<compile_context>
chip_gen: v7x
topology: tpu7x:2x2x1
jax: 0.10.0
libtpu: 0.0.40
codegen_flags: <defaults>
</compile_context>

<pallas_src>
import functools
import math

import jax
import jax.numpy as jnp
from jax import lax
from jax.experimental import pallas as pl
from jax.experimental.pallas import tpu as pltpu

_LANE = 128


def _round_up(x, m):
    return (x + m - 1) // m * m


# ---------------------------------------------------------------------------
# Static sub-pixel geometry (pure Python, trace time only).
# ---------------------------------------------------------------------------
def _phase_taps(k, s, p, r):
    """Kernel taps feeding output phase `r` (output index = s*q + r).

    Returns (khs, dhs): `khs` are flipped-conv kernel indices (ascending) and
    `dhs` the matching input offsets, i.e. output (s*q + r) reads input q + dh.
    """
    off = k - 1 - p
    khs = [kh for kh in range(k) if (kh + r - off) % s == 0]
    dhs = [(kh + r - off) // s for kh in khs]
    return tuple(khs), tuple(dhs)


def _conv_geometry(k, s, p, H, W):
    Ho = (H - 1) * s - 2 * p + k
    Wo = (W - 1) * s - 2 * p + k
    assert Ho > 0 and Wo > 0, "empty ConvTranspose2d output"
    Qh = -(-Ho // s)                     # per-phase output rows (uniform, padded)
    Qw = -(-Wo // s)
    taps = tuple(_phase_taps(k, s, p, r)[1] for r in range(s))
    all_d = [d for tl in taps for d in tl] or [0]
    pad_t = max(0, -min(all_d))
    pad_b = max(0, Qh - 1 + max(all_d) - (H - 1))
    pad_l = max(0, -min(all_d))
    pad_r = max(0, Qw - 1 + max(all_d) - (W - 1))
    return Ho, Wo, Qh, Qw, pad_t, pad_b, pad_l, pad_r, taps


def _build_phase_weights(w_pt, k, s, p, cout_pad):
    """PyTorch ConvTranspose2d weight (Cin, Cout, k, k) -> per-phase bf16
    matmul weights (s*s, K_max, cout_pad); im2col row order matches the patch
    built inside the kernel ((dh, dw) row-major, Cin fastest)."""
    cin, cout = int(w_pt.shape[0]), int(w_pt.shape[1])
    khs = [_phase_taps(k, s, p, r)[0] for r in range(s)]
    kmax = max(max(len(khs[rh]) * len(khs[rw]) for rw in range(s))
               for rh in range(s)) * cin
    kmax = max(kmax, 1)
    mats = []
    for rh in range(s):
        for rw in range(s):
            tap_mats = [w_pt[:, :, k - 1 - kh, k - 1 - kw]        # (cin, cout)
                        for kh in khs[rh] for kw in khs[rw]]
            if tap_mats:
                wph = jnp.concatenate(tap_mats, axis=0)           # (n_taps*cin, cout)
            else:
                wph = jnp.zeros((0, cout), w_pt.dtype)
            wph = jnp.pad(wph, ((0, kmax - wph.shape[0]), (0, cout_pad - cout)))
            mats.append(wph)
    return jnp.stack(mats, axis=0).astype(jnp.bfloat16)


# ---------------------------------------------------------------------------
# GroupNorm statistics kernel (tiny): per-channel sum / sum-of-squares.
# ---------------------------------------------------------------------------
def _gn_stats_kernel(x_ref, o_ref):
    x = x_ref[0].astype(jnp.float32)              # (H, W, C)
    o_ref[0, 0, :] = jnp.sum(x, axis=(0, 1))      # (C,)
    o_ref[0, 1, :] = jnp.sum(x * x, axis=(0, 1))


def group_norm_scale_shift(x_nhwc, gamma, beta, num_groups, eps=1e-5):
    """Per-(sample, channel) affine (scale, shift) implementing GroupNorm;
    applied inside the following conv kernel (fusion)."""
    N, H, W, C = x_nhwc.shape
    G = num_groups
    assert C % G == 0, "GroupNorm requires in_channels % num_groups == 0"
    Cg = C // G
    stats = pl.pallas_call(
        _gn_stats_kernel,
        out_shape=jax.ShapeDtypeStruct((N, 2, C), jnp.float32),
        grid=(N,),
        in_specs=[pl.BlockSpec((1, H, W, C), lambda n: (n, 0, 0, 0))],
        out_specs=pl.BlockSpec((1, 2, C), lambda n: (n, 0, 0)),
        compiler_params=pltpu.CompilerParams(dimension_semantics=("parallel",)),
    )(x_nhwc)
    cnt = float(Cg * H * W)
    gsum = stats[:, 0, :].reshape(N, G, Cg).sum(-1)     # (N, G)
    gsq = stats[:, 1, :].reshape(N, G, Cg).sum(-1)
    mean = gsum / cnt
    var = gsq / cnt - mean * mean                       # biased, like torch
    inv = lax.rsqrt(var + eps)
    mean_c = jnp.repeat(mean, Cg, axis=1)               # (N, C)
    inv_c = jnp.repeat(inv, Cg, axis=1)
    scale = inv_c * gamma[None, :]
    shift = beta[None, :] - mean_c * scale
    return scale, shift


# ---------------------------------------------------------------------------
# Fused GroupNorm-apply + sub-pixel ConvTranspose2d + bias + activation.
# Grid over batch; one sample per step.
# ---------------------------------------------------------------------------
def _upconv_kernel(x_ref, scale_ref, shift_ref, w_ref, b_ref, o_ref, xpad_ref, *,
                   s, H, W, Ho, Wo, Qh, Qw, pad_t, pad_l, taps, cin, cout_pad,
                   activation):
    # 1) fused GroupNorm-apply, cast to bf16, zero-padded into VMEM scratch.
    xpad_ref[...] = jnp.zeros_like(xpad_ref)
    x = x_ref[0].astype(jnp.float32)                           # (H, W, Cin)
    scale = scale_ref[0, 0].astype(jnp.float32)                # (Cin,)
    shift = shift_ref[0, 0].astype(jnp.float32)
    xn = x * scale[None, None, :] + shift[None, None, :]
    xpad_ref[pad_t:pad_t + H, pad_l:pad_l + W, :] = xn.astype(xpad_ref.dtype)

    bias = b_ref[0].astype(jnp.float32)                        # (cout_pad,)

    # 2) per output phase: one stride-1 conv as a single big-K MXU matmul.
    phase_out = []
    for rh in range(s):
        dhs = taps[rh]
        row = []
        for rw in range(s):
            dws = taps[rw]
            n_taps = len(dhs) * len(dws)
            if n_taps == 0:
                acc = jnp.zeros((Qh * Qw, cout_pad), jnp.float32)
            else:
                cols = []
                for dh in dhs:
                    for dw in dws:
                        blk = xpad_ref[pad_t + dh:pad_t + dh + Qh,
                                       pad_l + dw:pad_l + dw + Qw, :]
                        cols.append(blk.reshape(Qh * Qw, cin))
                patch = cols[0] if len(cols) == 1 else jnp.concatenate(cols, axis=-1)
                wph = w_ref[rh * s + rw, :n_taps * cin, :]     # (K, cout_pad) bf16
                acc = jnp.dot(patch, wph, preferred_element_type=jnp.float32)
            acc = acc + bias[None, :]
            if activation == "relu":
                acc = jnp.maximum(acc, 0.0)
            else:  # tanh
                acc = jnp.tanh(acc)
            row.append(acc.reshape(Qh, Qw, cout_pad).astype(o_ref.dtype))
        phase_out.append(row)

    # 3) sub-pixel interleave of the s*s phases -> (Ho, Wo, cout_pad).
    if s == 1:
        full = phase_out[0][0]
    else:
        rows = []
        for rh in range(s):
            r = jnp.stack(phase_out[rh], axis=2)               # (Qh, Qw, s, Cp)
            rows.append(r.reshape(Qh, Qw * s, cout_pad))
        full = jnp.stack(rows, axis=1).reshape(Qh * s, Qw * s, cout_pad)
    o_ref[0] = full[:Ho, :Wo, :]


def up_conv_nhwc(x_nhwc, blk, scale_nc, shift_nc):
    N, H, W, Cin = x_nhwc.shape
    k, s, p = blk["kernel"], blk["stride"], blk["padding"]
    w_phase, b_pad = blk["w_phase"], blk["b_pad"]
    cout_pad = int(w_phase.shape[-1])
    Ho, Wo, Qh, Qw, pad_t, pad_b, pad_l, pad_r, taps = _conv_geometry(k, s, p, H, W)
    Hp, Wp = H + pad_t + pad_b, W + pad_l + pad_r

    kernel = functools.partial(
        _upconv_kernel, s=s, H=H, W=W, Ho=Ho, Wo=Wo, Qh=Qh, Qw=Qw,
        pad_t=pad_t, pad_l=pad_l, taps=taps, cin=Cin, cout_pad=cout_pad,
        activation=blk["activation"])

    return pl.pallas_call(
        kernel,
        out_shape=jax.ShapeDtypeStruct((N, Ho, Wo, cout_pad), x_nhwc.dtype),
        grid=(N,),
        in_specs=[
            pl.BlockSpec((1, H, W, Cin), lambda n: (n, 0, 0, 0)),
            pl.BlockSpec((1, 1, Cin), lambda n: (n, 0, 0)),
            pl.BlockSpec((1, 1, Cin), lambda n: (n, 0, 0)),
            pl.BlockSpec(w_phase.shape, lambda n: (0, 0, 0)),
            pl.BlockSpec((1, cout_pad), lambda n: (0, 0)),
        ],
        out_specs=pl.BlockSpec((1, Ho, Wo, cout_pad), lambda n: (n, 0, 0, 0)),
        scratch_shapes=[pltpu.VMEM((Hp, Wp, Cin), jnp.bfloat16)],
        compiler_params=pltpu.CompilerParams(dimension_semantics=("parallel",)),
    )(x_nhwc, scale_nc.reshape(N, 1, Cin), shift_nc.reshape(N, 1, Cin),
      w_phase, b_pad)


# ---------------------------------------------------------------------------
# Decoder: parameter construction + forward pass (NCHW in / NCHW out).
# ---------------------------------------------------------------------------
def init_decoder_params(key, *, in_channels, up_out_channels, kernels, strides,
                        paddings, do_batch_norms, activations, num_groups=32):
    n = len(up_out_channels)
    kernels = (kernels,) * n if isinstance(kernels, int) else tuple(kernels)
    strides = (strides,) * n if isinstance(strides, int) else tuple(strides)
    paddings = (paddings,) * n if isinstance(paddings, int) else tuple(paddings)
    do_batch_norms = ((do_batch_norms,) * n if isinstance(do_batch_norms, bool)
                      else tuple(do_batch_norms))
    activations = ((activations,) * n if isinstance(activations, str)
                   else tuple(activations))

    blocks = []
    cin = in_channels
    for i in range(n):
        act = activations[i].lower()
        if act not in ("relu", "tanh"):
            raise NotImplementedError("`activation` must be `relu` or `tanh`")
        cout, k, s, p = up_out_channels[i], kernels[i], strides[i], paddings[i]
        assert k - 1 - p >= 0, "negative effective padding not supported"
        key, kw_key, kb_key, kg_key, kbeta_key = jax.random.split(key, 5)
        fan = cout * k * k                     # ConvTranspose2d fan_in convention
        bound = 1.0 / math.sqrt(fan)
        w = jax.random.uniform(kw_key, (cin, cout, k, k), jnp.float32, -bound, bound)
        b = jax.random.uniform(kb_key, (cout,), jnp.float32, -bound, bound)

        is_last = i == n - 1
        cout_pad = _round_up(cout, _LANE) if (is_last and cout % _LANE) else cout
        blk = dict(kernel=k, stride=s, padding=p, activation=act,
                   do_norm=do_batch_norms[i], num_groups=num_groups,
                   cout=cout, cout_pad=cout_pad, w=w, b=b,
                   w_phase=_build_phase_weights(w, k, s, p, cout_pad),
                   b_pad=jnp.zeros((1, cout_pad), jnp.float32).at[0, :cout].set(b))
        if do_batch_norms[i]:
            blk["gamma"] = 1.0 + 0.1 * jax.random.normal(kg_key, (cin,), jnp.float32)
            blk["beta"] = 0.1 * jax.random.normal(kbeta_key, (cin,), jnp.float32)
        blocks.append(blk)
        cin = cout
    return blocks


def decoder_forward(blocks, x_nchw):
    x = jnp.transpose(x_nchw, (0, 2, 3, 1))          # NCHW -> NHWC (once)
    for blk in blocks:
        N, H, W, C = x.shape
        if blk["do_norm"]:
            scale, shift = group_norm_scale_shift(
                x, blk["gamma"], blk["beta"], blk["num_groups"])
        else:
            scale = jnp.ones((N, C), jnp.float32)
            shift = jnp.zeros((N, C), jnp.float32)
        x = up_conv_nhwc(x, blk, scale, shift)
    x = x[..., :blocks[-1]["cout"]]                  # drop lane padding (last block)
    return jnp.transpose(x, (0, 3, 1, 2))            # NHWC -> NCHW (once)


# ---------------------------------------------------------------------------
# Pure-JAX reference (verification only).
# ---------------------------------------------------------------------------
def _ref_forward(blocks, x_nchw):
    x = x_nchw
    for blk in blocks:
        if blk["do_norm"]:
            N, C, H, W = x.shape
            G = blk["num_groups"]
            xr = x.reshape(N, G, C // G * H * W)
            mean = xr.mean(-1, keepdims=True)
            var = ((xr - mean) ** 2).mean(-1, keepdims=True)
            xr = (xr - mean) / jnp.sqrt(var + 1e-5)
            x = xr.reshape(N, C, H, W)
            x = x * blk["gamma"][None, :, None, None] + blk["beta"][None, :, None, None]
        k, s, p = blk["kernel"], blk["stride"], blk["padding"]
        w_oihw = jnp.transpose(blk["w"][:, :, ::-1, ::-1], (1, 0, 2, 3))
        y = lax.conv_general_dilated(
            x, w_oihw, window_strides=(1, 1),
            padding=[(k - 1 - p, k - 1 - p)] * 2, lhs_dilation=(s, s),
            dimension_numbers=("NCHW", "OIHW", "NCHW"))
        y = y + blk["b"][None, :, None, None]
        x = jnp.maximum(y, 0.0) if blk["activation"] == "relu" else jnp.tanh(y)
    return x


if __name__ == "__main__":
    key = jax.random.PRNGKey(0)
    pkey, xkey = jax.random.split(key)

    # Small config: in_channels=32 so default GroupNorm(num_groups=32) divides.
    blocks = init_decoder_params(
        pkey,
        in_channels=32,
        up_out_channels=(32, 3),
        kernels=4, strides=2, paddings=1,
        do_batch_norms=True,
        activations=("relu", "tanh"),
    )

    x = jax.random.normal(xkey, (2, 32, 4, 4), jnp.float32)  # NCHW, like PyTorch

    fwd = jax.jit(lambda v: decoder_forward(blocks, v))
    out = jax.block_until_ready(fwd(x))
    assert out.shape == (2, 3, 16, 16), out.shape

    ref = jax.block_until_ready(_ref_forward(blocks, x))
    err = float(jnp.max(jnp.abs(out - ref)))
    # bf16 MXU inputs with f32 accumulation -> small numerical delta vs f32 ref.
    assert err < 5e-2, err

    print("KERNEL_OK")
</pallas_src>

<mosaic_0001>
module attributes {stable_mosaic.version = 11 : i64} {
  func.func @_gn_stats_kernel(%arg0: i32, %arg1: memref<1x8x8x32xf32, #tpu.memory_space<vmem>>, %arg2: memref<1x2x32xf32, #tpu.memory_space<vmem>>) attributes {dimension_semantics = [#tpu.dimension_semantics<parallel>], iteration_bounds = array<i64: 2>, scalar_prefetch = 0 : i64, scratch_operands = 0 : i64, tpu.core_type = #tpu.core_type<tc>, window_params = [{transform_indices = @transform_0, window_bounds = array<i64: 1, 8, 8, 32>}, {transform_indices = @transform_1, window_bounds = array<i64: 1, 2, 32>}]} {
    %c0 = arith.constant 0 : index
    %c0_0 = arith.constant 0 : index
    %c0_1 = arith.constant 0 : index
    %c0_2 = arith.constant 0 : index
    %0 = vector.load %arg1[%c0, %c0_0, %c0_1, %c0_2] : memref<1x8x8x32xf32, #tpu.memory_space<vmem>>, vector<1x8x8x32xf32>
    %1 = vector.shape_cast %0 : vector<1x8x8x32xf32> to vector<8x8x32xf32>
    %cst = arith.constant dense<0.000000e+00> : vector<32xf32>
    %2 = vector.multi_reduction <add>, %1, %cst [0, 1] : vector<8x8x32xf32> to vector<32xf32>
    %c0_3 = arith.constant 0 : index
    %c0_4 = arith.constant 0 : index
    %c0_5 = arith.constant 0 : index
    %3 = vector.load %arg2[%c0_3, %c0_4, %c0_5] : memref<1x2x32xf32, #tpu.memory_space<vmem>>, vector<1x1x32xf32>
    %4 = vector.shape_cast %3 : vector<1x1x32xf32> to vector<32xf32>
    %5 = vector.shape_cast %2 : vector<32xf32> to vector<1x1x32xf32>
    tpu.vector_store %arg2[%c0_3, %c0_4, %c0_5], %5 {strides = array<i32>} : memref<1x2x32xf32, #tpu.memory_space<vmem>>, vector<1x1x32xf32>,
    %6 = arith.mulf %1, %1 : vector<8x8x32xf32>
    %cst_6 = arith.constant dense<0.000000e+00> : vector<32xf32>
    %7 = vector.multi_reduction <add>, %6, %cst_6 [0, 1] : vector<8x8x32xf32> to vector<32xf32>
    %c0_7 = arith.constant 0 : index
    %c1 = arith.constant 1 : index
    %c0_8 = arith.constant 0 : index
    %8 = vector.load %arg2[%c0_7, %c1, %c0_8] : memref<1x2x32xf32, #tpu.memory_space<vmem>>, vector<1x1x32xf32>
    %9 = vector.shape_cast %8 : vector<1x1x32xf32> to vector<32xf32>
    %10 = vector.shape_cast %7 : vector<32xf32> to vector<1x1x32xf32>
    tpu.vector_store %arg2[%c0_7, %c1, %c0_8], %10 {strides = array<i32>} : memref<1x2x32xf32, #tpu.memory_space<vmem>>, vector<1x1x32xf32>,
    return
  }
  func.func @transform_0(%arg0: i32) -> (i32, i32, i32, i32) {
    %c0_i32 = arith.constant 0 : i32
    %c0_i32_0 = arith.constant 0 : i32
    %c0_i32_1 = arith.constant 0 : i32
    %c0_i32_2 = arith.constant 0 : i32
    return %arg0, %c0_i32, %c0_i32_0, %c0_i32_1 : i32, i32, i32, i32
  }
  func.func @transform_1(%arg0: i32) -> (i32, i32, i32) {
    %c0_i32 = arith.constant 0 : i32
    %c0_i32_0 = arith.constant 0 : i32
    %c0_i32_1 = arith.constant 0 : i32
    return %arg0, %c0_i32, %c0_i32_0 : i32, i32, i32
  }
}

module attributes {stable_mosaic.version = 11 : i64} {
  func.func @_upconv_kernel(%arg0: i32, %arg1: memref<1x4x4x32xf32, #tpu.memory_space<vmem>>, %arg2: memref<1x1x32xf32, #tpu.memory_space<vmem>>, %arg3: memref<1x1x32xf32, #tpu.memory_space<vmem>>, %arg4: memref<4x128x32xbf16, #tpu.memory_space<vmem>>, %arg5: memref<1x32xf32, #tpu.memory_space<vmem>>, %arg6: memref<1x8x8x32xf32, #tpu.memory_space<vmem>>, %arg7: memref<6x6x32xbf16, #tpu.memory_space<vmem>>) attributes {dimension_semantics = [#tpu.dimension_semantics<parallel>], iteration_bounds = array<i64: 2>, scalar_prefetch = 0 : i64, scratch_operands = 1 : i64, tpu.core_type = #tpu.core_type<tc>, window_params = [{transform_indices = @transform_0, window_bounds = array<i64: 1, 4, 4, 32>}, {transform_indices = @transform_1, window_bounds = array<i64: 1, 1, 32>}, {transform_indices = @transform_2, window_bounds = array<i64: 1, 1, 32>}, {pipeline_mode = #tpu.pipeline_mode<synchronous>, transform_indices = @transform_3, window_bounds = array<i64: 4, 128, 32>}, {pipeline_mode = #tpu.pipeline_mode<synchronous>, transform_indices = @transform_4, window_bounds = array<i64: 1, 32>}, {transform_indices = @transform_5, window_bounds = array<i64: 1, 8, 8, 32>}]} {
    %cst = arith.constant 0.000000e+00 : bf16
    %0 = vector.broadcast %cst : bf16 to vector<6x6x32xbf16>
    %c0 = arith.constant 0 : index
    %c0_0 = arith.constant 0 : index
    %c0_1 = arith.constant 0 : index
    %1 = vector.load %arg7[%c0, %c0_0, %c0_1] : memref<6x6x32xbf16, #tpu.memory_space<vmem>>, vector<6x6x32xbf16>
    tpu.vector_store %arg7[%c0, %c0_0, %c0_1], %0 {strides = array<i32>} : memref<6x6x32xbf16, #tpu.memory_space<vmem>>, vector<6x6x32xbf16>,
    %c0_2 = arith.constant 0 : index
    %c0_3 = arith.constant 0 : index
    %c0_4 = arith.constant 0 : index
    %c0_5 = arith.constant 0 : index
    %2 = vector.load %arg1[%c0_2, %c0_3, %c0_4, %c0_5] : memref<1x4x4x32xf32, #tpu.memory_space<vmem>>, vector<1x4x4x32xf32>
    %3 = vector.shape_cast %2 : vector<1x4x4x32xf32> to vector<4x4x32xf32>
    %c0_6 = arith.constant 0 : index
    %c0_7 = arith.constant 0 : index
    %c0_8 = arith.constant 0 : index
    %4 = vector.load %arg2[%c0_6, %c0_7, %c0_8] : memref<1x1x32xf32, #tpu.memory_space<vmem>>, vector<1x1x32xf32>
    %5 = vector.shape_cast %4 : vector<1x1x32xf32> to vector<32xf32>
    %c0_9 = arith.constant 0 : index
    %c0_10 = arith.constant 0 : index
    %c0_11 = arith.constant 0 : index
    %6 = vector.load %arg3[%c0_9, %c0_10, %c0_11] : memref<1x1x32xf32, #tpu.memory_space<vmem>>, vector<1x1x32xf32>
    %7 = vector.shape_cast %6 : vector<1x1x32xf32> to vector<32xf32>
    %8 = vector.shape_cast %5 : vector<32xf32> to vector<1x1x32xf32>
    %9 = vector.broadcast %8 : vector<1x1x32xf32> to vector<4x4x32xf32>
    %10 = arith.mulf %3, %9 : vector<4x4x32xf32>
    %11 = vector.shape_cast %7 : vector<32xf32> to vector<1x1x32xf32>
    %12 = vector.broadcast %11 : vector<1x1x32xf32> to vector<4x4x32xf32>
    %13 = arith.addf %10, %12 : vector<4x4x32xf32>
    %14 = arith.truncf %13 : vector<4x4x32xf32> to vector<4x4x32xbf16>
    %c1 = arith.constant 1 : index
    %c1_12 = arith.constant 1 : index
    %c0_13 = arith.constant 0 : index
    %15 = vector.load %arg7[%c1, %c1_12, %c0_13] : memref<6x6x32xbf16, #tpu.memory_space<vmem>>, vector<4x4x32xbf16>
    tpu.vector_store %arg7[%c1, %c1_12, %c0_13], %14 {strides = array<i32>} : memref<6x6x32xbf16, #tpu.memory_space<vmem>>, vector<4x4x32xbf16>,
    %c0_14 = arith.constant 0 : index
    %c0_15 = arith.constant 0 : index
    %16 = vector.load %arg5[%c0_14, %c0_15] : memref<1x32xf32, #tpu.memory_space<vmem>>, vector<1x32xf32>
    %17 = vector.shape_cast %16 : vector<1x32xf32> to vector<32xf32>
    %c0_16 = arith.constant 0 : index
    %c0_17 = arith.constant 0 : index
    %c0_18 = arith.constant 0 : index
    %18 = vector.load %arg7[%c0_16, %c0_17, %c0_18] : memref<6x6x32xbf16, #tpu.memory_space<vmem>>, vector<4x4x32xbf16>
    %19 = vector.shape_cast %18 : vector<4x4x32xbf16> to vector<16x32xbf16>
    %c0_19 = arith.constant 0 : index
    %c1_20 = arith.constant 1 : index
    %c0_21 = arith.constant 0 : index
    %20 = vector.load %arg7[%c0_19, %c1_20, %c0_21] : memref<6x6x32xbf16, #tpu.memory_space<vmem>>, vector<4x4x32xbf16>
    %21 = vector.shape_cast %20 : vector<4x4x32xbf16> to vector<16x32xbf16>
    %c1_22 = arith.constant 1 : index
    %c0_23 = arith.constant 0 : index
    %c0_24 = arith.constant 0 : index
    %22 = vector.load %arg7[%c1_22, %c0_23, %c0_24] : memref<6x6x32xbf16, #tpu.memory_space<vmem>>, vector<4x4x32xbf16>
    %23 = vector.shape_cast %22 : vector<4x4x32xbf16> to vector<16x32xbf16>
    %c1_25 = arith.constant 1 : index
    %c1_26 = arith.constant 1 : index
    %c0_27 = arith.constant 0 : index
    %24 = vector.load %arg7[%c1_25, %c1_26, %c0_27] : memref<6x6x32xbf16, #tpu.memory_space<vmem>>, vector<4x4x32xbf16>
    %25 = vector.shape_cast %24 : vector<4x4x32xbf16> to vector<16x32xbf16>
    %26 = tpu.concatenate %19, %21, %23, %25 in 1 : vector<16x32xbf16>, vector<16x32xbf16>, vector<16x32xbf16>, vector<16x32xbf16> -> vector<16x128xbf16>
    %c0_28 = arith.constant 0 : index
    %c0_29 = arith.constant 0 : index
    %c0_30 = arith.constant 0 : index
    %27 = vector.load %arg4[%c0_28, %c0_29, %c0_30] : memref<4x128x32xbf16, #tpu.memory_space<vmem>>, vector<1x128x32xbf16>
    %28 = vector.shape_cast %27 : vector<1x128x32xbf16> to vector<128x32xbf16>
    %cst_31 = arith.constant dense<0.000000e+00> : vector<16x32xf32>
    %29 = tpu.matmul %26, %28, %cst_31 {dimension_numbers = #tpu.dot_dimension_numbers<[1], [0], [0], [1], [0, 0, 1, 1], [], []>} : vector<16x128xbf16>, vector<128x32xbf16>, vector<16x32xf32> -> vector<16x32xf32>
    %30 = vector.shape_cast %17 : vector<32xf32> to vector<1x32xf32>
    %31 = vector.broadcast %30 : vector<1x32xf32> to vector<16x32xf32>
    %32 = arith.addf %29, %31 : vector<16x32xf32>
    %cst_32 = arith.constant 0.000000e+00 : f32
    %33 = vector.broadcast %cst_32 : f32 to vector<16x32xf32>
    %34 = arith.maximumf %32, %33 : vector<16x32xf32>
    %35 = vector.shape_cast %34 : vector<16x32xf32> to vector<4x4x32xf32>
    %c0_33 = arith.constant 0 : index
    %c1_34 = arith.constant 1 : index
    %c0_35 = arith.constant 0 : index
    %36 = vector.load %arg7[%c0_33, %c1_34, %c0_35] : memref<6x6x32xbf16, #tpu.memory_space<vmem>>, vector<4x4x32xbf16>
    %37 = vector.shape_cast %36 : vector<4x4x32xbf16> to vector<16x32xbf16>
    %c0_36 = arith.constant 0 : index
    %c2 = arith.constant 2 : index
    %c0_37 = arith.constant 0 : index
    %38 = vector.load %arg7[%c0_36, %c2, %c0_37] : memref<6x6x32xbf16, #tpu.memory_space<vmem>>, vector<4x4x32xbf16>
    %39 = vector.shape_cast %38 : vector<4x4x32xbf16> to vector<16x32xbf16>
    %c1_38 = arith.constant 1 : index
    %c1_39 = arith.constant 1 : index
    %c0_40 = arith.constant 0 : index
    %40 = vector.load %arg7[%c1_38, %c1_39, %c0_40] : memref<6x6x32xbf16, #tpu.memory_space<vmem>>, vector<4x4x32xbf16>
    %41 = vector.shape_cast %40 : vector<4x4x32xbf16> to vector<16x32xbf16>
    %c1_41 = arith.constant 1 : index
    %c2_42 = arith.constant 2 : index
    %c0_43 = arith.constant 0 : index
    %42 = vector.load %arg7[%c1_41, %c2_42, %c0_43] : memref<6x6x32xbf16, #tpu.memory_space<vmem>>, vector<4x4x32xbf16>
    %43 = vector.shape_cast %42 : vector<4x4x32xbf16> to vector<16x32xbf16>
    %44 = tpu.concatenate %37, %39, %41, %43 in 1 : vector<16x32xbf16>, vector<16x32xbf16>, vector<16x32xbf16>, vector<16x32xbf16> -> vector<16x128xbf16>
    %c1_44 = arith.constant 1 : index
    %c0_45 = arith.constant 0 : index
    %c0_46 = arith.constant 0 : index
    %45 = vector.load %arg4[%c1_44, %c0_45, %c0_46] : memref<4x128x32xbf16, #tpu.memory_space<vmem>>, vector<1x128x32xbf16>
    %46 = vector.shape_cast %45 : vector<1x128x32xbf16> to vector<128x32xbf16>
    %cst_47 = arith.constant dense<0.000000e+00> : vector<16x32xf32>
    %47 = tpu.matmul %44, %46, %cst_47 {dimension_numbers = #tpu.dot_dimension_numbers<[1], [0], [0], [1], [0, 0, 1, 1], [], []>} : vector<16x128xbf16>, vector<128x32xbf16>, vector<16x32xf32> -> vector<16x32xf32>
    %48 = vector.shape_cast %17 : vector<32xf32> to vector<1x32xf32>
    %49 = vector.broadcast %48 : vector<1x32xf32> to vector<16x32xf32>
    %50 = arith.addf %47, %49 : vector<16x32xf32>
    %cst_48 = arith.constant 0.000000e+00 : f32
    %51 = vector.broadcast %cst_48 : f32 to vector<16x32xf32>
    %52 = arith.maximumf %50, %51 : vector<16x32xf32>
    %53 = vector.shape_cast %52 : vector<16x32xf32> to vector<4x4x32xf32>
    %c1_49 = arith.constant 1 : index
    %c0_50 = arith.constant 0 : index
    %c0_51 = arith.constant 0 : index
    %54 = vector.load %arg7[%c1_49, %c0_50, %c0_51] : memref<6x6x32xbf16, #tpu.memory_space<vmem>>, vector<4x4x32xbf16>
    %55 = vector.shape_cast %54 : vector<4x4x32xbf16> to vector<16x32xbf16>
    %c1_52 = arith.constant 1 : index
    %c1_53 = arith.constant 1 : index
    %c0_54 = arith.constant 0 : index
    %56 = vector.load %arg7[%c1_52, %c1_53, %c0_54] : memref<6x6x32xbf16, #tpu.memory_space<vmem>>, vector<4x4x32xbf16>
    %57 = vector.shape_cast %56 : vector<4x4x32xbf16> to vector<16x32xbf16>
    %c2_55 = arith.constant 2 : index
    %c0_56 = arith.constant 0 : index
    %c0_57 = arith.constant 0 : index
    %58 = vector.load %arg7[%c2_55, %c0_56, %c0_57] : memref<6x6x32xbf16, #tpu.memory_space<vmem>>, vector<4x4x32xbf16>
    %59 = vector.shape_cast %58 : vector<4x4x32xbf16> to vector<16x32xbf16>
    %c2_58 = arith.constant 2 : index
    %c1_59 = arith.constant 1 : index
    %c0_60 = arith.constant 0 : index
    %60 = vector.load %arg7[%c2_58, %c1_59, %c0_60] : memref<6x6x32xbf16, #tpu.memory_space<vmem>>, vector<4x4x32xbf16>
    %61 = vector.shape_cast %60 : vector<4x4x32xbf16> to vector<16x32xbf16>
    %62 = tpu.concatenate %55, %57, %59, %61 in 1 : vector<16x32xbf16>, vector<16x32xbf16>, vector<16x32xbf16>, vector<16x32xbf16> -> vector<16x128xbf16>
    %c2_61 = arith.constant 2 : index
    %c0_62 = arith.constant 0 : index
    %c0_63 = arith.constant 0 : index
    %63 = vector.load %arg4[%c2_61, %c0_62, %c0_63] : memref<4x128x32xbf16, #tpu.memory_space<vmem>>, vector<1x128x32xbf16>
    %64 = vector.shape_cast %63 : vector<1x128x32xbf16> to vector<128x32xbf16>
    %cst_64 = arith.constant dense<0.000000e+00> : vector<16x32xf32>
    %65 = tpu.matmul %62, %64, %cst_64 {dimension_numbers = #tpu.dot_dimension_numbers<[1], [0], [0], [1], [0, 0, 1, 1], [], []>} : vector<16x128xbf16>, vector<128x32xbf16>, vector<16x32xf32> -> vector<16x32xf32>
    %66 = vector.shape_cast %17 : vector<32xf32> to vector<1x32xf32>
    %67 = vector.broadcast %66 : vector<1x32xf32> to vector<16x32xf32>
    %68 = arith.addf %65, %67 : vector<16x32xf32>
    %cst_65 = arith.constant 0.000000e+00 : f32
    %69 = vector.broadcast %cst_65 : f32 to vector<16x32xf32>
    %70 = arith.maximumf %68, %69 : vector<16x32xf32>
    %71 = vector.shape_cast %70 : vector<16x32xf32> to vector<4x4x32xf32>
    %c1_66 = arith.constant 1 : index
    %c1_67 = arith.constant 1 : index
    %c0_68 = arith.constant 0 : index
    %72 = vector.load %arg7[%c1_66, %c1_67, %c0_68] : memref<6x6x32xbf16, #tpu.memory_space<vmem>>, vector<4x4x32xbf16>
    %73 = vector.shape_cast %72 : vector<4x4x32xbf16> to vector<16x32xbf16>
    %c1_69 = arith.constant 1 : index
    %c2_70 = arith.constant 2 : index
    %c0_71 = arith.constant 0 : index
    %74 = vector.load %arg7[%c1_69, %c2_70, %c0_71] : memref<6x6x32xbf16, #tpu.memory_space<vmem>>, vector<4x4x32xbf16>
    %75 = vector.shape_cast %74 : vector<4x4x32xbf16> to vector<16x32xbf16>
    %c2_72 = arith.constant 2 : index
    %c1_73 = arith.constant 1 : index
    %c0_74 = arith.constant 0 : index
    %76 = vector.load %arg7[%c2_72, %c1_73, %c0_74] : memref<6x6x32xbf16, #tpu.memory_space<vmem>>, vector<4x4x32xbf16>
    %77 = vector.shape_cast %76 : vector<4x4x32xbf16> to vector<16x32xbf16>
    %c2_75 = arith.constant 2 : index
    %c2_76 = arith.constant 2 : index
    %c0_77 = arith.constant 0 : index
    %78 = vector.load %arg7[%c2_75, %c2_76, %c0_77] : memref<6x6x32xbf16, #tpu.memory_space<vmem>>, vector<4x4x32xbf16>
    %79 = vector.shape_cast %78 : vector<4x4x32xbf16> to vector<16x32xbf16>
    %80 = tpu.concatenate %73, %75, %77, %79 in 1 : vector<16x32xbf16>, vector<16x32xbf16>, vector<16x32xbf16>, vector<16x32xbf16> -> vector<16x128xbf16>
    %c3 = arith.constant 3 : index
    %c0_78 = arith.constant 0 : index
    %c0_79 = arith.constant 0 : index
    %81 = vector.load %arg4[%c3, %c0_78, %c0_79] : memref<4x128x32xbf16, #tpu.memory_space<vmem>>, vector<1x128x32xbf16>
    %82 = vector.shape_cast %81 : vector<1x128x32xbf16> to vector<128x32xbf16>
    %cst_80 = arith.constant dense<0.000000e+00> : vector<16x32xf32>
    %83 = tpu.matmul %80, %82, %cst_80 {dimension_numbers = #tpu.dot_dimension_numbers<[1], [0], [0], [1], [0, 0, 1, 1], [], []>} : vector<16x128xbf16>, vector<128x32xbf16>, vector<16x32xf32> -> vector<16x32xf32>
    %84 = vector.shape_cast %17 : vector<32xf32> to vector<1x32xf32>
    %85 = vector.broadcast %84 : vector<1x32xf32> to vector<16x32xf32>
    %86 = arith.addf %83, %85 : vector<16x32xf32>
    %cst_81 = arith.constant 0.000000e+00 : f32
    %87 = vector.broadcast %cst_81 : f32 to vector<16x32xf32>
    %88 = arith.maximumf %86, %87 : vector<16x32xf32>
    %89 = vector.shape_cast %88 : vector<16x32xf32> to vector<4x4x32xf32>
    %90 = vector.shape_cast %35 : vector<4x4x32xf32> to vector<4x4x1x32xf32>
    %91 = vector.shape_cast %53 : vector<4x4x32xf32> to vector<4x4x1x32xf32>
    %92 = tpu.concatenate %90, %91 in 2 : vector<4x4x1x32xf32>, vector<4x4x1x32xf32> -> vector<4x4x2x32xf32>
    %93 = vector.shape_cast %92 : vector<4x4x2x32xf32> to vector<4x8x32xf32>
    %94 = vector.shape_cast %71 : vector<4x4x32xf32> to vector<4x4x1x32xf32>
    %95 = vector.shape_cast %89 : vector<4x4x32xf32> to vector<4x4x1x32xf32>
    %96 = tpu.concatenate %94, %95 in 2 : vector<4x4x1x32xf32>, vector<4x4x1x32xf32> -> vector<4x4x2x32xf32>
    %97 = vector.shape_cast %96 : vector<4x4x2x32xf32> to vector<4x8x32xf32>
    %98 = vector.shape_cast %93 : vector<4x8x32xf32> to vector<4x1x8x32xf32>
    %99 = vector.shape_cast %97 : vector<4x8x32xf32> to vector<4x1x8x32xf32>
    %100 = tpu.concatenate %98, %99 in 1 : vector<4x1x8x32xf32>, vector<4x1x8x32xf32> -> vector<4x2x8x32xf32>
    %101 = vector.shape_cast %100 : vector<4x2x8x32xf32> to vector<8x8x32xf32>
    %c0_82 = arith.constant 0 : index
    %c0_83 = arith.constant 0 : index
    %c0_84 = arith.constant 0 : index
    %c0_85 = arith.constant 0 : index
    %102 = vector.load %arg6[%c0_82, %c0_83, %c0_84, %c0_85] : memref<1x8x8x32xf32, #tpu.memory_space<vmem>>, vector<1x8x8x32xf32>
    %103 = vector.shape_cast %102 : vector<1x8x8x32xf32> to vector<8x8x32xf32>
    %104 = vector.shape_cast %101 : vector<8x8x32xf32> to vector<1x8x8x32xf32>
    tpu.vector_store %arg6[%c0_82, %c0_83, %c0_84, %c0_85], %104 {strides = array<i32>} : memref<1x8x8x32xf32, #tpu.memory_space<vmem>>, vector<1x8x8x32xf32>,
    return
  }
  func.func @transform_0(%arg0: i32) -> (i32, i32, i32, i32) {
    %c0_i32 = arith.constant 0 : i32
    %c0_i32_0 = arith.constant 0 : i32
    %c0_i32_1 = arith.constant 0 : i32
    %c0_i32_2 = arith.constant 0 : i32
    return %arg0, %c0_i32, %c0_i32_0, %c0_i32_1 : i32, i32, i32, i32
  }
  func.func @transform_1(%arg0: i32) -> (i32, i32, i32) {
    %c0_i32 = arith.constant 0 : i32
    %c0_i32_0 = arith.constant 0 : i32
    %c0_i32_1 = arith.constant 0 : i32
    return %arg0, %c0_i32, %c0_i32_0 : i32, i32, i32
  }
  func.func @transform_2(%arg0: i32) -> (i32, i32, i32) {
    %c0_i32 = arith.constant 0 : i32
    %c0_i32_0 = arith.constant 0 : i32
    %c0_i32_1 = arith.constant 0 : i32
    return %arg0, %c0_i32, %c0_i32_0 : i32, i32, i32
  }
  func.func @transform_3(%arg0: i32) -> (i32, i32, i32) {
    %c0_i32 = arith.constant 0 : i32
    %c0_i32_0 = arith.constant 0 : i32
    %c0_i32_1 = arith.constant 0 : i32
    %c0_i32_2 = arith.constant 0 : i32
    return %c0_i32, %c0_i32_0, %c0_i32_1 : i32, i32, i32
  }
  func.func @transform_4(%arg0: i32) -> (i32, i32) {
    %c0_i32 = arith.constant 0 : i32
    %c0_i32_0 = arith.constant 0 : i32
    %c0_i32_1 = arith.constant 0 : i32
    return %c0_i32, %c0_i32_0 : i32, i32
  }
  func.func @transform_5(%arg0: i32) -> (i32, i32, i32, i32) {
    %c0_i32 = arith.constant 0 : i32
    %c0_i32_0 = arith.constant 0 : i32
    %c0_i32_1 = arith.constant 0 : i32
    %c0_i32_2 = arith.constant 0 : i32
    return %arg0, %c0_i32, %c0_i32_0, %c0_i32_1 : i32, i32, i32, i32
  }
}

module attributes {stable_mosaic.version = 11 : i64} {
  func.func @_gn_stats_kernel(%arg0: i32, %arg1: memref<1x4x4x32xf32, #tpu.memory_space<vmem>>, %arg2: memref<1x2x32xf32, #tpu.memory_space<vmem>>) attributes {dimension_semantics = [#tpu.dimension_semantics<parallel>], iteration_bounds = array<i64: 2>, scalar_prefetch = 0 : i64, scratch_operands = 0 : i64, tpu.core_type = #tpu.core_type<tc>, window_params = [{transform_indices = @transform_0, window_bounds = array<i64: 1, 4, 4, 32>}, {transform_indices = @transform_1, window_bounds = array<i64: 1, 2, 32>}]} {
    %c0 = arith.constant 0 : index
    %c0_0 = arith.constant 0 : index
    %c0_1 = arith.constant 0 : index
    %c0_2 = arith.constant 0 : index
    %0 = vector.load %arg1[%c0, %c0_0, %c0_1, %c0_2] : memref<1x4x4x32xf32, #tpu.memory_space<vmem>>, vector<1x4x4x32xf32>
    %1 = vector.shape_cast %0 : vector<1x4x4x32xf32> to vector<4x4x32xf32>
    %cst = arith.constant dense<0.000000e+00> : vector<32xf32>
    %2 = vector.multi_reduction <add>, %1, %cst [0, 1] : vector<4x4x32xf32> to vector<32xf32>
    %c0_3 = arith.constant 0 : index
    %c0_4 = arith.constant 0 : index
    %c0_5 = arith.constant 0 : index
    %3 = vector.load %arg2[%c0_3, %c0_4, %c0_5] : memref<1x2x32xf32, #tpu.memory_space<vmem>>, vector<1x1x32xf32>
    %4 = vector.shape_cast %3 : vector<1x1x32xf32> to vector<32xf32>
    %5 = vector.shape_cast %2 : vector<32xf32> to vector<1x1x32xf32>
    tpu.vector_store %arg2[%c0_3, %c0_4, %c0_5], %5 {strides = array<i32>} : memref<1x2x32xf32, #tpu.memory_space<vmem>>, vector<1x1x32xf32>,
    %6 = arith.mulf %1, %1 : vector<4x4x32xf32>
    %cst_6 = arith.constant dense<0.000000e+00> : vector<32xf32>
    %7 = vector.multi_reduction <add>, %6, %cst_6 [0, 1] : vector<4x4x32xf32> to vector<32xf32>
    %c0_7 = arith.constant 0 : index
    %c1 = arith.constant 1 : index
    %c0_8 = arith.constant 0 : index
    %8 = vector.load %arg2[%c0_7, %c1, %c0_8] : memref<1x2x32xf32, #tpu.memory_space<vmem>>, vector<1x1x32xf32>
    %9 = vector.shape_cast %8 : vector<1x1x32xf32> to vector<32xf32>
    %10 = vector.shape_cast %7 : vector<32xf32> to vector<1x1x32xf32>
    tpu.vector_store %arg2[%c0_7, %c1, %c0_8], %10 {strides = array<i32>} : memref<1x2x32xf32, #tpu.memory_space<vmem>>, vector<1x1x32xf32>,
    return
  }
  func.func @transform_0(%arg0: i32) -> (i32, i32, i32, i32) {
    %c0_i32 = arith.constant 0 : i32
    %c0_i32_0 = arith.constant 0 : i32
    %c0_i32_1 = arith.constant 0 : i32
    %c0_i32_2 = arith.constant 0 : i32
    return %arg0, %c0_i32, %c0_i32_0, %c0_i32_1 : i32, i32, i32, i32
  }
  func.func @transform_1(%arg0: i32) -> (i32, i32, i32) {
    %c0_i32 = arith.constant 0 : i32
    %c0_i32_0 = arith.constant 0 : i32
    %c0_i32_1 = arith.constant 0 : i32
    return %arg0, %c0_i32, %c0_i32_0 : i32, i32, i32
  }
}

module attributes {stable_mosaic.version = 11 : i64} {
  func.func @_upconv_kernel(%arg0: i32, %arg1: memref<1x8x8x32xf32, #tpu.memory_space<vmem>>, %arg2: memref<1x1x32xf32, #tpu.memory_space<vmem>>, %arg3: memref<1x1x32xf32, #tpu.memory_space<vmem>>, %arg4: memref<4x128x128xbf16, #tpu.memory_space<vmem>>, %arg5: memref<1x128xf32, #tpu.memory_space<vmem>>, %arg6: memref<1x16x16x128xf32, #tpu.memory_space<vmem>>, %arg7: memref<10x10x32xbf16, #tpu.memory_space<vmem>>) attributes {dimension_semantics = [#tpu.dimension_semantics<parallel>], iteration_bounds = array<i64: 2>, scalar_prefetch = 0 : i64, scratch_operands = 1 : i64, tpu.core_type = #tpu.core_type<tc>, window_params = [{transform_indices = @transform_0, window_bounds = array<i64: 1, 8, 8, 32>}, {transform_indices = @transform_1, window_bounds = array<i64: 1, 1, 32>}, {transform_indices = @transform_2, window_bounds = array<i64: 1, 1, 32>}, {pipeline_mode = #tpu.pipeline_mode<synchronous>, transform_indices = @transform_3, window_bounds = array<i64: 4, 128, 128>}, {pipeline_mode = #tpu.pipeline_mode<synchronous>, transform_indices = @transform_4, window_bounds = array<i64: 1, 128>}, {transform_indices = @transform_5, window_bounds = array<i64: 1, 16, 16, 128>}]} {
    %cst = arith.constant 0.000000e+00 : bf16
    %0 = vector.broadcast %cst : bf16 to vector<10x10x32xbf16>
    %c0 = arith.constant 0 : index
    %c0_0 = arith.constant 0 : index
    %c0_1 = arith.constant 0 : index
    %1 = vector.load %arg7[%c0, %c0_0, %c0_1] : memref<10x10x32xbf16, #tpu.memory_space<vmem>>, vector<10x10x32xbf16>
    tpu.vector_store %arg7[%c0, %c0_0, %c0_1], %0 {strides = array<i32>} : memref<10x10x32xbf16, #tpu.memory_space<vmem>>, vector<10x10x32xbf16>,
    %c0_2 = arith.constant 0 : index
    %c0_3 = arith.constant 0 : index
    %c0_4 = arith.constant 0 : index
    %c0_5 = arith.constant 0 : index
    %2 = vector.load %arg1[%c0_2, %c0_3, %c0_4, %c0_5] : memref<1x8x8x32xf32, #tpu.memory_space<vmem>>, vector<1x8x8x32xf32>
    %3 = vector.shape_cast %2 : vector<1x8x8x32xf32> to vector<8x8x32xf32>
    %c0_6 = arith.constant 0 : index
    %c0_7 = arith.constant 0 : index
    %c0_8 = arith.constant 0 : index
    %4 = vector.load %arg2[%c0_6, %c0_7, %c0_8] : memref<1x1x32xf32, #tpu.memory_space<vmem>>, vector<1x1x32xf32>
    %5 = vector.shape_cast %4 : vector<1x1x32xf32> to vector<32xf32>
    %c0_9 = arith.constant 0 : index
    %c0_10 = arith.constant 0 : index
    %c0_11 = arith.constant 0 : index
    %6 = vector.load %arg3[%c0_9, %c0_10, %c0_11] : memref<1x1x32xf32, #tpu.memory_space<vmem>>, vector<1x1x32xf32>
    %7 = vector.shape_cast %6 : vector<1x1x32xf32> to vector<32xf32>
    %8 = vector.shape_cast %5 : vector<32xf32> to vector<1x1x32xf32>
    %9 = vector.broadcast %8 : vector<1x1x32xf32> to vector<8x8x32xf32>
    %10 = arith.mulf %3, %9 : vector<8x8x32xf32>
    %11 = vector.shape_cast %7 : vector<32xf32> to vector<1x1x32xf32>
    %12 = vector.broadcast %11 : vector<1x1x32xf32> to vector<8x8x32xf32>
    %13 = arith.addf %10, %12 : vector<8x8x32xf32>
    %14 = arith.truncf %13 : vector<8x8x32xf32> to vector<8x8x32xbf16>
    %c1 = arith.constant 1 : index
    %c1_12 = arith.constant 1 : index
    %c0_13 = arith.constant 0 : index
    %15 = vector.load %arg7[%c1, %c1_12, %c0_13] : memref<10x10x32xbf16, #tpu.memory_space<vmem>>, vector<8x8x32xbf16>
    tpu.vector_store %arg7[%c1, %c1_12, %c0_13], %14 {strides = array<i32>} : memref<10x10x32xbf16, #tpu.memory_space<vmem>>, vector<8x8x32xbf16>,
    %c0_14 = arith.constant 0 : index
    %c0_15 = arith.constant 0 : index
    %16 = vector.load %arg5[%c0_14, %c0_15] : memref<1x128xf32, #tpu.memory_space<vmem>>, vector<1x128xf32>
    %17 = vector.shape_cast %16 : vector<1x128xf32> to vector<128xf32>
    %c0_16 = arith.constant 0 : index
    %c0_17 = arith.constant 0 : index
    %c0_18 = arith.constant 0 : index
    %18 = vector.load %arg7[%c0_16, %c0_17, %c0_18] : memref<10x10x32xbf16, #tpu.memory_space<vmem>>, vector<8x8x32xbf16>
    %19 = vector.shape_cast %18 : vector<8x8x32xbf16> to vector<64x32xbf16>
    %c0_19 = arith.constant 0 : index
    %c1_20 = arith.constant 1 : index
    %c0_21 = arith.constant 0 : index
    %20 = vector.load %arg7[%c0_19, %c1_20, %c0_21] : memref<10x10x32xbf16, #tpu.memory_space<vmem>>, vector<8x8x32xbf16>
    %21 = vector.shape_cast %20 : vector<8x8x32xbf16> to vector<64x32xbf16>
    %c1_22 = arith.constant 1 : index
    %c0_23 = arith.constant 0 : index
    %c0_24 = arith.constant 0 : index
    %22 = vector.load %arg7[%c1_22, %c0_23, %c0_24] : memref<10x10x32xbf16, #tpu.memory_space<vmem>>, vector<8x8x32xbf16>
    %23 = vector.shape_cast %22 : vector<8x8x32xbf16> to vector<64x32xbf16>
    %c1_25 = arith.constant 1 : index
    %c1_26 = arith.constant 1 : index
    %c0_27 = arith.constant 0 : index
    %24 = vector.load %arg7[%c1_25, %c1_26, %c0_27] : memref<10x10x32xbf16, #tpu.memory_space<vmem>>, vector<8x8x32xbf16>
    %25 = vector.shape_cast %24 : vector<8x8x32xbf16> to vector<64x32xbf16>
    %26 = tpu.concatenate %19, %21, %23, %25 in 1 : vector<64x32xbf16>, vector<64x32xbf16>, vector<64x32xbf16>, vector<64x32xbf16> -> vector<64x128xbf16>
    %c0_28 = arith.constant 0 : index
    %c0_29 = arith.constant 0 : index
    %c0_30 = arith.constant 0 : index
    %27 = vector.load %arg4[%c0_28, %c0_29, %c0_30] : memref<4x128x128xbf16, #tpu.memory_space<vmem>>, vector<1x128x128xbf16>
    %28 = vector.shape_cast %27 : vector<1x128x128xbf16> to vector<128x128xbf16>
    %cst_31 = arith.constant dense<0.000000e+00> : vector<64x128xf32>
    %29 = tpu.matmul %26, %28, %cst_31 {dimension_numbers = #tpu.dot_dimension_numbers<[1], [0], [0], [1], [0, 0, 1, 1], [], []>} : vector<64x128xbf16>, vector<128x128xbf16>, vector<64x128xf32> -> vector<64x128xf32>
    %30 = vector.shape_cast %17 : vector<128xf32> to vector<1x128xf32>
    %31 = vector.broadcast %30 : vector<1x128xf32> to vector<64x128xf32>
    %32 = arith.addf %29, %31 : vector<64x128xf32>
    %33 = math.tanh %32 : vector<64x128xf32>
    %34 = vector.shape_cast %33 : vector<64x128xf32> to vector<8x8x128xf32>
    %c0_32 = arith.constant 0 : index
    %c1_33 = arith.constant 1 : index
    %c0_34 = arith.constant 0 : index
    %35 = vector.load %arg7[%c0_32, %c1_33, %c0_34] : memref<10x10x32xbf16, #tpu.memory_space<vmem>>, vector<8x8x32xbf16>
    %36 = vector.shape_cast %35 : vector<8x8x32xbf16> to vector<64x32xbf16>
    %c0_35 = arith.constant 0 : index
    %c2 = arith.constant 2 : index
    %c0_36 = arith.constant 0 : index
    %37 = vector.load %arg7[%c0_35, %c2, %c0_36] : memref<10x10x32xbf16, #tpu.memory_space<vmem>>, vector<8x8x32xbf16>
    %38 = vector.shape_cast %37 : vector<8x8x32xbf16> to vector<64x32xbf16>
    %c1_37 = arith.constant 1 : index
    %c1_38 = arith.constant 1 : index
    %c0_39 = arith.constant 0 : index
    %39 = vector.load %arg7[%c1_37, %c1_38, %c0_39] : memref<10x10x32xbf16, #tpu.memory_space<vmem>>, vector<8x8x32xbf16>
    %40 = vector.shape_cast %39 : vector<8x8x32xbf16> to vector<64x32xbf16>
    %c1_40 = arith.constant 1 : index
    %c2_41 = arith.constant 2 : index
    %c0_42 = arith.constant 0 : index
    %41 = vector.load %arg7[%c1_40, %c2_41, %c0_42] : memref<10x10x32xbf16, #tpu.memory_space<vmem>>, vector<8x8x32xbf16>
    %42 = vector.shape_cast %41 : vector<8x8x32xbf16> to vector<64x32xbf16>
    %43 = tpu.concatenate %36, %38, %40, %42 in 1 : vector<64x32xbf16>, vector<64x32xbf16>, vector<64x32xbf16>, vector<64x32xbf16> -> vector<64x128xbf16>
    %c1_43 = arith.constant 1 : index
    %c0_44 = arith.constant 0 : index
    %c0_45 = arith.constant 0 : index
    %44 = vector.load %arg4[%c1_43, %c0_44, %c0_45] : memref<4x128x128xbf16, #tpu.memory_space<vmem>>, vector<1x128x128xbf16>
    %45 = vector.shape_cast %44 : vector<1x128x128xbf16> to vector<128x128xbf16>
    %cst_46 = arith.constant dense<0.000000e+00> : vector<64x128xf32>
    %46 = tpu.matmul %43, %45, %cst_46 {dimension_numbers = #tpu.dot_dimension_numbers<[1], [0], [0], [1], [0, 0, 1, 1], [], []>} : vector<64x128xbf16>, vector<128x128xbf16>, vector<64x128xf32> -> vector<64x128xf32>
    %47 = vector.shape_cast %17 : vector<128xf32> to vector<1x128xf32>
    %48 = vector.broadcast %47 : vector<1x128xf32> to vector<64x128xf32>
    %49 = arith.addf %46, %48 : vector<64x128xf32>
    %50 = math.tanh %49 : vector<64x128xf32>
    %51 = vector.shape_cast %50 : vector<64x128xf32> to vector<8x8x128xf32>
    %c1_47 = arith.constant 1 : index
    %c0_48 = arith.constant 0 : index
    %c0_49 = arith.constant 0 : index
    %52 = vector.load %arg7[%c1_47, %c0_48, %c0_49] : memref<10x10x32xbf16, #tpu.memory_space<vmem>>, vector<8x8x32xbf16>
    %53 = vector.shape_cast %52 : vector<8x8x32xbf16> to vector<64x32xbf16>
    %c1_50 = arith.constant 1 : index
    %c1_51 = arith.constant 1 : index
    %c0_52 = arith.constant 0 : index
    %54 = vector.load %arg7[%c1_50, %c1_51, %c0_52] : memref<10x10x32xbf16, #tpu.memory_space<vmem>>, vector<8x8x32xbf16>
    %55 = vector.shape_cast %54 : vector<8x8x32xbf16> to vector<64x32xbf16>
    %c2_53 = arith.constant 2 : index
    %c0_54 = arith.constant 0 : index
    %c0_55 = arith.constant 0 : index
    %56 = vector.load %arg7[%c2_53, %c0_54, %c0_55] : memref<10x10x32xbf16, #tpu.memory_space<vmem>>, vector<8x8x32xbf16>
    %57 = vector.shape_cast %56 : vector<8x8x32xbf16> to vector<64x32xbf16>
    %c2_56 = arith.constant 2 : index
    %c1_57 = arith.constant 1 : index
    %c0_58 = arith.constant 0 : index
    %58 = vector.load %arg7[%c2_56, %c1_57, %c0_58] : memref<10x10x32xbf16, #tpu.memory_space<vmem>>, vector<8x8x32xbf16>
    %59 = vector.shape_cast %58 : vector<8x8x32xbf16> to vector<64x32xbf16>
    %60 = tpu.concatenate %53, %55, %57, %59 in 1 : vector<64x32xbf16>, vector<64x32xbf16>, vector<64x32xbf16>, vector<64x32xbf16> -> vector<64x128xbf16>
    %c2_59 = arith.constant 2 : index
    %c0_60 = arith.constant 0 : index
    %c0_61 = arith.constant 0 : index
    %61 = vector.load %arg4[%c2_59, %c0_60, %c0_61] : memref<4x128x128xbf16, #tpu.memory_space<vmem>>, vector<1x128x128xbf16>
    %62 = vector.shape_cast %61 : vector<1x128x128xbf16> to vector<128x128xbf16>
    %cst_62 = arith.constant dense<0.000000e+00> : vector<64x128xf32>
    %63 = tpu.matmul %60, %62, %cst_62 {dimension_numbers = #tpu.dot_dimension_numbers<[1], [0], [0], [1], [0, 0, 1, 1], [], []>} : vector<64x128xbf16>, vector<128x128xbf16>, vector<64x128xf32> -> vector<64x128xf32>
    %64 = vector.shape_cast %17 : vector<128xf32> to vector<1x128xf32>
    %65 = vector.broadcast %64 : vector<1x128xf32> to vector<64x128xf32>
    %66 = arith.addf %63, %65 : vector<64x128xf32>
    %67 = math.tanh %66 : vector<64x128xf32>
    %68 = vector.shape_cast %67 : vector<64x128xf32> to vector<8x8x128xf32>
    %c1_63 = arith.constant 1 : index
    %c1_64 = arith.constant 1 : index
    %c0_65 = arith.constant 0 : index
    %69 = vector.load %arg7[%c1_63, %c1_64, %c0_65] : memref<10x10x32xbf16, #tpu.memory_space<vmem>>, vector<8x8x32xbf16>
    %70 = vector.shape_cast %69 : vector<8x8x32xbf16> to vector<64x32xbf16>
    %c1_66 = arith.constant 1 : index
    %c2_67 = arith.constant 2 : index
    %c0_68 = arith.constant 0 : index
    %71 = vector.load %arg7[%c1_66, %c2_67, %c0_68] : memref<10x10x32xbf16, #tpu.memory_space<vmem>>, vector<8x8x32xbf16>
    %72 = vector.shape_cast %71 : vector<8x8x32xbf16> to vector<64x32xbf16>
    %c2_69 = arith.constant 2 : index
    %c1_70 = arith.constant 1 : index
    %c0_71 = arith.constant 0 : index
    %73 = vector.load %arg7[%c2_69, %c1_70, %c0_71] : memref<10x10x32xbf16, #tpu.memory_space<vmem>>, vector<8x8x32xbf16>
    %74 = vector.shape_cast %73 : vector<8x8x32xbf16> to vector<64x32xbf16>
    %c2_72 = arith.constant 2 : index
    %c2_73 = arith.constant 2 : index
    %c0_74 = arith.constant 0 : index
    %75 = vector.load %arg7[%c2_72, %c2_73, %c0_74] : memref<10x10x32xbf16, #tpu.memory_space<vmem>>, vector<8x8x32xbf16>
    %76 = vector.shape_cast %75 : vector<8x8x32xbf16> to vector<64x32xbf16>
    %77 = tpu.concatenate %70, %72, %74, %76 in 1 : vector<64x32xbf16>, vector<64x32xbf16>, vector<64x32xbf16>, vector<64x32xbf16> -> vector<64x128xbf16>
    %c3 = arith.constant 3 : index
    %c0_75 = arith.constant 0 : index
    %c0_76 = arith.constant 0 : index
    %78 = vector.load %arg4[%c3, %c0_75, %c0_76] : memref<4x128x128xbf16, #tpu.memory_space<vmem>>, vector<1x128x128xbf16>
    %79 = vector.shape_cast %78 : vector<1x128x128xbf16> to vector<128x128xbf16>
    %cst_77 = arith.constant dense<0.000000e+00> : vector<64x128xf32>
    %80 = tpu.matmul %77, %79, %cst_77 {dimension_numbers = #tpu.dot_dimension_numbers<[1], [0], [0], [1], [0, 0, 1, 1], [], []>} : vector<64x128xbf16>, vector<128x128xbf16>, vector<64x128xf32> -> vector<64x128xf32>
    %81 = vector.shape_cast %17 : vector<128xf32> to vector<1x128xf32>
    %82 = vector.broadcast %81 : vector<1x128xf32> to vector<64x128xf32>
    %83 = arith.addf %80, %82 : vector<64x128xf32>
    %84 = math.tanh %83 : vector<64x128xf32>
    %85 = vector.shape_cast %84 : vector<64x128xf32> to vector<8x8x128xf32>
    %86 = vector.shape_cast %34 : vector<8x8x128xf32> to vector<8x8x1x128xf32>
    %87 = vector.shape_cast %51 : vector<8x8x128xf32> to vector<8x8x1x128xf32>
    %88 = tpu.concatenate %86, %87 in 2 : vector<8x8x1x128xf32>, vector<8x8x1x128xf32> -> vector<8x8x2x128xf32>
    %89 = vector.shape_cast %88 : vector<8x8x2x128xf32> to vector<8x16x128xf32>
    %90 = vector.shape_cast %68 : vector<8x8x128xf32> to vector<8x8x1x128xf32>
    %91 = vector.shape_cast %85 : vector<8x8x128xf32> to vector<8x8x1x128xf32>
    %92 = tpu.concatenate %90, %91 in 2 : vector<8x8x1x128xf32>, vector<8x8x1x128xf32> -> vector<8x8x2x128xf32>
    %93 = vector.shape_cast %92 : vector<8x8x2x128xf32> to vector<8x16x128xf32>
    %94 = vector.shape_cast %89 : vector<8x16x128xf32> to vector<8x1x16x128xf32>
    %95 = vector.shape_cast %93 : vector<8x16x128xf32> to vector<8x1x16x128xf32>
    %96 = tpu.concatenate %94, %95 in 1 : vector<8x1x16x128xf32>, vector<8x1x16x128xf32> -> vector<8x2x16x128xf32>
    %97 = vector.shape_cast %96 : vector<8x2x16x128xf32> to vector<16x16x128xf32>
    %c0_78 = arith.constant 0 : index
    %c0_79 = arith.constant 0 : index
    %c0_80 = arith.constant 0 : index
    %c0_81 = arith.constant 0 : index
    %98 = vector.load %arg6[%c0_78, %c0_79, %c0_80, %c0_81] : memref<1x16x16x128xf32, #tpu.memory_space<vmem>>, vector<1x16x16x128xf32>
    %99 = vector.shape_cast %98 : vector<1x16x16x128xf32> to vector<16x16x128xf32>
    %100 = vector.shape_cast %97 : vector<16x16x128xf32> to vector<1x16x16x128xf32>
    tpu.vector_store %arg6[%c0_78, %c0_79, %c0_80, %c0_81], %100 {strides = array<i32>} : memref<1x16x16x128xf32, #tpu.memory_space<vmem>>, vector<1x16x16x128xf32>,
    return
  }
  func.func @transform_0(%arg0: i32) -> (i32, i32, i32, i32) {
    %c0_i32 = arith.constant 0 : i32
    %c0_i32_0 = arith.constant 0 : i32
    %c0_i32_1 = arith.constant 0 : i32
    %c0_i32_2 = arith.constant 0 : i32
    return %arg0, %c0_i32, %c0_i32_0, %c0_i32_1 : i32, i32, i32, i32
  }
  func.func @transform_1(%arg0: i32) -> (i32, i32, i32) {
    %c0_i32 = arith.constant 0 : i32
    %c0_i32_0 = arith.constant 0 : i32
    %c0_i32_1 = arith.constant 0 : i32
    return %arg0, %c0_i32, %c0_i32_0 : i32, i32, i32
  }
  func.func @transform_2(%arg0: i32) -> (i32, i32, i32) {
    %c0_i32 = arith.constant 0 : i32
    %c0_i32_0 = arith.constant 0 : i32
    %c0_i32_1 = arith.constant 0 : i32
    return %arg0, %c0_i32, %c0_i32_0 : i32, i32, i32
  }
  func.func @transform_3(%arg0: i32) -> (i32, i32, i32) {
    %c0_i32 = arith.constant 0 : i32
    %c0_i32_0 = arith.constant 0 : i32
    %c0_i32_1 = arith.constant 0 : i32
    %c0_i32_2 = arith.constant 0 : i32
    return %c0_i32, %c0_i32_0, %c0_i32_1 : i32, i32, i32
  }
  func.func @transform_4(%arg0: i32) -> (i32, i32) {
    %c0_i32 = arith.constant 0 : i32
    %c0_i32_0 = arith.constant 0 : i32
    %c0_i32_1 = arith.constant 0 : i32
    return %c0_i32, %c0_i32_0 : i32, i32
  }
  func.func @transform_5(%arg0: i32) -> (i32, i32, i32, i32) {
    %c0_i32 = arith.constant 0 : i32
    %c0_i32_0 = arith.constant 0 : i32
    %c0_i32_1 = arith.constant 0 : i32
    %c0_i32_2 = arith.constant 0 : i32
    return %arg0, %c0_i32, %c0_i32_0, %c0_i32_1 : i32, i32, i32, i32
  }
}

</mosaic_0001>

<bundles_post_ra>
// kernel: _lambda_.6
= control target key start
LH: loop header
LB: loop body
LE: loop exit
PB: predicated region body
PF: predicated region fallthrough
CT: control target
= control target key end

     0   :  { %s267_s6 = smov 0   ;;  %s304_s0 = inlined_call_operand.vmem [shape: f32[2,8,8,32], index: 0, kind: input, shape index: {}]   ;;  %s305_s1 = inlined_call_operand.vmem [shape: f32[2,2,32], index: 1, kind: output, shape index: {}]  }
   0x1 LB: > { %s230_s7 = sadd.s32 4294967295, %s255_s6   ;;  %p234_p0 = scmp.ge.s32.totalorder %s255_s6, 1  ;;  %s255_s6 = sphi %s267_s6, %s11_s6  }
   0x2   : > { %p87_p1 = scmp.lt.s32.totalorder %s255_s6, 3 }
   0x4   : > { %p88_p2 = pnand %p234_p0, %p87_p1 }
   0x5   : > { %p106_p3 = scmp.lt.s32.totalorder (!%p88_p2), %s230_s7, 1  ;;  %vm123_vm0 = vcmask (!%p88_p2), 261120   ;;  %vm145_vm1 = vcmask (!%p88_p2), 253952  }
   0x6   : > { %91 = sbr.rel (%p88_p2) target bundleno = 48 (0x30), region = 24 }
   0xd   : > { %s307_s7 = smov (!%p106_p3, %s230_s7), 1 }
   0xe   : > { %s240_s8 = sshll.u32 %s307_s7, 6  ;;  %s237_s12 = sshll.u32 %s307_s7, 1 }
   0xf   : > { %s110_s11 = scalar_lea.vmem %s304_s0, %s240_s8  ;;  %s114_s15 = scalar_lea.vmem %s305_s1, %s237_s12 }
  0x10   : > { %v115_v0 = vld [vmem:[%s110_s11] sm:$0xff]  ;;  %v116_v1 = vld [vmem:[%s110_s11 + $0x8] sm:$0xff]  ;;  %v117_v2 = vld [vmem:[%s110_s11 + $0x10] sm:$0xff] }
  0x11   : > { %v118_v3 = vld [vmem:[%s110_s11 + $0x18] sm:$0xff]  ;;  %v124_v4 = vsel %vm123_vm0, %v115_v0, 0.0  ;;  %v125_v5 = vsel %vm123_vm0, %v116_v1, 0.0  ;;  %v127_v6 = vsel %vm123_vm0, %v117_v2, 0.0  ;;  %v147_v7 = vmul.f32 %v115_v0, %v115_v0  ;;  %v119_v8 = vld [vmem:[%s110_s11 + $0x20] sm:$0xff]  ;;  %v120_v13 = vld [vmem:[%s110_s11 + $0x28] sm:$0xff] }
  0x12   : > { %v126_v9 = vadd.f32 %v125_v5, %v124_v4  ;;  %v129_v10 = vsel %vm123_vm0, %v118_v3, 0.0  ;;  %v148_v11 = vmul.f32 %v116_v1, %v116_v1  ;;  %v149_v12 = vmul.f32 %v117_v2, %v117_v2  ;;  %v121_v20 = vld [vmem:[%s110_s11 + $0x30] sm:$0xff]  ;;  %v122_v27 = vld [vmem:[%s110_s11 + $0x38] sm:$0xff] }
  0x13   : > { %v150_v15 = vmul.f32 %v118_v3, %v118_v3  ;;  %v131_v16 = vsel %vm123_vm0, %v119_v8, 0.0  ;;  %v151_v17 = vmul.f32 %v119_v8, %v119_v8  ;;  %v155_v18 = vsel %vm123_vm0, %v147_v7, 0.0 }
  0x14   : > { %v128_v14 = vadd.f32 %v127_v6, %v126_v9  ;;  %v156_v19 = vsel %vm123_vm0, %v148_v11, 0.0  ;;  %v158_v23 = vsel %vm123_vm0, %v149_v12, 0.0  ;;  %v133_v24 = vsel %vm123_vm0, %v120_v13, 0.0 }
  0x15   : > { %v157_v22 = vadd.f32 %v156_v19, %v155_v18  ;;  %v152_v25 = vmul.f32 %v120_v13, %v120_v13  ;;  %v160_v26 = vsel %vm123_vm0, %v150_v15, 0.0  ;;  %v135_v30 = vsel %vm123_vm0, %v121_v20, 0.0 }
  0x16   : > { %v130_v21 = vadd.f32 %v129_v10, %v128_v14  ;;  %v153_v31 = vmul.f32 %v121_v20, %v121_v20  ;;  %v162_v32 = vsel %vm123_vm0, %v151_v17, 0.0  ;;  %v137_v35 = vsel %vm123_vm0, %v122_v27, 0.0 }
  0x17   : > { %v159_v29 = vadd.f32 %v158_v23, %v157_v22  ;;  %v154_v36 = vmul.f32 %v122_v27, %v122_v27  ;;  %v164_v37 = vsel %vm123_vm0, %v152_v25, 0.0 }
  0x18   : > { %v132_v28 = vadd.f32 %v131_v16, %v130_v21  ;;  %v166_v40 = vsel %vm123_vm0, %v153_v31, 0.0 }
  0x19   : > { %v161_v34 = vadd.f32 %v160_v26, %v159_v29  ;;  %v168_v43 = vsel %vm123_vm0, %v154_v36, 0.0 }
  0x1a   : > { %v134_v33 = vadd.f32 %v133_v24, %v132_v28 }
  0x1b   : > { %v163_v39 = vadd.f32 %v162_v32, %v161_v34 }
  0x1c   : > { %v136_v38 = vadd.f32 %v135_v30, %v134_v33 }
  0x1d   : > { %v165_v42 = vadd.f32 %v164_v37, %v163_v39 }
  0x1e   : > { %v138_v41 = vadd.f32 %v137_v35, %v136_v38 }
  0x1f   : > { %v167_v45 = vadd.f32 %v166_v40, %v165_v42 }
  0x20   : > { %v139_v44 = vrot.slane %v138_v41, 4 }
  0x21   : > { %v169_v47 = vadd.f32 %v168_v43, %v167_v45 }
  0x22   : > { %v140_v46 = vadd.f32 %v139_v44, %v138_v41 }
  0x23   : > { %v170_v49 = vrot.slane %v169_v47, 4 }
  0x24   : > { %v141_v48 = vrot.slane %v140_v46, 2 }
  0x25   : > { %v171_v51 = vadd.f32 %v170_v49, %v169_v47 }
  0x26   : > { %v142_v50 = vadd.f32 %v141_v48, %v140_v46 }
  0x27   : > { %v172_v53 = vrot.slane %v171_v51, 2 }
  0x28   : > { %v143_v52 = vrot.slane %v142_v50, 1 }
  0x29   : > { %v173_v55 = vadd.f32 %v172_v53, %v171_v51 }
  0x2a   : > { %v144_v54 = vadd.f32 %v143_v52, %v142_v50 }
  0x2b   : > { %v174_v56 = vrot.slane %v173_v55, 1 }
  0x2c   : > { %146 = vst.msk [vmem:[%s114_s15] sm:$0x1] %vm145_vm1, %v144_v54 }
  0x2d   : > { %v175_v57 = vadd.f32 %v174_v56, %v173_v55 }
  0x2f   : > { %176 = vst.msk [vmem:[%s114_s15 + $0x1] sm:$0x1] %vm145_vm1, %v175_v57 }
  0x30 PF: > { %s11_s6 = sadd.s32 1, %s255_s6  }
  0x31   : > { %p8_p4 = scmp.ge.s32.totalorder %s11_s6, 4  }
  0x33   :  { %10 = sbr.rel (!%p8_p4) target bundleno = 1 (0x1), region = 54 }

// kernel: _lambda_.4
= control target key start
LH: loop header
LB: loop body
LE: loop exit
PB: predicated region body
PF: predicated region fallthrough
CT: control target
= control target key end

     0   :  { %6 = vsyncpa [#allocation3], 0  ;;  %s486_s0 = inlined_call_operand.hbm [shape: f32[2,4,4,32], index: 0, kind: input, shape index: {}]   ;;  %s487_s1 = inlined_call_operand.vmem [shape: f32[2,2,32], index: 1, kind: output, shape index: {}]  }
   0x1   :  { %8 = vsyncpa [#allocation3 + $0x1], 0  ;;  %s370_s6 = smov 0   ;;  %s372_s7 = smov 0  }
   0x2   :  { %s374_s8 = smov 0   ;;  %s376_s9 = smov 0  }
   0x3 LB: > { %s389_s10 = sadd.s32 4294967295, %s355_s9   ;;  %s392_s11 = sadd.s32 1, %s355_s9   ;;  %s355_s9 = sphi %s376_s9, %s494_s9   ;;  %s351_s8 = sphi %s374_s8, %s493_s8   ;;  %s347_s7 = sphi %s372_s7, %s492_s7   ;;  %s343_s6 = sphi %s370_s6, %s491_s6  }
   0x4   : > { %s18_s12 = ssub.s32 %s355_s9, %s392_s11  ;;  %s21_s13 = sadd.s32 1, %s351_s8 }
   0x5   : > { %p19_p0 = scmp.eq.s32.totalorder %s18_s12, 0  ;;  %p28_p1 = scmp.ne.s32.totalorder %s351_s8, %s347_s7 }
   0x6   : > { %p29_p2 = scmp.eq.s32.totalorder %s355_s9, 0  ;;  %p34_p3 = scmp.ne.s32.totalorder %s347_s7, %s343_s6 }
   0x7   : > { %s402_s14 = scalar_select %p19_p0, %s351_s8, %s21_s13  }
   0x8   : > { %p30_p4 = por %p29_p2, %p28_p1  ;;  %p35_p5 = scmp.eq.s32.totalorder %s389_s10, 0 }
   0x9   : > { %p256_p6 = scmp.lt.s32.totalorder %s355_s9, 2  ;;  %s84_s16 = sand.u32 1, %s351_s8  }
   0xa   : > { %p406_p7 = por %p35_p5, %p34_p3  ;;  %s241_s17 = sshll.u32 %s84_s16, 4 }
   0xb   : > { %s249_s18 = sshll.u32 %s355_s9, 8  ;;  %s88_s22 = scalar_lea.vmem [#allocation2], %s241_s17 }
   0xc   : > { %s415_s21 = scalar_lea.hbm %s486_s0, %s249_s18  ;;  %s95_s23 = sshll.u32 %s88_s22, 4  ;;  %s417_s23 = int_to_ptr.vmem [resolvable:$true] %s95_s23 }
   0xd   : > { %p419_p8 = pnand %p256_p6, %p30_p4  ;;  %s424_s25 = scalar_lea.sflag [#allocation3], %s84_s16 }
   0xe   : > { %s291_s26 = scalar_lea.hbm %s415_s21, 256  ;;  %s296_s29 = scalar_lea.hbm %s486_s0, 512 }
   0xf   : > { %p292_p10 = scmp.ne.s32.totalorder %s415_s21, %s291_s26  ;;  %p293_p11 = pneg %p419_p8 }
  0x10   : > { %p297_p0 = scmp.lt.u32.totalorder %s415_s21, %s486_s0  ;;  %p298_p1 = scmp.lt.u32.totalorder %s296_s29, %s291_s26 }
  0x11   : > { %p294_p12 = pnand %p293_p11, %p292_p10  ;;  %p300_p3 = scmp.lt.u32.totalorder %s291_s26, %s415_s21 }
  0x12   : > { %p299_p2 = por %p298_p1, %p297_p0 }
  0x13   : > { %p295_p13 = pneg %p294_p12 }
  0x14   : > { %p301_p4 = por %p300_p3, %p299_p2 }
  0x16   : > { %p302_p5 = pnand %p301_p4, %p295_p13 }
  0x18   : > { %305 = shalt.err (!%p302_p5)
}
  0x19   : > { %s306_s3 = scalar_lea.vmem %s417_s23, 256  ;;  %s357_s4 = smov [#allocation2]  }
  0x1a   : > { %p307_p6 = scmp.ne.s32.totalorder %s417_s23, %s306_s3  ;;  %s311_s5 = sshll.u32 %s357_s4, 4  ;;  %s312_s5 = int_to_ptr.vmem [resolvable:$false] %s311_s5 }
  0x1b   : > { %s313_s6 = scalar_lea.vmem %s312_s5, 512  ;;  %p314_p9 = scmp.lt.s32.totalorder %s417_s23, %s312_s5 }
  0x1c   : > { %p309_p10 = pnand %p307_p6, %p293_p11  ;;  %p315_p0 = scmp.lt.s32.totalorder %s313_s6, %s306_s3 }
  0x1e   : > { %p310_p12 = pneg %p309_p10  ;;  %p316_p1 = por %p315_p0, %p314_p9 }
  0x20   : > { %p317_p2 = pnand %p316_p1, %p310_p12 }
  0x22   : > { %320 = shalt.err (!%p317_p2)
}
  0x23   : > { %s358_s12 = smov 64   ;;  %s359_s13 = smov 4  }
  0x24   : > { %255 = dma.hbm_to_vmem [thread:$0]  (!%p419_p8), %s415_s21, 256, %s417_s23, %s424_s25, %s358_s12, %s358_s12, %s359_s13  }
  0x25   : > { %p103_p11 = scmp.lt.s32.totalorder %s355_s9, 3  ;;  %p490_p13 = scmp.ge.s32.totalorder %s355_s9, 1 }
  0x27   : > { %p104_p3 = pnand %p490_p13, %p103_p11 }
  0x28   : > { %s109_s16 = sand.u32 (!%p104_p3), 1, %s347_s7  }
  0x29   : > { %107 = sbr.rel (%p104_p3) target bundleno = 72 (0x48), region = 24  ;;  %s245_s17 = sshll.u32 (!%p104_p3), %s109_s16, 4 }
  0x2a   : > { %s110_s18 = scalar_lea.sflag (!%p104_p3), [#allocation3], %s109_s16  ;;  %s113_s19 = scalar_lea.vmem (!%p104_p3), [#allocation2], %s245_s17 }
  0x30   : > { %338 = dma.done.wait (%p406_p7), %s110_s18, 256  }
  0x31   : > { %340 = vsyncadd (%p406_p7), %s110_s18, 4294967040  ;;  %vm139_vm0 = vcmask 257024   ;;  %v135_v0 = vld [vmem:[%s113_s19] sm:$0xf]  ;;  %v136_v1 = vld [vmem:[%s113_s19 + $0x4] sm:$0xf] }
  0x32   : > { %v137_v2 = vld [vmem:[%s113_s19 + $0x8] sm:$0xf]  ;;  %v138_v3 = vld [vmem:[%s113_s19 + $0xc] sm:$0xf]  ;;  %v140_v4 = vsel %vm139_vm0, %v135_v0, 0.0  ;;  %v141_v5 = vsel %vm139_vm0, %v136_v1, 0.0  ;;  %v155_v7 = vmul.f32 %v135_v0, %v135_v0  ;;  %v156_v9 = vmul.f32 %v136_v1, %v136_v1 }
  0x33   : > { %v143_v6 = vsel %vm139_vm0, %v137_v2, 0.0  ;;  %v142_v8 = vadd.f32 %v141_v5, %v140_v4  ;;  %v157_v10 = vmul.f32 %v137_v2, %v137_v2  ;;  %v145_v11 = vsel %vm139_vm0, %v138_v3, 0.0  ;;  %p131_p7 = scmp.lt.s32.totalorder %s389_s10, 1 }
  0x34   : > { %v158_v12 = vmul.f32 %v138_v3, %v138_v3  ;;  %v159_v13 = vsel %vm139_vm0, %v155_v7, 0.0  ;;  %v160_v15 = vsel %vm139_vm0, %v156_v9, 0.0  ;;  %vm153_vm1 = vcmask 253952  }
  0x35   : > { %v144_v14 = vadd.f32 %v143_v6, %v142_v8  ;;  %v162_v16 = vsel %vm139_vm0, %v157_v10, 0.0  ;;  %v161_v17 = vadd.f32 %v160_v15, %v159_v13  ;;  %s496_s10 = smov (!%p131_p7, %s389_s10), 1 }
  0x36   : > { %v164_v19 = vsel %vm139_vm0, %v158_v12, 0.0  ;;  %s246_s9 = sshll.u32 %s496_s10, 1 }
  0x37   : > { %v146_v18 = vadd.f32 %v145_v11, %v144_v14  ;;  %v163_v20 = vadd.f32 %v162_v16, %v161_v17  ;;  %s134_s21 = scalar_lea.vmem %s487_s1, %s246_s9 }
  0x39   : > { %v147_v21 = vrot.slane %v146_v18, 4  ;;  %v165_v22 = vadd.f32 %v164_v19, %v163_v20 }
  0x3b   : > { %v148_v23 = vadd.f32 %v147_v21, %v146_v18  ;;  %v166_v24 = vrot.slane %v165_v22, 4 }
  0x3d   : > { %v149_v25 = vrot.slane %v148_v23, 2  ;;  %v167_v26 = vadd.f32 %v166_v24, %v165_v22 }
  0x3f   : > { %v150_v27 = vadd.f32 %v149_v25, %v148_v23  ;;  %v168_v28 = vrot.slane %v167_v26, 2 }
  0x41   : > { %v151_v29 = vrot.slane %v150_v27, 1  ;;  %v169_v30 = vadd.f32 %v168_v28, %v167_v26 }
  0x43   : > { %v152_v31 = vadd.f32 %v151_v29, %v150_v27  ;;  %v170_v32 = vrot.slane %v169_v30, 1 }
  0x45   : > { %154 = vst.msk [vmem:[%s134_s21] sm:$0x1] %vm153_vm1, %v152_v31  ;;  %v171_v33 = vadd.f32 %v170_v32, %v169_v30 }
  0x47   : > { %172 = vst.msk [vmem:[%s134_s21 + $0x1] sm:$0x1] %vm153_vm1, %v171_v33 }
  0x48 PF: > { %p11_p8 = scmp.ge.s32.totalorder %s392_s11, 4   ;;  %s491_s6 = smov %s347_s7 }
  0x49   : > { %s492_s7 = smov %s351_s8  ;;  %s493_s8 = smov %s402_s14 }
  0x4a   : > { %s494_s9 = smov %s392_s11  ;;  %13 = sbr.rel (!%p11_p8) target bundleno = 3 (0x3), region = 64 }
  0x51   :  { %192 = vsyncpa [#allocation3], 1 }
  0x52   :  { %194 = vsyncpa [#allocation3 + $0x1], 1 }

// kernel: _lambda_.5
= control target key start
LH: loop header
LB: loop body
LE: loop exit
PB: predicated region body
PF: predicated region fallthrough
CT: control target
= control target key end

     0   :  { %10 = vsyncpa [#allocation4], 0  ;;  %s2769_s18 = smov 0   ;;  %s3253_s0 = inlined_call_operand.vmem [shape: f32[2,4,4,32], index: 0, kind: input, shape index: {}]   ;;  %s3254_s1 = inlined_call_operand.vmem [shape: f32[2,1,32], index: 1, kind: input, shape index: {}]   ;;  %s3255_s2 = inlined_call_operand.vmem [shape: f32[2,1,32], index: 2, kind: input, shape index: {}]   ;;  %s3256_s3 = inlined_call_operand.hbm [shape: bf16[4,128,32], index: 3, kind: input, shape index: {}]   ;;  %s3257_s4 = inlined_call_operand.vmem [shape: f32[1,32], index: 4, kind: input, shape index: {}]   ;;  %s3258_s5 = inlined_call_operand.vmem [shape: f32[2,8,8,32], index: 5, kind: output, shape index: {}]  }
   0x1 LB: > { %s2775_s19 = sadd.s32 4294967295, %s2726_s18   ;;  %p2407_p0 = scmp.ge.s32.totalorder %s2726_s18, 1  ;;  %s2726_s18 = sphi %s2769_s18, %s16_s18  }
   0x2   : > { %p167_p1 = scmp.lt.s32.totalorder %s2726_s18, 3  ;;  %s2728_s20 = smov [#allocation3]  }
   0x3   : > { %s179_s21 = sshll.u32 %s2728_s20, 4  ;;  %p3259_p3 = scmp.eq.s32.totalorder %s2775_s19, 0  ;;  %s180_s21 = int_to_ptr.vmem [resolvable:$true] %s179_s21 }
   0x4   : > { %p2779_p2 = pnand %p2407_p0, %p167_p1  ;;  %s2688_s26 = scalar_lea.hbm %s3256_s3, 4096 }
   0x5   : > { %p2689_p6 = scmp.ne.s32.totalorder %s3256_s3, %s2688_s26  ;;  %p2695_p10 = scmp.lt.u32.totalorder %s2688_s26, %s3256_s3 }
   0x6   : > { %s3261_s22 = scalar_select %p2779_p2, 1, 0 }
   0x7   : > { %p2619_p4 = pneg %p2779_p2 }
   0x9   : > { %p2788_p5 = pnand %p3259_p3, %p2619_p4 }
   0xb   : > { %p2690_p7 = pneg %p2788_p5 }
   0xd   : > { %p2691_p8 = pnand %p2690_p7, %p2689_p6 }
   0xf   : > { %p2692_p9 = pneg %p2691_p8 }
  0x11   : > { %p2697_p11 = pnand %p2695_p10, %p2692_p9 }
  0x13   : > { %2700 = shalt.err (!%p2697_p11)
}
  0x14   : > { %s2701_s6 = scalar_lea.vmem %s180_s21, 4096  ;;  %p2709_p1 = scmp.lt.s32.totalorder %s180_s21, %s180_s21 }
  0x15   : > { %p2702_p12 = scmp.ne.s32.totalorder %s180_s21, %s2701_s6  ;;  %p2710_p4 = scmp.lt.s32.totalorder %s2701_s6, %s2701_s6 }
  0x17   : > { %p2704_p13 = pnand %p2702_p12, %p2690_p7  ;;  %p2711_p3 = por %p2710_p4, %p2709_p1 }
  0x19   : > { %p2705_p0 = pneg %p2704_p13 }
  0x1b   : > { %p2712_p2 = pnand %p2711_p3, %p2705_p0 }
  0x1d   : > { %2715 = shalt.err (!%p2712_p2)
}
  0x1e   : > { %s2729_s7 = smov 64   ;;  %s2730_s8 = smov 4  }
  0x1f   : > { %2622 = dma.hbm_to_vmem [thread:$0]  (!%p2788_p5), %s3256_s3, 4096, %s180_s21, [#allocation4], %s2729_s7, %s2729_s7, %s2730_s8  }
  0x20   : > { %p3263_p6 = scmp.ne.s32.totalorder %s3261_s22, 0 }
  0x21   : > { %p3264_p8 = scmp.eq.s32.totalorder (!%p3263_p6), %s2775_s19, 0 }
  0x22   : > { %218 = sbr.rel (%p3263_p6) target bundleno = 496 (0x1f0), region = 40 }
  0x29   : > { %2721 = dma.done.wait (%p3264_p8), [#allocation4], 4096   ;;  %p3265_p7 = pmov %p3264_p8 }
  0x2a   : > { %p252_p2 = scmp.lt.s32.totalorder %s2775_s19, 1  ;;  %vm269_vm0 = vcmask 256000   ;;  %v2731_v0 = vmov 0   ;;  %v2732_v1 = vmov 0.0   ;;  %v583_v7 = vlaneseq  ;;  %v2648_v24 = vld [vmem:[#allocation3 + $0x40] sm:$0xff]   ;;  %v2650_v40 = vld [vmem:[#allocation3 + $0x48] sm:$0xff]  }
  0x2b   : > { %2723 = vsyncadd (%p3265_p7), [#allocation4], 4294963200  ;;  %270 = vst.msk [vmem:[#allocation2] sm:$0x7] %vm269_vm0, %v2731_v0  ;;  %2555 = vmatprep.subr.bf16.mxu1 %v2732_v1  ;;  %2535 = vmatprep.subr.bf16.mxu0 %v2732_v1  ;;  %vm352_vm1 = vsmask.f32 2306 }
  0x2c   : > { %271 = vst.msk [vmem:[#allocation2 + $0x4] sm:$0x7] %vm269_vm0, %v2731_v0  ;;  %272 = vst.msk [vmem:[#allocation2 + $0x8] sm:$0x7] %vm269_vm0, %v2731_v0  ;;  %s3281_s19 = smov (!%p252_p2, %s2775_s19), 1  ;;  %vm820_vm2 = vcmask 1040384   ;;  %2556 = vmatpush3.bf16.msra.mxu1 %v2648_v24 }
  0x2d   : > { %273 = vst.msk [vmem:[#allocation2 + $0xc] sm:$0x7] %vm269_vm0, %v2731_v0  ;;  %274 = vst.msk [vmem:[#allocation2 + $0x10] sm:$0x7] %vm269_vm0, %v2731_v0  ;;  %s2493_s11 = sshll.u32 %s3281_s19, 4  ;;  %s259_s14 = scalar_lea.vmem %s3254_s1, %s3281_s19  ;;  %v2838_v17 = vshrl.u32 %v583_v7, 7  ;;  %2557 = vmatprep.subr.bf16.mxu1 %v2732_v1 }
  0x2e   : > { %275 = vst.msk [vmem:[#allocation2 + $0x14] sm:$0x7] %vm269_vm0, %v2731_v0  ;;  %s256_s17 = scalar_lea.vmem %s3253_s0, %s2493_s11  ;;  %s262_s22 = scalar_lea.vmem %s3255_s2, %s3281_s19  ;;  %v2416_v5 = vld [vmem:[%s259_s14] ss:$0 sm:$0xff]  ;;  %vm821_vm3 = vcmask 1042434   ;;  %vm823_vm5 = vcmask 1044484   ;;  %vm2850_vm8 = vmand %vm269_vm0, %vm352_vm1 }
  0x2f   : > { %v276_v2 = vld [vmem:[%s256_s17] sm:$0xf]  ;;  %v277_v3 = vld [vmem:[%s256_s17 + $0x4] sm:$0xf]  ;;  %v278_v4 = vld [vmem:[%s256_s17 + $0x8] sm:$0xf] }
  0x30   : > { %v2417_v6 = vld [vmem:[%s262_s22] ss:$0 sm:$0xff]  ;;  %v288_v8 = vmul.f32 %v2416_v5, %v276_v2  ;;  %v289_v9 = vmul.f32 %v2416_v5, %v277_v3  ;;  %v290_v10 = vmul.f32 %v2416_v5, %v278_v4  ;;  %v279_v11 = vld [vmem:[%s256_s17 + $0xc] sm:$0xf]  ;;  %vm411_vm4 = vsmask.f32 1280  ;;  %2558 = vmatpush3.bf16.msra.mxu1 %v2650_v40  ;;  %vm2864_vm11 = vmor %vm820_vm2, %vm821_vm3 }
  0x31   : > { %v291_v12 = vmul.f32 %v2416_v5, %v279_v11  ;;  %vm412_vm6 = vsmask.f32 3336  ;;  %v2649_v28 = vld [vmem:[#allocation3] sm:$0xff]   ;;  %vm414_vm7 = vsmask.f32 5392  ;;  %vm825_vm9 = vcmask 1046534   ;;  %2559 = vmatprep.subr.bf16.mxu1 %v2732_v1  ;;  %vm2886_vm13 = vmor %vm2864_vm11, %vm823_vm5 }
  0x32   : > { %v298_v13 = vadd.f32 %v2417_v6, %v288_v8  ;;  %v299_v14 = vadd.f32 %v2417_v6, %v289_v9  ;;  %v300_v15 = vadd.f32 %v2417_v6, %v290_v10  ;;  %v2422_v16 = vld.sshfl [vmem:[#allocation2] sm:$0x13 pattern:$0x76325410]  ;;  %2536 = vmatpush3.bf16.msra.mxu0 %v2649_v28  ;;  %vm416_vm10 = vsmask.f32 7448  ;;  %vm2877_vm12 = vmor %vm411_vm4, %vm412_vm6 }
  0x33   : > { %v301_v18 = vadd.f32 %v2417_v6, %v291_v12  ;;  %v2840_v22 = vld.sshfl [vmem:[#allocation2] sm:$0x12 pattern:$0x76325410]  ;;  %v419_v23 = vshrl.u32 %v2422_v16, 16  ;;  %v386_v26 = vcombine.high %v2422_v16, %v2422_v16  ;;  %v422_v27 = vshll.u32 %v2422_v16, 16  ;;  %2537 = vmatprep.subr.bf16.mxu0 %v2732_v1  ;;  %vm2897_vm14 = vmor %vm2877_vm12, %vm414_vm7 }
  0x34   : > { %v2495_v19 = vpack.c.bf16 %v298_v13, %v298_v13  ;;  %v2496_v20 = vpack.c.bf16 %v299_v14, %v299_v14  ;;  %v2497_v21 = vpack.c.bf16 %v300_v15, %v300_v15  ;;  %v354_v35 = vld [vmem:[#allocation2 + $0x4] sm:$0x7]  ;;  %v357_v36 = vld [vmem:[#allocation2 + $0x8] sm:$0x7]  ;;  %v795_v37 = vcombine.high %v2840_v22, %v2840_v22  ;;  %v360_v43 = vld [vmem:[#allocation2 + $0xc] sm:$0x7] }
  0x35   : > { %v2498_v25 = vpack.c.bf16 %v301_v18, %v301_v18  ;;  %v2844_v39 = vld.sshfl [vmem:[#allocation2 + $0x14] sm:$0x12 pattern:$0x76325410]  ;;  %v363_v45 = vld [vmem:[#allocation2 + $0x10] sm:$0x7]  ;;  %vm2911_vm15 = vmor %vm2886_vm13, %vm825_vm9 }
  0x36   : > { %v319_v29 = vshrl.u32 %v2495_v19, 16  ;;  %v322_v30 = vshll.u32 %v2495_v19, 16  ;;  %v326_v31 = vshrl.u32 %v2496_v20, 16  ;;  %v329_v32 = vshll.u32 %v2496_v20, 16  ;;  %v2651_v52 = vld [vmem:[#allocation3 + $0x8] sm:$0xff]   ;;  %v2652_v56 = vld [vmem:[#allocation3 + $0x50] sm:$0xff]   ;;  %vm2919_vm0 = vmor %vm2897_vm14, %vm416_vm10 }
  0x37   : > { %v333_v33 = vshrl.u32 %v2497_v21, 16  ;;  %v336_v34 = vshll.u32 %v2497_v21, 16  ;;  %v340_v38 = vshrl.u32 %v2498_v25, 16  ;;  %v343_v44 = vshll.u32 %v2498_v25, 16  ;;  %2538 = vmatpush3.bf16.msra.mxu0 %v2651_v52  ;;  %v2653_v60 = vld [vmem:[#allocation3 + $0x10] sm:$0xff]   ;;  %2560 = vmatpush3.bf16.msra.mxu1 %v2652_v56  ;;  %v2654_v12 = vld [vmem:[#allocation3 + $0x58] sm:$0xff]  }
  0x38   : > { %v321_v41 = vrot.slane %v319_v29, 7  ;;  %v328_v42 = vrot.slane %v326_v31, 7  ;;  %v421_v46 = vrot.slane %v419_v23, 6  ;;  %v424_v51 = vrot.slane %v422_v27, 7  ;;  %2539 = vmatprep.subr.bf16.mxu0 %v2732_v1  ;;  %2561 = vmatprep.subr.bf16.mxu1 %v2732_v1  ;;  %v2655_v14 = vld [vmem:[#allocation3 + $0x18] sm:$0xff]   ;;  %v2656_v24 = vld [vmem:[#allocation3 + $0x60] sm:$0xff]  }
  0x39   : > { %v2466_v47 = vld.sshfl [vmem:[#allocation2 + $0x14] sm:$0x13 pattern:$0x76325410]  ;;  %v335_v48 = vrot.slane %v333_v33, 7  ;;  %v342_v50 = vrot.slane %v340_v38, 7  ;;  %v1355_v2 = vcombine.high %v2844_v39, %v2844_v39 }
  0x3a   : > { %v324_v53 = vor.u32 %v322_v30, %v321_v41  ;;  %v331_v54 = vor.u32 %v329_v32, %v328_v42  ;;  %v2854_v55 = vshll.u32 %v386_v26, 16  ;;  %v2443_v58 = vrot.slane %v2840_v22, 9  ;;  %v2657_v26 = vld [vmem:[#allocation3 + $0x20] sm:$0xff]   ;;  %v2658_v33 = vld [vmem:[#allocation3 + $0x68] sm:$0xff]   ;;  %v2662_v19 = vld [vmem:[#allocation3 + $0x78] sm:$0xff]   ;;  %s2734_s23 = smov 32  }
  0x3b   : > { %v338_v57 = vor.u32 %v336_v34, %v335_v48  ;;  %v345_v59 = vor.u32 %v343_v44, %v342_v50  ;;  %v829_v0 = vrot.slane %v795_v37, 7  ;;  %v425_v6 = vor.u32 %v424_v51, %v421_v46  ;;  %2540 = vmatpush3.bf16.msra.mxu0 %v2653_v60  ;;  %2562 = vmatpush3.bf16.msra.mxu1 %v2654_v12  ;;  %v2659_v38 = vld [vmem:[#allocation3 + $0x28] sm:$0xff]   ;;  %v2660_v60 = vld [vmem:[#allocation3 + $0x70] sm:$0xff]   ;;  %s2735_s24 = smov 96   ;;  %s2737_s25 = smov 64  }
  0x3c   : > { %v355_v61 = vsel %vm2850_vm8, %v324_v53, %v354_v35  ;;  %v358_v62 = vsel %vm2850_vm8, %v331_v54, %v357_v36  ;;  %v1143_v7 = vshrl.u32 %v2466_v47, 16  ;;  %v2733_v8 = vmov 1983009808   ;;  %2541 = vmatprep.subr.bf16.mxu0 %v2732_v1  ;;  %2563 = vmatprep.subr.bf16.mxu1 %v2732_v1  ;;  %s2494_s28 = sshll.u32 %s3281_s19, 6 }
  0x3d   : > { %356 = vst [vmem:[#allocation2 + $0x4] sm:$0x7] %v355_v61  ;;  %359 = vst [vmem:[#allocation2 + $0x8] sm:$0x7] %v358_v62  ;;  %v361_v3 = vsel %vm2850_vm8, %v338_v57, %v360_v43  ;;  %v364_v4 = vsel %vm2850_vm8, %v345_v59, %v363_v45  ;;  %v581_v9 = vunpack.c.l.s4 %v2733_v8  ;;  %v430_v10 = vrot.slane %v2854_v55, 7  ;;  %s3133_s30 = scalar_lea.vmem %s3258_s5, %s2494_s28 }
  0x3e   : > { %362 = vst [vmem:[#allocation2 + $0xc] sm:$0x7] %v361_v3  ;;  %365 = vst [vmem:[#allocation2 + $0x10] sm:$0x7] %v364_v4  ;;  %v1099_v11 = vcombine.high %v2466_v47, %v2466_v47  ;;  %v1146_v13 = vshll.u32 %v2466_v47, 16  ;;  %v2482_v16 = vrot.slane %v2844_v39, 9  ;;  %v830_v41 = vsel %vm2911_vm15, %v2443_v58, %v829_v0 }
  0x3f   : > { %v2891_v18 = vrot.slane %v1355_v2, 7  ;;  %v426_v20 = vrot.slane %v425_v6, 2  ;;  %v2901_v21 = vrot.slane %v1143_v7, 6  ;;  %v582_v22 = vunpack.c.0.s8 %v581_v9  ;;  %2542 = vmatpush3.bf16.msra.mxu0 %v2655_v14  ;;  %2564 = vmatpush3.bf16.msra.mxu1 %v2656_v24  ;;  %v2661_v3 = vld [vmem:[#allocation3 + $0x30] sm:$0xff]  }
  0x40   : > { %v2903_v23 = vshll.u32 %v1099_v11, 16  ;;  %v2905_v25 = vrot.slane %v1146_v13, 7  ;;  %2543 = vmatprep.subr.bf16.mxu0 %v2732_v1  ;;  %2565 = vmatprep.subr.bf16.mxu1 %v2732_v1  ;;  %vm2736_vm1 = vmmov 0   ;;  %vm656_vm3 = vcmask 261120  }
  0x41   : > { %v2924_v34 = vsub.s32 %v582_v22, %v2838_v17  ;;  %v2931_v49 = vsel %vm2919_vm0, %v426_v20, %v430_v10  ;;  %2571 = vmatprep.mubr.msk.bf16.mxu1 %vm2736_vm1, %v2732_v1  ;;  %2551 = vmatprep.mubr.msk.bf16.mxu0 %vm2736_vm1, %v2732_v1  ;;  %vm660_vm4 = vcmask 523264   ;;  %vm663_vm5 = vcmask 785408  }
  0x43   : > { %2544 = vmatpush3.bf16.msra.mxu0 %v2657_v26  ;;  %2566 = vmatpush3.bf16.msra.mxu1 %v2658_v33 }
  0x44   : > { %v2440_v27 = vld.sshfl [vmem:[#allocation2 + $0x4] sm:$0x12 pattern:$0x76325410]  ;;  %2545 = vmatprep.subr.bf16.mxu0 %v2732_v1  ;;  %2567 = vmatprep.subr.bf16.mxu1 %v2732_v1 }
  0x45   : > { %v2441_v29 = vld.sshfl [vmem:[#allocation2 + $0x8] sm:$0x12 pattern:$0x76325410]  ;;  %v803_v30 = vcombine.high %v2440_v27, %v2440_v27  ;;  %v2444_v31 = vrot.slane %v2440_v27, 9 }
  0x46   : > { %v2442_v35 = vld.sshfl [vmem:[#allocation2 + $0xc] sm:$0x12 pattern:$0x76325410]  ;;  %v811_v36 = vcombine.high %v2441_v29, %v2441_v29  ;;  %v2445_v37 = vrot.slane %v2441_v29, 9 }
  0x47   : > { %v819_v40 = vcombine.high %v2442_v35, %v2442_v35  ;;  %v833_v42 = vrot.slane %v803_v30, 7  ;;  %v2446_v43 = vrot.slane %v2442_v35, 9  ;;  %v2450_v44 = vld.sshfl [vmem:[#allocation2 + $0x10] sm:$0x12 pattern:$0x76325410]  ;;  %2546 = vmatpush3.bf16.msra.mxu0 %v2659_v38  ;;  %2568 = vmatpush3.bf16.msra.mxu1 %v2660_v60 }
  0x48   : > { %v837_v45 = vrot.slane %v811_v36, 7  ;;  %v882_v46 = vcombine.high %v2450_v44, %v2450_v44  ;;  %v2454_v47 = vrot.slane %v2450_v44, 9  ;;  %v2426_v48 = vld.sshfl [vmem:[#allocation2 + $0x4] sm:$0x13 pattern:$0x76325410]  ;;  %2547 = vmatprep.subr.bf16.mxu0 %v2732_v1  ;;  %2569 = vmatprep.subr.bf16.mxu1 %v2732_v1 }
  0x49   : > { %v834_v50 = vsel %vm2911_vm15, %v2444_v31, %v833_v42  ;;  %v841_v51 = vrot.slane %v819_v40, 7  ;;  %v2427_v52 = vld.sshfl [vmem:[#allocation2 + $0x8] sm:$0x13 pattern:$0x76325410]  ;;  %v493_v53 = vcombine.high %v2426_v48, %v2426_v48  ;;  %v519_v54 = vshrl.u32 %v2426_v48, 16 }
  0x4a   : > { %v838_v55 = vsel %vm2911_vm15, %v2445_v37, %v837_v45  ;;  %v899_v56 = vcombine.low %v830_v41, %v834_v50  ;;  %v897_v57 = vrot.slane %v882_v46, 7  ;;  %v2428_v58 = vld.sshfl [vmem:[#allocation2 + $0xc] sm:$0x13 pattern:$0x76325410]  ;;  %v501_v59 = vcombine.high %v2427_v52, %v2427_v52 }
  0x4b   : > { %v842_v61 = vsel %vm2911_vm15, %v2446_v43, %v841_v51  ;;  %v920_v62 = vcombine.low %v834_v50, %v838_v55  ;;  %v2429_v63 = vld.sshfl [vmem:[#allocation2 + $0x10] sm:$0x13 pattern:$0x76325410]  ;;  %v509_v0 = vcombine.high %v2428_v58, %v2428_v58  ;;  %v521_v2 = vrot.slane %v519_v54, 6  ;;  %2548 = vmatpush3.bf16.msra.mxu0 %v2661_v3  ;;  %2570 = vmatpush3.bf16.msra.mxu1 %v2662_v19 }
  0x4c   : > { %v900_v4 = vcombine.low %v838_v55, %v842_v61  ;;  %v907_v5 = vrot.slane %v899_v56, %v2924_v34  ;;  %v2944_v6 = vsel %vm2911_vm15, %v2454_v47, %v897_v57  ;;  %v517_v7 = vcombine.high %v2429_v63, %v2429_v63  ;;  %2549 = vmatprep.subr.bf16.mxu0 %v2732_v1  ;;  %v2665_v55 = vld [vmem:[#allocation3 + $0x38] sm:$0xff]  }
  0x4d   : > { %v921_v8 = vcombine.low %v842_v61, %v2944_v6  ;;  %v928_v9 = vrot.slane %v920_v62, %v2924_v34  ;;  %v522_v10 = vshll.u32 %v2426_v48, 16  ;;  %v528_v11 = vshll.u32 %v493_v53, 16  ;;  %2595 = vmatprep.subr.bf16.mxu1 %v2732_v1  ;;  %v2682_v61 = vld.sshfl [vmem:[#allocation2 + $0x4] sm:$0xf pattern:$0x76325410] }
  0x4e   : > { %v2950_v12 = vrot.slane %v900_v4, %v2924_v34  ;;  %v533_v13 = vshrl.u32 %v2427_v52, 16  ;;  %v536_v14 = vshll.u32 %v2427_v52, 16  ;;  %v542_v15 = vshll.u32 %v501_v59, 16 }
  0x4f   : > { %v935_v20 = vrot.slane %v921_v8, %v2924_v34  ;;  %v524_v22 = vrot.slane %v522_v10, 7  ;;  %v530_v24 = vrot.slane %v528_v11, 7  ;;  %v547_v26 = vshrl.u32 %v2428_v58, 16  ;;  %2550 = vmatpush3.bf16.msra.mxu0 %v2665_v55  ;;  %v2677_v55 = vld [vmem:[#allocation3 + $0xa8] sm:$0xff]  }
  0x50   : > { %v915_v27 = vcombine.low %v907_v5, %v2950_v12  ;;  %v535_v29 = vrot.slane %v533_v13, 6  ;;  %v538_v30 = vrot.slane %v536_v14, 7  ;;  %v544_v31 = vrot.slane %v542_v15, 7  ;;  %2575 = vmatprep.subr.bf16.mxu0 %v2732_v1 }
  0x51   : > { %v2956_v33 = vcombine.low %v928_v9, %v935_v20  ;;  %v525_v35 = vor.u32 %v524_v22, %v521_v2  ;;  %v549_v36 = vrot.slane %v547_v26, 6  ;;  %v550_v37 = vshll.u32 %v2428_v58, 16  ;;  %v2684_v13 = vld.sshfl [vmem:[#allocation2 + $0x8] sm:$0xf pattern:$0x76325410] }
  0x52   : > { %916 = vrot.lane.b32.xlu0 %v915_v27, %s2734_s23  ;;  %v539_v38 = vor.u32 %v538_v30, %v535_v29  ;;  %v556_v40 = vshll.u32 %v509_v0, 16  ;;  %v561_v41 = vshrl.u32 %v2429_v63, 16  ;;  %v564_v42 = vshll.u32 %v2429_v63, 16 }
  0x53   : > { %937 = vrot.lane.b32.xlu1 %v2956_v33, %s2735_s24  ;;  %v526_v43 = vrot.slane %v525_v35, 2  ;;  %v552_v44 = vrot.slane %v550_v37, 7  ;;  %v570_v45 = vshll.u32 %v517_v7, 16  ;;  %v1149_v46 = vor.u32 %v2905_v25, %v2901_v21 }
  0x54   : > { %v540_v47 = vrot.slane %v539_v38, 2  ;;  %v558_v48 = vrot.slane %v556_v40, 7  ;;  %v563_v50 = vrot.slane %v561_v41, 6  ;;  %v566_v51 = vrot.slane %v564_v42, 7  ;;  %v2667_v40 = vld [vmem:[#allocation3 + $0x80] sm:$0xff]   ;;  %v2668_v41 = vld [vmem:[#allocation3 + $0xc8] sm:$0xff]  }
  0x55   : > { %v531_v52 = vsel %vm2919_vm0, %v526_v43, %v530_v24  ;;  %v553_v53 = vor.u32 %v552_v44, %v549_v36  ;;  %v572_v54 = vrot.slane %v570_v45, 7  ;;  %v1154_v25 = vrot.slane %v2903_v23, 7  ;;  %v2683_v0 = vld.sshfl [vmem:[#allocation2 + $0xc] sm:$0xf pattern:$0x76325410] }
  0x56   : > { %v545_v56 = vsel %vm2919_vm0, %v540_v47, %v544_v31  ;;  %v567_v57 = vor.u32 %v566_v51, %v563_v50  ;;  %v595_v58 = vcombine.low %v2931_v49, %v531_v52  ;;  %v1150_v62 = vrot.slane %v1149_v46, 2  ;;  %v2685_v14 = vld.sshfl [vmem:[#allocation2 + $0x10] sm:$0xf pattern:$0x76325410]  ;;  %v2666_v31 = vld [vmem:[#allocation3 + $0xc0] sm:$0xff]  }
  0x57   : > { %v554_v59 = vrot.slane %v553_v53, 2  ;;  %v637_v21 = vcombine.low %v531_v52, %v545_v56  ;;  %v1371_v49 = vsel %vm2911_vm15, %v2482_v16, %v2891_v18  ;;  %v2996_v32 = vcombine.low %v2682_v61, %v2683_v0  ;;  %v2687_v20 = vld.sshfl [vmem:[#allocation2] sm:$0xf pattern:$0x76325410]  ;;  %v2670_v45 = vld [vmem:[#allocation3 + $0xd0] sm:$0xff]  }
  0x58   : > { %v568_v60 = vrot.slane %v567_v57, 2  ;;  %v603_v3 = vrot.slane %v595_v58, %v2924_v34  ;;  %v1377_v8 = vcombine.low %v2944_v6, %v1371_v49  ;;  %v1155_v9 = vsel %vm2919_vm0, %v1150_v62, %v1154_v25  ;;  %v2669_v44 = vld [vmem:[#allocation3 + $0x88] sm:$0xff]   ;;  %v2671_v46 = vld [vmem:[#allocation3 + $0x90] sm:$0xff]   ;;  %v2672_v47 = vld [vmem:[#allocation3 + $0xd8] sm:$0xff]  }
  0x59   : > { %v559_v63 = vsel %vm2919_vm0, %v554_v59, %v558_v48  ;;  %v645_v5 = vrot.slane %v637_v21, %v2924_v34  ;;  %v1178_v19 = vcombine.low %v2684_v13, %v2685_v14  ;;  %v2673_v48 = vld [vmem:[#allocation3 + $0x98] sm:$0xff]   ;;  %v2674_v50 = vld [vmem:[#allocation3 + $0xe0] sm:$0xff]   ;;  %v2676_v52 = vld [vmem:[#allocation3 + $0xe8] sm:$0xff]  }
  0x5a   : > { %v573_v2 = vsel %vm2919_vm0, %v568_v60, %v572_v54  ;;  %v596_v23 = vcombine.low %v545_v56, %v559_v63  ;;  %v1391_v28 = vrot.slane %v1377_v8, %v2924_v34  ;;  %v2675_v51 = vld [vmem:[#allocation3 + $0xa0] sm:$0xff]   ;;  %v2678_v56 = vld [vmem:[#allocation3 + $0xf0] sm:$0xff]   ;;  %v2680_v25 = vld [vmem:[#allocation3 + $0xf8] sm:$0xff]  }
  0x5b   : > { %v638_v4 = vcombine.low %v559_v63, %v573_v2  ;;  %v1182_v6 = vcombine.low %v573_v2, %v1155_v9  ;;  %v2679_v21 = vld [vmem:[#allocation3 + $0xb0] sm:$0xff]   ;;  %v2681_v63 = vld [vmem:[#allocation3 + $0xb8] sm:$0xff]  }
  0x5c   : > { %v610_v7 = vrot.slane %v596_v23, %v2924_v34  ;;  %v1392_v10 = vcombine.low %v2950_v12, %v1391_v28  ;;  %v2686_v12 = vld.sshfl [vmem:[#allocation2 + $0x8] sm:$0xf pattern:$0x76325410] }
  0x5d   : > { %v652_v39 = vrot.slane %v638_v4, %v2924_v34  ;;  %v1196_v11 = vrot.slane %v1182_v6, %v2924_v34  ;;  %v594_v30 = vcombine.low %v2687_v20, %v2686_v12 }
  0x5e   : > { %v611_v16 = vcombine.low %v603_v3, %v610_v7  ;;  %v2738_v3 = vmov 1966171168  }
  0x5f   : > { %v2991_v18 = vcombine.low %v645_v5, %v652_v39  ;;  %v1197_v15 = vcombine.low %v610_v7, %v1196_v11  ;;  %v1515_v4 = vunpack.c.l.s4 %v2738_v3  ;;  %v3044_v7 = vld [vmem:[%s3257_s4] ss:$0 sm:$0xff] }
  0x60   : > { %612 = vrot.lane.b32.xlu1 %v611_v16, %s2734_s23 }
  0x61   : > { %918 = vrot.lane.b32.xlu0 %v2991_v18, %s2737_s25  ;;  %v1516_v5 = vunpack.c.0.s8 %v1515_v4 }
  0x64   : > { %654 = vrot.lane.b32.xlu1 %v2991_v18, %s2735_s24 }
  0x65   : > { %635 = vrot.lane.b32.xlu0 %v2996_v32, %s2737_s25 }
  0x68   : > { %1393 = vrot.lane.b32.xlu1 %v1392_v10, %s2735_s24 }
  0x69   : > { %1372 = vrot.lane.b32.xlu0 %v2956_v33, %s2734_s23 }
  0x6c   : > { %1374 = vrot.lane.b32.xlu1 %v1197_v15, %s2737_s25 }
  0x6d   : > { %1156 = vrot.lane.b32.xlu0 %v2991_v18, %s2734_s23 }
  0x70   : > { %1198 = vrot.lane.b32.xlu1 %v1197_v15, %s2735_s24 }
  0x71   : > { %1179 = vrot.lane.b32.xlu0 %v1178_v19, %s2737_s25 }
  0xc4   : > { %v917_v24 = vpop.permute.xlu0 %916 }
  0xc5   : > { %v938_v22 = vpop.permute.xlu1 %937  ;;  %v941_v27 = vsel %vm656_vm3, %v611_v16, %v917_v24 }
  0xd2   : > { %v613_v26 = vpop.permute.xlu1 %612 }
  0xd3   : > { %v919_v29 = vpop.permute.xlu0 %918  ;;  %v659_v37 = vsel %vm656_vm3, %v594_v30, %v613_v26 }
  0xd4   : > { %v943_v33 = vsel %vm660_vm4, %v941_v27, %v919_v29  ;;  %v3056_v27 = vsub.s32 0, %v2838_v17 }
  0xd5   : > { %v945_v35 = vsel %vm663_vm5, %v943_v33, %v938_v22 }
  0xd6   : > { %2572 = vmatmul.mubr.bf16.vlgmr.msra.gmra.mrb[0].mxu1 %v945_v35  ;;  %v655_v36 = vpop.permute.xlu1 %654 }
  0xd7   : > { %2596 = vmatpush3.bf16.msra.mxu1 %v2666_v31  ;;  %v636_v38 = vpop.permute.xlu0 %635  ;;  %2611 = vmatprep.mubr.msk.bf16.mxu1 %vm2736_vm1, %v2732_v1 }
  0xd8   : > { %v662_v42 = vsel %vm660_vm4, %v659_v37, %v636_v38  ;;  %2597 = vmatprep.subr.bf16.mxu1 %v2732_v1 }
  0xd9   : > { %v665_v43 = vsel %vm663_vm5, %v662_v42, %v655_v36 }
  0xda   : > { %2552 = vmatmul.mubr.bf16.vlgmr.msra.gmra.mrb[0].mxu0 %v665_v43  ;;  %v1394_v54 = vpop.permute.xlu1 %1393 }
  0xdb   : > { %2576 = vmatpush3.bf16.msra.mxu0 %v2667_v40  ;;  %2598 = vmatpush3.bf16.msra.mxu1 %v2668_v41  ;;  %v1373_v53 = vpop.permute.xlu0 %1372 }
  0xdc   : > { %2577 = vmatprep.subr.bf16.mxu0 %v2732_v1  ;;  %2599 = vmatprep.subr.bf16.mxu1 %v2732_v1  ;;  %v1397_v58 = vsel %vm656_vm3, %v2991_v18, %v1373_v53 }
  0xdd   : > { %2591 = vmatprep.mubr.msk.bf16.mxu0 %vm2736_vm1, %v2732_v1 }
  0xde   : > { %v1375_v59 = vpop.permute.xlu1 %1374 }
  0xdf   : > { %2578 = vmatpush3.bf16.msra.mxu0 %v2669_v44  ;;  %2600 = vmatpush3.bf16.msra.mxu1 %v2670_v45  ;;  %v1157_v57 = vpop.permute.xlu0 %1156  ;;  %v1399_v60 = vsel %vm660_vm4, %v1397_v58, %v1375_v59 }
  0xe0   : > { %2579 = vmatprep.subr.bf16.mxu0 %v2732_v1  ;;  %2601 = vmatprep.subr.bf16.mxu1 %v2732_v1  ;;  %v1202_v61 = vsel %vm656_vm3, %v2996_v32, %v1157_v57  ;;  %v1401_v0 = vsel %vm663_vm5, %v1399_v60, %v1394_v54 }
  0xe2   : > { %v1199_v2 = vpop.permute.xlu1 %1198 }
  0xe3   : > { %2580 = vmatpush3.bf16.msra.mxu0 %v2671_v46  ;;  %2602 = vmatpush3.bf16.msra.mxu1 %v2672_v47  ;;  %v1180_v62 = vpop.permute.xlu0 %1179 }
  0xe4   : > { %2581 = vmatprep.subr.bf16.mxu0 %v2732_v1  ;;  %2603 = vmatprep.subr.bf16.mxu1 %v2732_v1  ;;  %v1204_v49 = vsel %vm660_vm4, %v1202_v61, %v1180_v62 }
  0xe5   : > { %v1206_v23 = vsel %vm663_vm5, %v1204_v49, %v1199_v2 }
  0xe7   : > { %2582 = vmatpush3.bf16.msra.mxu0 %v2673_v48  ;;  %2604 = vmatpush3.bf16.msra.mxu1 %v2674_v50 }
  0xe8   : > { %2583 = vmatprep.subr.bf16.mxu0 %v2732_v1  ;;  %2605 = vmatprep.subr.bf16.mxu1 %v2732_v1 }
  0xeb   : > { %2584 = vmatpush3.bf16.msra.mxu0 %v2675_v51  ;;  %2606 = vmatpush3.bf16.msra.mxu1 %v2676_v52 }
  0xec   : > { %2585 = vmatprep.subr.bf16.mxu0 %v2732_v1  ;;  %2607 = vmatprep.subr.bf16.mxu1 %v2732_v1 }
  0xef   : > { %2586 = vmatpush3.bf16.msra.mxu0 %v2677_v55  ;;  %2608 = vmatpush3.bf16.msra.mxu1 %v2678_v56 }
  0xf0   : > { %2587 = vmatprep.subr.bf16.mxu0 %v2732_v1  ;;  %2609 = vmatprep.subr.bf16.mxu1 %v2732_v1 }
  0xf3   : > { %2588 = vmatpush3.bf16.msra.mxu0 %v2679_v21  ;;  %2610 = vmatpush3.bf16.msra.mxu1 %v2680_v25 }
  0xf4   : > { %2589 = vmatprep.subr.bf16.mxu0 %v2732_v1  ;;  %v3047_v1 = vsub.s32 %v1516_v5, %v2838_v17 }
  0xf6   : > { %2612 = vmatmul.mubr.bf16.vlgmr.msra.gmra.mrb[4].mxu1 %v1401_v0 }
  0xf7   : > { %2590 = vmatpush3.bf16.msra.mxu0 %v2681_v63 }
  0xfa   : > { %2592 = vmatmul.mubr.bf16.vlgmr.msra.gmra.mrb[4].mxu0 %v1206_v23 }
 0x1a9   : > { %v1046_v8 = vpop.f32.mrb[0].mxu1 }
 0x1aa   : > { %v1047_v9 = vadd.f32 %v3044_v7, %v1046_v8  ;;  %v2573_v39 = vpop.f32.mrb[1].mxu1 }
 0x1ab   : > { %v1049_v16 = vpop.f32.mrb[2].mxu1 }
 0x1ac   : > { %v1053_v18 = vmax.f32 %v1047_v9, 0.0  ;;  %v1050_v28 = vadd.f32 %v3044_v7, %v1049_v16  ;;  %v2574_v6 = vpop.f32.mrb[3].mxu1 }
 0x1ad   : > { %v771_v32 = vpop.f32.mrb[0].mxu0 }
 0x1ae   : > { %v1629_v10 = vcombine.high %v1053_v18, %v1053_v18  ;;  %v1636_v11 = vrot.slane %v1053_v18, %v3047_v1  ;;  %v1054_v13 = vmax.f32 %v1050_v28, 0.0  ;;  %v2553_v14 = vpop.f32.mrb[1].mxu0  ;;  %v772_v15 = vadd.f32 %v3044_v7, %v771_v32 }
 0x1af   : > { %v774_v19 = vpop.f32.mrb[2].mxu0 }
 0x1b0   : > { %v1643_v12 = vrot.slane %v1629_v10, %v3047_v1  ;;  %v1644_v20 = vcombine.high %v1636_v11, %v1636_v11  ;;  %v1652_v22 = vrot.slane %v1636_v11, %v3047_v1  ;;  %v1678_v24 = vcombine.high %v1054_v13, %v1054_v13  ;;  %v2554_v26 = vpop.f32.mrb[3].mxu0 }
 0x1b1   : > { %v1685_v29 = vrot.slane %v1054_v13, %v3047_v1  ;;  %v778_v17 = vmax.f32 %v772_v15, 0.0  ;;  %v775_v46 = vadd.f32 %v3044_v7, %v774_v19 }
 0x1b2   : > { %v1645_v30 = vcombine.high %v1643_v12, %v1643_v12  ;;  %v1659_v31 = vrot.slane %v1643_v12, %v3047_v1  ;;  %v1666_v33 = vrot.slane %v1644_v20, %v3047_v1  ;;  %v1674_v35 = vcombine.high %v1652_v22, %v1652_v22 }
 0x1b3   : > { %v1692_v36 = vrot.slane %v1678_v24, %v3047_v1  ;;  %v1693_v37 = vcombine.high %v1685_v29, %v1685_v29  ;;  %v3063_v38 = vrot.slane %v1685_v29, %v3047_v1  ;;  %v1730_v43 = vrot.slane %v1652_v22, %v3056_v27 }
 0x1b4   : > { %v1673_v40 = vrot.slane %v1645_v30, %v3047_v1  ;;  %v1675_v41 = vcombine.high %v1659_v31, %v1659_v31  ;;  %v1676_v42 = vcombine.high %v1666_v33, %v1666_v33  ;;  %v1734_v48 = vrot.slane %v1666_v33, %v3056_v27 }
 0x1b5   : > { %v1694_v44 = vcombine.high %v1692_v36, %v1692_v36  ;;  %v3068_v45 = vrot.slane %v1692_v36, %v3047_v1  ;;  %v1738_v50 = vrot.slane %v1674_v35, %v3056_v27  ;;  %v1746_v51 = vrot.slane %v1659_v31, %v3056_v27 }
 0x1b6   : > { %v1677_v47 = vcombine.high %v1673_v40, %v1673_v40  ;;  %v3075_v52 = vrot.slane %v1693_v37, %v3047_v1  ;;  %v1723_v54 = vcombine.high %v3063_v38, %v3063_v38  ;;  %v1742_v56 = vrot.slane %v1676_v42, %v3056_v27 }
 0x1b7   : > { %v3078_v53 = vrot.slane %v1694_v44, %v3047_v1  ;;  %v1724_v55 = vcombine.high %v3068_v45, %v3068_v45  ;;  %v1750_v57 = vrot.slane %v1673_v40, %v3056_v27  ;;  %v1754_v58 = vrot.slane %v1675_v41, %v3056_v27 }
 0x1b8   : > { %v1513_v59 = vcombine.high %v778_v17, %v778_v17  ;;  %v1758_v21 = vrot.slane %v1677_v47, %v3056_v27  ;;  %v1725_v25 = vcombine.high %v3075_v52, %v3075_v52  ;;  %v1762_v61 = vrot.slane %v3063_v38, %v3056_v27 }
 0x1b9   : > { %v1726_v60 = vcombine.high %v3078_v53, %v3078_v53  ;;  %v1766_v62 = vrot.slane %v3075_v52, %v3056_v27  ;;  %v1778_v63 = vrot.slane %v3068_v45, %v3056_v27  ;;  %v1520_v0 = vrot.slane %v778_v17, %v3047_v1 }
 0x1ba   : > { %v1527_v49 = vrot.slane %v1513_v59, %v3047_v1  ;;  %v1770_v2 = vrot.slane %v1723_v54, %v3056_v27  ;;  %v1782_v23 = vrot.slane %v3078_v53, %v3056_v27  ;;  %v1786_v3 = vrot.slane %v1724_v55, %v3056_v27 }
 0x1bb   : > { %v779_v4 = vmax.f32 %v775_v46, 0.0  ;;  %v1528_v5 = vcombine.high %v1520_v0, %v1520_v0  ;;  %v1536_v9 = vrot.slane %v1520_v0, %v3047_v1  ;;  %v1774_v16 = vrot.slane %v1725_v25, %v3056_v27 }
 0x1bc   : > { %v1529_v8 = vcombine.high %v1527_v49, %v1527_v49  ;;  %v1543_v39 = vrot.slane %v1527_v49, %v3047_v1  ;;  %v1790_v18 = vrot.slane %v1726_v60, %v3056_v27 }
 0x1bd   : > { %v1562_v28 = vcombine.high %v779_v4, %v779_v4  ;;  %v1569_v6 = vrot.slane %v779_v4, %v3047_v1  ;;  %v1550_v32 = vrot.slane %v1528_v5, %v3047_v1  ;;  %v1558_v11 = vcombine.high %v1536_v9, %v1536_v9 }
 0x1be   : > { %v1557_v10 = vrot.slane %v1529_v8, %v3047_v1  ;;  %v1559_v13 = vcombine.high %v1543_v39, %v1543_v39  ;;  %v1808_v14 = vsel %vm820_vm2, %v1536_v9, %v1730_v43  ;;  %v1812_v15 = vsel %vm820_vm2, %v1543_v39, %v1746_v51 }
 0x1bf   : > { %v1576_v19 = vrot.slane %v1562_v28, %v3047_v1  ;;  %v1577_v12 = vcombine.high %v1569_v6, %v1569_v6  ;;  %v1560_v20 = vcombine.high %v1550_v32, %v1550_v32  ;;  %v1809_v24 = vsel %vm820_vm2, %v1550_v32, %v1734_v48 }
 0x1c0   : > { %v1561_v22 = vcombine.high %v1557_v10, %v1557_v10  ;;  %v1810_v26 = vsel %vm820_vm2, %v1558_v11, %v1738_v50  ;;  %v1813_v29 = vsel %vm820_vm2, %v1557_v10, %v1750_v57  ;;  %v1814_v30 = vsel %vm820_vm2, %v1559_v13, %v1754_v58 }
 0x1c1   : > { %v2168_v31 = vcombine.low %v1808_v14, %v1809_v24  ;;  %v1578_v33 = vcombine.high %v1576_v19, %v1576_v19  ;;  %v1811_v35 = vsel %vm820_vm2, %v1560_v20, %v1742_v56  ;;  %v2202_v37 = vcombine.low %v1812_v15, %v1813_v29 }
 0x1c2   : > { %v1815_v36 = vsel %vm820_vm2, %v1561_v22, %v1758_v21  ;;  %v1585_v38 = vrot.slane %v1569_v6, %v3047_v1  ;;  %v2169_v40 = vcombine.low %v1810_v26, %v1811_v35  ;;  %v1592_v17 = vrot.slane %v1576_v19, %v3047_v1 }
 0x1c3   : > { %v2176_v41 = vrot.slane %v2168_v31, %v2924_v34  ;;  %v2203_v42 = vcombine.low %v1814_v30, %v1815_v36  ;;  %v2210_v43 = vrot.slane %v2202_v37, %v2924_v34  ;;  %v1599_v44 = vrot.slane %v1577_v12, %v3047_v1 }
 0x1c4   : > { %v1606_v45 = vrot.slane %v1578_v33, %v3047_v1  ;;  %v1607_v46 = vcombine.high %v1585_v38, %v1585_v38  ;;  %v2183_v47 = vrot.slane %v2169_v40, %v2924_v34  ;;  %v1608_v50 = vcombine.high %v1592_v17, %v1592_v17 }
 0x1c5   : > { %v2217_v48 = vrot.slane %v2203_v42, %v2924_v34  ;;  %v1816_v51 = vsel %vm820_vm2, %v1585_v38, %v1762_v61  ;;  %v1609_v52 = vcombine.high %v1599_v44, %v1599_v44  ;;  %v1817_v54 = vsel %vm820_vm2, %v1599_v44, %v1766_v62 }
 0x1c6   : > { %v1610_v53 = vcombine.high %v1606_v45, %v1606_v45  ;;  %v1818_v55 = vsel %vm820_vm2, %v1607_v46, %v1770_v2  ;;  %v2184_v56 = vcombine.low %v2176_v41, %v2183_v47  ;;  %v1820_v58 = vsel %vm820_vm2, %v1592_v17, %v1778_v63 }
 0x1c7   : > { %v2218_v57 = vcombine.low %v2210_v43, %v2217_v48  ;;  %v1821_v59 = vsel %vm820_vm2, %v1606_v45, %v1782_v23  ;;  %v1819_v21 = vsel %vm820_vm2, %v1609_v52, %v1774_v16  ;;  %v1822_v25 = vsel %vm820_vm2, %v1608_v50, %v1786_v3 }
 0x1c8   : > { %v1823_v60 = vsel %vm820_vm2, %v1610_v53, %v1790_v18  ;;  %v2236_v61 = vcombine.low %v1816_v51, %v1817_v54  ;;  %2312 = vst.msk [vmem:[%s3133_s30] sm:$0xff] %vm656_vm3, %v2184_v56  ;;  %v2237_v62 = vcombine.low %v1818_v55, %v1819_v21  ;;  %v2270_v0 = vcombine.low %v1820_v58, %v1821_v59 }
 0x1c9   : > { %2314 = vst.msk [vmem:[%s3133_s30 + $0x10] sm:$0xff] %vm656_vm3, %v2218_v57  ;;  %v2271_v49 = vcombine.low %v1822_v25, %v1823_v60  ;;  %v1502_v2 = vpop.f32.mrb[4].mxu1 }
 0x1ca   : > { %v1503_v4 = vadd.f32 %v3044_v7, %v1502_v2  ;;  %v2613_v63 = vpop.f32.mrb[5].mxu1  ;;  %v2244_v23 = vrot.slane %v2236_v61, %v2924_v34  ;;  %v2251_v3 = vrot.slane %v2237_v62, %v2924_v34  ;;  %v2278_v5 = vrot.slane %v2270_v0, %v2924_v34 }
 0x1cb   : > { %v2285_v8 = vrot.slane %v2271_v49, %v2924_v34  ;;  %v1505_v9 = vpop.f32.mrb[6].mxu1 }
 0x1cc   : > { %v1509_v39 = vmax.f32 %v1503_v4, 0.0  ;;  %v1506_v16 = vadd.f32 %v3044_v7, %v1505_v9  ;;  %v2614_v18 = vpop.f32.mrb[7].mxu1  ;;  %v2252_v28 = vcombine.low %v2244_v23, %v2251_v3 }
 0x1cd   : > { %v2286_v6 = vcombine.low %v2278_v5, %v2285_v8  ;;  %v1307_v32 = vpop.f32.mrb[4].mxu0 }
 0x1ce   : > { %v1942_v10 = vcombine.high %v1509_v39, %v1509_v39  ;;  %v1949_v11 = vrot.slane %v1509_v39, %v3047_v1  ;;  %v1510_v13 = vmax.f32 %v1506_v16, 0.0  ;;  %v2593_v14 = vpop.f32.mrb[5].mxu0  ;;  %2316 = vst.msk [vmem:[%s3133_s30 + $0x20] sm:$0xff] %vm656_vm3, %v2252_v28  ;;  %v1308_v15 = vadd.f32 %v3044_v7, %v1307_v32 }
 0x1cf   : > { %2318 = vst.msk [vmem:[%s3133_s30 + $0x30] sm:$0xff] %vm656_vm3, %v2286_v6  ;;  %v1310_v19 = vpop.f32.mrb[6].mxu0 }
 0x1d0   : > { %v1956_v12 = vrot.slane %v1942_v10, %v3047_v1  ;;  %v1957_v20 = vcombine.high %v1949_v11, %v1949_v11  ;;  %v1965_v22 = vrot.slane %v1949_v11, %v3047_v1  ;;  %v1991_v24 = vcombine.high %v1510_v13, %v1510_v13  ;;  %v2594_v26 = vpop.f32.mrb[7].mxu0 }
 0x1d1   : > { %v1998_v29 = vrot.slane %v1510_v13, %v3047_v1  ;;  %v1314_v17 = vmax.f32 %v1308_v15, 0.0  ;;  %v1311_v46 = vadd.f32 %v3044_v7, %v1310_v19 }
 0x1d2   : > { %v1958_v30 = vcombine.high %v1956_v12, %v1956_v12  ;;  %v1972_v31 = vrot.slane %v1956_v12, %v3047_v1  ;;  %v1979_v33 = vrot.slane %v1957_v20, %v3047_v1  ;;  %v1987_v35 = vcombine.high %v1965_v22, %v1965_v22 }
 0x1d3   : > { %v2005_v36 = vrot.slane %v1991_v24, %v3047_v1  ;;  %v2006_v37 = vcombine.high %v1998_v29, %v1998_v29  ;;  %v3165_v38 = vrot.slane %v1998_v29, %v3047_v1  ;;  %v2043_v43 = vrot.slane %v1965_v22, %v3056_v27 }
 0x1d4   : > { %v1986_v40 = vrot.slane %v1958_v30, %v3047_v1  ;;  %v1988_v41 = vcombine.high %v1972_v31, %v1972_v31  ;;  %v1989_v42 = vcombine.high %v1979_v33, %v1979_v33  ;;  %v2047_v48 = vrot.slane %v1979_v33, %v3056_v27 }
 0x1d5   : > { %v2007_v44 = vcombine.high %v2005_v36, %v2005_v36  ;;  %v3170_v45 = vrot.slane %v2005_v36, %v3047_v1  ;;  %v2051_v50 = vrot.slane %v1987_v35, %v3056_v27  ;;  %v2059_v51 = vrot.slane %v1972_v31, %v3056_v27 }
 0x1d6   : > { %v1990_v47 = vcombine.high %v1986_v40, %v1986_v40  ;;  %v3177_v52 = vrot.slane %v2006_v37, %v3047_v1  ;;  %v2036_v54 = vcombine.high %v3165_v38, %v3165_v38  ;;  %v2055_v7 = vrot.slane %v1989_v42, %v3056_v27 }
 0x1d7   : > { %v3180_v53 = vrot.slane %v2007_v44, %v3047_v1  ;;  %v2037_v55 = vcombine.high %v3170_v45, %v3170_v45  ;;  %v2063_v56 = vrot.slane %v1986_v40, %v3056_v27  ;;  %v2067_v57 = vrot.slane %v1988_v41, %v3056_v27 }
 0x1d8   : > { %v1826_v58 = vcombine.high %v1314_v17, %v1314_v17  ;;  %v2071_v59 = vrot.slane %v1990_v47, %v3056_v27  ;;  %v2038_v21 = vcombine.high %v3177_v52, %v3177_v52  ;;  %v2075_v60 = vrot.slane %v3165_v38, %v3056_v27 }
 0x1d9   : > { %v2039_v25 = vcombine.high %v3180_v53, %v3180_v53  ;;  %v2079_v61 = vrot.slane %v3177_v52, %v3056_v27  ;;  %v2091_v62 = vrot.slane %v3170_v45, %v3056_v27  ;;  %v1833_v0 = vrot.slane %v1314_v17, %v3047_v1 }
 0x1da   : > { %v1840_v49 = vrot.slane %v1826_v58, %v3047_v1  ;;  %v2083_v2 = vrot.slane %v2036_v54, %v3056_v27  ;;  %v2095_v4 = vrot.slane %v3180_v53, %v3056_v27  ;;  %v2099_v63 = vrot.slane %v2037_v55, %v3056_v27 }
 0x1db   : > { %v1315_v23 = vmax.f32 %v1311_v46, 0.0  ;;  %v1841_v3 = vcombine.high %v1833_v0, %v1833_v0  ;;  %v1849_v8 = vrot.slane %v1833_v0, %v3047_v1  ;;  %v2087_v39 = vrot.slane %v2038_v21, %v3056_v27 }
 0x1dc   : > { %v1842_v5 = vcombine.high %v1840_v49, %v1840_v49  ;;  %v1856_v9 = vrot.slane %v1840_v49, %v3047_v1  ;;  %v2103_v16 = vrot.slane %v2039_v25, %v3056_v27 }
 0x1dd   : > { %v1875_v18 = vcombine.high %v1315_v23, %v1315_v23  ;;  %v1882_v28 = vrot.slane %v1315_v23, %v3047_v1  ;;  %v1863_v6 = vrot.slane %v1841_v3, %v3047_v1  ;;  %v1871_v10 = vcombine.high %v1849_v8, %v1849_v8 }
 0x1de   : > { %v1870_v32 = vrot.slane %v1842_v5, %v3047_v1  ;;  %v1872_v11 = vcombine.high %v1856_v9, %v1856_v9  ;;  %v2120_v13 = vsel %vm820_vm2, %v1849_v8, %v2043_v43  ;;  %v2124_v14 = vsel %vm820_vm2, %v1856_v9, %v2059_v51 }
 0x1df   : > { %v1889_v15 = vrot.slane %v1875_v18, %v3047_v1  ;;  %v1890_v19 = vcombine.high %v1882_v28, %v1882_v28  ;;  %v1873_v12 = vcombine.high %v1863_v6, %v1863_v6  ;;  %v2121_v27 = vsel %vm820_vm2, %v1863_v6, %v2047_v48 }
 0x1e0   : > { %v1874_v20 = vcombine.high %v1870_v32, %v1870_v32  ;;  %v2122_v22 = vsel %vm820_vm2, %v1871_v10, %v2051_v50  ;;  %v2125_v24 = vsel %vm820_vm2, %v1870_v32, %v2063_v56  ;;  %v2126_v26 = vsel %vm820_vm2, %v1872_v11, %v2067_v57 }
 0x1e1   : > { %v2185_v29 = vcombine.low %v2120_v13, %v2121_v27  ;;  %v1891_v30 = vcombine.high %v1889_v15, %v1889_v15  ;;  %v2123_v31 = vsel %vm820_vm2, %v1873_v12, %v2055_v7  ;;  %v2219_v35 = vcombine.low %v2124_v14, %v2125_v24 }
 0x1e2   : > { %v2127_v33 = vsel %vm820_vm2, %v1874_v20, %v2071_v59  ;;  %v1898_v36 = vrot.slane %v1882_v28, %v3047_v1  ;;  %v2186_v37 = vcombine.low %v2122_v22, %v2123_v31  ;;  %v1905_v41 = vrot.slane %v1889_v15, %v3047_v1 }
 0x1e3   : > { %v2193_v38 = vrot.slane %v2185_v29, %v2924_v34  ;;  %v2220_v40 = vcombine.low %v2126_v26, %v2127_v33  ;;  %v2227_v42 = vrot.slane %v2219_v35, %v2924_v34  ;;  %v1912_v17 = vrot.slane %v1890_v19, %v3047_v1 }
 0x1e4   : > { %v1919_v43 = vrot.slane %v1891_v30, %v3047_v1  ;;  %v1920_v44 = vcombine.high %v1898_v36, %v1898_v36  ;;  %v2200_v45 = vrot.slane %v2186_v37, %v2924_v34  ;;  %v1921_v47 = vcombine.high %v1905_v41, %v1905_v41 }
 0x1e5   : > { %v2234_v46 = vrot.slane %v2220_v40, %v2924_v34  ;;  %v2128_v48 = vsel %vm820_vm2, %v1898_v36, %v2075_v60  ;;  %v1922_v50 = vcombine.high %v1912_v17, %v1912_v17  ;;  %v2129_v52 = vsel %vm820_vm2, %v1912_v17, %v2079_v61 }
 0x1e6   : > { %v1923_v51 = vcombine.high %v1919_v43, %v1919_v43  ;;  %v2130_v53 = vsel %vm820_vm2, %v1920_v44, %v2083_v2  ;;  %v2201_v54 = vcombine.low %v2193_v38, %v2200_v45  ;;  %v2132_v1 = vsel %vm820_vm2, %v1905_v41, %v2091_v62 }
 0x1e7   : > { %v2235_v55 = vcombine.low %v2227_v42, %v2234_v46  ;;  %v2133_v7 = vsel %vm820_vm2, %v1919_v43, %v2095_v4  ;;  %v2131_v56 = vsel %vm820_vm2, %v1922_v50, %v2087_v39  ;;  %v2134_v57 = vsel %vm820_vm2, %v1921_v47, %v2099_v63 }
 0x1e8   : > { %v2135_v58 = vsel %vm820_vm2, %v1923_v51, %v2103_v16  ;;  %v2253_v59 = vcombine.low %v2128_v48, %v2129_v52  ;;  %2313 = vst.msk [vmem:[%s3133_s30 + $0x8] sm:$0xff] %vm656_vm3, %v2201_v54  ;;  %v2254_v21 = vcombine.low %v2130_v53, %v2131_v56  ;;  %v2287_v25 = vcombine.low %v2132_v1, %v2133_v7 }
 0x1e9   : > { %2315 = vst.msk [vmem:[%s3133_s30 + $0x18] sm:$0xff] %vm656_vm3, %v2235_v55  ;;  %v2288_v60 = vcombine.low %v2134_v57, %v2135_v58 }
 0x1ea   : > { %v2261_v61 = vrot.slane %v2253_v59, %v2924_v34  ;;  %v2268_v62 = vrot.slane %v2254_v21, %v2924_v34  ;;  %v2295_v0 = vrot.slane %v2287_v25, %v2924_v34 }
 0x1eb   : > { %v2302_v49 = vrot.slane %v2288_v60, %v2924_v34 }
 0x1ec   : > { %v2269_v2 = vcombine.low %v2261_v61, %v2268_v62 }
 0x1ed   : > { %v2303_v4 = vcombine.low %v2295_v0, %v2302_v49 }
 0x1ee   : > { %2317 = vst.msk [vmem:[%s3133_s30 + $0x28] sm:$0xff] %vm656_vm3, %v2269_v2 }
 0x1ef   : > { %2319 = vst.msk [vmem:[%s3133_s30 + $0x38] sm:$0xff] %vm656_vm3, %v2303_v4 }
 0x1f0 PF: > { %s16_s18 = sadd.s32 1, %s2726_s18  }
 0x1f1   : > { %p13_p3 = scmp.ge.s32.totalorder %s16_s18, 4  }
 0x1f3   :  { %15 = sbr.rel (!%p13_p3) target bundleno = 1 (0x1), region = 86 }
 0x1fa   :  { %2341 = vsyncpa [#allocation4], 1 }
 0x1fb   :  { %2343 = vsyncpa [#allocation4 + $0x1], 1 }

// kernel: _lambda_.7
= control target key start
LH: loop header
LB: loop body
LE: loop exit
PB: predicated region body
PF: predicated region fallthrough
CT: control target
= control target key end

     0   :  { %s5747_s18 = smov 0   ;;  %s7980_s0 = inlined_call_operand.vmem [shape: f32[2,8,8,32], index: 0, kind: input, shape index: {}]   ;;  %s7981_s1 = inlined_call_operand.vmem [shape: f32[2,1,32], index: 1, kind: input, shape index: {}]   ;;  %s7982_s2 = inlined_call_operand.vmem [shape: f32[2,1,32], index: 2, kind: input, shape index: {}]   ;;  %s7983_s3 = inlined_call_operand.vmem [shape: bf16[4,128,128], index: 3, kind: input, shape index: {}]   ;;  %s7984_s4 = inlined_call_operand.vmem [shape: f32[1,128], index: 4, kind: input, shape index: {}]   ;;  %s7985_s5 = inlined_call_operand.vmem [shape: f32[2,16,16,128], index: 5, kind: output, shape index: {}]  }
   0x1 LB: > { %s5263_s19 = sadd.s32 4294967295, %s5709_s18   ;;  %p5267_p0 = scmp.ge.s32.totalorder %s5709_s18, 1  ;;  %s5709_s18 = sphi %s5747_s18, %s15_s18  }
   0x2   : > { %p203_p1 = scmp.lt.s32.totalorder %s5709_s18, 3 }
   0x4   : > { %p204_p2 = pnand %p5267_p0, %p203_p1 }
   0x6   : > { %207 = sbr.rel (%p204_p2) target bundleno = 660 (0x294), region = 40 }
   0xd   : > { %p5755_p3 = scmp.lt.s32.totalorder %s5263_s19, 1  ;;  %vm254_vm0 = vcmask 257024   ;;  %v5711_v0 = vmov 0   ;;  %vm256_vm1 = vcmask 253952   ;;  %vm428_vm2 = vsmask.f32 7938 }
   0xe   : > { %258 = vst.msk [vmem:[#allocation2 + $0x8] sm:$0xf] %vm254_vm0, %v5711_v0  ;;  %260 = vst.msk [vmem:[#allocation2 + $0x10] sm:$0xf] %vm254_vm0, %v5711_v0  ;;  %vm434_vm3 = vsmask.f32 256 }
   0xf   : > { %255 = vst.msk [vmem:[#allocation2] sm:$0xf] %vm254_vm0, %v5711_v0  ;;  %262 = vst.msk [vmem:[#allocation2 + $0x18] sm:$0xf] %vm254_vm0, %v5711_v0  ;;  %s8049_s19 = smov (!%p5755_p3, %s5263_s19), 1  ;;  %vm1031_vm4 = vcmask 1042432  }
  0x10   : > { %264 = vst.msk [vmem:[#allocation2 + $0x20] sm:$0xf] %vm254_vm0, %v5711_v0  ;;  %266 = vst.msk [vmem:[#allocation2 + $0x28] sm:$0xf] %vm254_vm0, %v5711_v0  ;;  %s5425_s21 = sshll.u32 %s8049_s19, 6  ;;  %s244_s24 = scalar_lea.vmem %s7981_s1, %s8049_s19  ;;  %vm1032_vm5 = vcmask 1046532  }
  0x11   : > { %268 = vst.msk [vmem:[#allocation2 + $0x30] sm:$0xf] %vm254_vm0, %v5711_v0  ;;  %270 = vst.msk [vmem:[#allocation2 + $0x38] sm:$0xf] %vm254_vm0, %v5711_v0  ;;  %s5791_s27 = scalar_lea.vmem %s7980_s0, %s5425_s21  ;;  %s247_s30 = scalar_lea.vmem %s7982_s2, %s8049_s19  ;;  %v5797_v1 = vld [vmem:[%s244_s24] ss:$0 sm:$0xff] }
  0x12   : > { %272 = vst.msk [vmem:[#allocation2 + $0x40] sm:$0xf] %vm254_vm0, %v5711_v0  ;;  %274 = vst.msk [vmem:[#allocation2 + $0x48] sm:$0xf] %vm254_vm0, %v5711_v0  ;;  %v276_v2 = vld [vmem:[%s5791_s27] sm:$0xff]  ;;  %v277_v3 = vld [vmem:[%s5791_s27 + $0x8] sm:$0xff] }
  0x13   : > { %257 = vst.msk [vmem:[#allocation2 + $0x4] sm:$0x1] %vm256_vm1, %v5711_v0  ;;  %259 = vst.msk [vmem:[#allocation2 + $0xc] sm:$0x1] %vm256_vm1, %v5711_v0  ;;  %v5801_v4 = vld [vmem:[%s247_s30] ss:$0 sm:$0xff]  ;;  %v292_v5 = vmul.f32 %v5797_v1, %v276_v2  ;;  %v293_v6 = vmul.f32 %v5797_v1, %v277_v3 }
  0x14   : > { %261 = vst.msk [vmem:[#allocation2 + $0x14] sm:$0x1] %vm256_vm1, %v5711_v0  ;;  %263 = vst.msk [vmem:[#allocation2 + $0x1c] sm:$0x1] %vm256_vm1, %v5711_v0  ;;  %v278_v7 = vld [vmem:[%s5791_s27 + $0x10] sm:$0xff]  ;;  %v279_v8 = vld [vmem:[%s5791_s27 + $0x18] sm:$0xff] }
  0x15   : > { %265 = vst.msk [vmem:[#allocation2 + $0x24] sm:$0x1] %vm256_vm1, %v5711_v0  ;;  %267 = vst.msk [vmem:[#allocation2 + $0x2c] sm:$0x1] %vm256_vm1, %v5711_v0  ;;  %v280_v9 = vld [vmem:[%s5791_s27 + $0x20] sm:$0xff]  ;;  %v294_v10 = vmul.f32 %v5797_v1, %v278_v7  ;;  %v295_v11 = vmul.f32 %v5797_v1, %v279_v8  ;;  %v306_v13 = vadd.f32 %v5801_v4, %v292_v5  ;;  %v281_v15 = vld [vmem:[%s5791_s27 + $0x28] sm:$0xff] }
  0x16   : > { %269 = vst.msk [vmem:[#allocation2 + $0x34] sm:$0x1] %vm256_vm1, %v5711_v0  ;;  %271 = vst.msk [vmem:[#allocation2 + $0x3c] sm:$0x1] %vm256_vm1, %v5711_v0  ;;  %v296_v12 = vmul.f32 %v5797_v1, %v280_v9  ;;  %v307_v14 = vadd.f32 %v5801_v4, %v293_v6  ;;  %v297_v20 = vmul.f32 %v5797_v1, %v281_v15  ;;  %v282_v28 = vld [vmem:[%s5791_s27 + $0x30] sm:$0xff]  ;;  %s5712_s16 = smov 64  }
  0x17   : > { %273 = vst.msk [vmem:[#allocation2 + $0x44] sm:$0x1] %vm256_vm1, %v5711_v0  ;;  %275 = vst.msk [vmem:[#allocation2 + $0x4c] sm:$0x1] %vm256_vm1, %v5711_v0  ;;  %v308_v16 = vadd.f32 %v5801_v4, %v294_v10  ;;  %v309_v17 = vadd.f32 %v5801_v4, %v295_v11  ;;  %v5427_v18 = vpack.c.bf16 %v306_v13, %v306_v13  ;;  %v430_v29 = vld [vmem:[#allocation2 + $0x8] sm:$0xf] }
  0x18   : > { %v5428_v19 = vpack.c.bf16 %v307_v14, %v307_v14  ;;  %v310_v23 = vadd.f32 %v5801_v4, %v296_v12  ;;  %v439_v30 = vld [vmem:[#allocation2 + $0x10] sm:$0xf]  ;;  %vm5823_vm6 = vmand %vm254_vm0, %vm428_vm2  ;;  %v311_v41 = vadd.f32 %v5801_v4, %v297_v20  ;;  %v445_v45 = vld [vmem:[#allocation2 + $0x18] sm:$0xf]  ;;  %v298_v48 = vmul.f32 %v5797_v1, %v282_v28  ;;  %s5713_s21 = smov 32   ;;  %s5714_s30 = smov 96  }
  0x19   : > { %v5429_v21 = vpack.c.bf16 %v308_v16, %v308_v16  ;;  %v5430_v22 = vpack.c.bf16 %v309_v17, %v309_v17  ;;  %v347_v24 = vshrl.u32 %v5427_v18, 16  ;;  %v350_v25 = vshll.u32 %v5427_v18, 16  ;;  %vm5831_vm7 = vmand %vm256_vm1, %vm434_vm3  ;;  %v451_v53 = vld [vmem:[#allocation2 + $0x20] sm:$0xf]  ;;  %v457_v13 = vld [vmem:[#allocation2 + $0x28] sm:$0xf] }
  0x1a   : > { %v355_v26 = vshrl.u32 %v5428_v19, 16  ;;  %v358_v27 = vshll.u32 %v5428_v19, 16  ;;  %v5819_v31 = vld [vmem:[#allocation2 + $0x4] sm:$0x1]  ;;  %v436_v39 = vld [vmem:[#allocation2 + $0xc] sm:$0x1]  ;;  %v5431_v47 = vpack.c.bf16 %v310_v23, %v310_v23  ;;  %v5432_v7 = vpack.c.bf16 %v311_v41, %v311_v41  ;;  %vm5867_vm8 = vmor %vm1031_vm4, %vm1032_vm5 }
  0x1b   : > { %v363_v32 = vshrl.u32 %v5429_v21, 16  ;;  %v366_v33 = vshll.u32 %v5429_v21, 16  ;;  %v371_v34 = vshrl.u32 %v5430_v22, 16  ;;  %v374_v35 = vshll.u32 %v5430_v22, 16  ;;  %v442_v46 = vld [vmem:[#allocation2 + $0x14] sm:$0x1] }
  0x1c   : > { %v349_v36 = vrot.slane %v347_v24, 7  ;;  %v357_v37 = vrot.slane %v355_v26, 7  ;;  %v511_v40 = vshll.u32 %v5819_v31, 16  ;;  %v448_v54 = vld [vmem:[#allocation2 + $0x1c] sm:$0x1]  ;;  %v379_v8 = vshrl.u32 %v5431_v47, 16 }
  0x1d   : > { %v365_v43 = vrot.slane %v363_v32, 7  ;;  %v373_v44 = vrot.slane %v371_v34, 7  ;;  %v1007_v55 = vld [vmem:[#allocation2] sm:$0xe]  ;;  %v454_v60 = vld [vmem:[#allocation2 + $0x24] sm:$0x1]  ;;  %v312_v11 = vadd.f32 %v5801_v4, %v298_v48 }
  0x1e   : > { %v352_v49 = vor.u32 %v350_v25, %v349_v36  ;;  %v353_v50 = vrot.slane %v349_v36, 4  ;;  %v360_v51 = vor.u32 %v358_v27, %v357_v37  ;;  %v361_v52 = vrot.slane %v357_v37, 4  ;;  %v482_v2 = vld [vmem:[#allocation2] sm:$0xf]  ;;  %v5602_v21 = vld [vmem:[%s7983_s3 + $0x48] sm:$0xff]   ;;  %v5604_v34 = vld [vmem:[%s7983_s3 + $0x50] sm:$0xff]  }
  0x1f   : > { %v368_v56 = vor.u32 %v366_v33, %v365_v43  ;;  %v369_v57 = vrot.slane %v365_v43, 4  ;;  %v376_v58 = vor.u32 %v374_v35, %v373_v44  ;;  %v377_v59 = vrot.slane %v373_v44, 4  ;;  %v5601_v20 = vld [vmem:[%s7983_s3 + $0x40] sm:$0xff]   ;;  %v460_v26 = vld [vmem:[#allocation2 + $0x2c] sm:$0x1]  ;;  %s5426_s6 = sshll.u32 %s8049_s19, 8 }
  0x20   : > { %v431_v61 = vsel %vm5823_vm6, %v352_v49, %v430_v29  ;;  %v440_v62 = vsel %vm5823_vm6, %v360_v51, %v439_v30  ;;  %v437_v63 = vsel %vm5831_vm7, %v353_v50, %v436_v39  ;;  %v443_v0 = vsel %vm5831_vm7, %v361_v52, %v442_v46  ;;  %v5603_v22 = vld [vmem:[%s7983_s3] sm:$0xff]   ;;  %v5605_v28 = vld [vmem:[%s7983_s3 + $0x8] sm:$0xff]   ;;  %5507 = vmatprep.subr.bf16.mxu1 %v5601_v20  ;;  %s6734_s8 = scalar_lea.vmem %s7985_s5, %s5426_s6 }
  0x21   : > { %432 = vst [vmem:[#allocation2 + $0x8] sm:$0xf] %v431_v61  ;;  %441 = vst [vmem:[#allocation2 + $0x10] sm:$0xf] %v440_v62  ;;  %v446_v3 = vsel %vm5823_vm6, %v368_v56, %v445_v45  ;;  %v452_v5 = vsel %vm5823_vm6, %v376_v58, %v451_v53  ;;  %v449_v6 = vsel %vm5831_vm7, %v369_v57, %v448_v54  ;;  %v382_v9 = vshll.u32 %v5431_v47, 16 }
  0x22   : > { %438 = vst [vmem:[#allocation2 + $0xc] sm:$0x1] %v437_v63  ;;  %444 = vst [vmem:[#allocation2 + $0x14] sm:$0x1] %v443_v0  ;;  %v455_v10 = vsel %vm5831_vm7, %v377_v59, %v454_v60  ;;  %v387_v12 = vshrl.u32 %v5432_v7, 16  ;;  %v502_v14 = vshrl.u32 %v482_v2, 16  ;;  %v5854_v19 = vpack.c.bf16 %v312_v11, %v312_v11  ;;  %5483 = vmatprep.subr.bf16.mxu0 %v5603_v22 }
  0x23   : > { %447 = vst [vmem:[#allocation2 + $0x18] sm:$0xf] %v446_v3  ;;  %453 = vst [vmem:[#allocation2 + $0x20] sm:$0xf] %v452_v5  ;;  %v505_v15 = vshll.u32 %v482_v2, 16  ;;  %v5307_v16 = vrot.slane %v1007_v55, 9  ;;  %5508 = vmatpush3.bf16.msra.mxu1 %v5601_v20  ;;  %5484 = vmatpush3.bf16.msra.mxu0 %v5603_v22 }
  0x24   : > { %450 = vst [vmem:[#allocation2 + $0x1c] sm:$0x1] %v449_v6  ;;  %456 = vst [vmem:[#allocation2 + $0x24] sm:$0x1] %v455_v10  ;;  %v1036_v17 = vrot.slane %v5819_v31, 5  ;;  %v381_v18 = vrot.slane %v379_v8, 7  ;;  %5509 = vmatprep.subr.bf16.mxu1 %v5602_v21  ;;  %5485 = vmatprep.subr.bf16.mxu0 %v5605_v28 }
  0x25   : > { %v5871_v24 = vrot.slane %v387_v12, 7  ;;  %v390_v25 = vshll.u32 %v5432_v7, 16  ;;  %v5873_v27 = vrot.slane %v511_v40, 5  ;;  %v5878_v31 = vrot.slane %v502_v14, 4  ;;  %v463_v63 = vld [vmem:[#allocation2 + $0x30] sm:$0xf] }
  0x26   : > { %v384_v29 = vor.u32 %v382_v9, %v381_v18  ;;  %v385_v30 = vrot.slane %v381_v18, 4  ;;  %v5880_v32 = vrot.slane %v505_v15, 5  ;;  %v395_v33 = vshrl.u32 %v5854_v19, 16  ;;  %v5606_v0 = vld [vmem:[%s7983_s3 + $0x58] sm:$0xff]  }
  0x27   : > { %v1037_v39 = vsel %vm5867_vm8, %v5307_v16, %v1036_v17  ;;  %v398_v47 = vshll.u32 %v5854_v19, 16  ;;  %v392_v52 = vor.u32 %v390_v25, %v5871_v24  ;;  %5510 = vmatpush3.bf16.msra.mxu1 %v5602_v21  ;;  %v393_v62 = vrot.slane %v5871_v24, 4  ;;  %5486 = vmatpush3.bf16.msra.mxu0 %v5605_v28  ;;  %v5607_v28 = vld [vmem:[%s7983_s3 + $0x10] sm:$0xff]  }
  0x28   : > { %v613_v35 = vld [vmem:[#allocation2 + $0x8] sm:$0xf]  ;;  %v614_v36 = vld [vmem:[#allocation2 + $0x10] sm:$0xf]  ;;  %v458_v40 = vsel %vm5823_vm6, %v384_v29, %v457_v13  ;;  %v461_v41 = vsel %vm5831_vm7, %v385_v30, %v460_v26  ;;  %5511 = vmatprep.subr.bf16.mxu1 %v5604_v34  ;;  %vm498_vm9 = vsmask.f32 3328  ;;  %5487 = vmatprep.subr.bf16.mxu0 %v5607_v28 }
  0x29   : > { %v5886_v37 = vld [vmem:[#allocation2 + $0xc] sm:$0x1]  ;;  %v644_v43 = vshrl.u32 %v614_v36, 16  ;;  %v647_v44 = vshll.u32 %v614_v36, 16  ;;  %v5894_v45 = vcombine.low %v613_v35, %v614_v36  ;;  %v1008_v46 = vld [vmem:[#allocation2 + $0x8] sm:$0xe]  ;;  %v464_v30 = vsel %vm5823_vm6, %v392_v52, %v463_v63 }
  0x2a   : > { %459 = vst [vmem:[#allocation2 + $0x28] sm:$0xf] %v458_v40  ;;  %462 = vst [vmem:[#allocation2 + $0x2c] sm:$0x1] %v461_v41  ;;  %v630_v48 = vshrl.u32 %v613_v35, 16  ;;  %v5308_v49 = vrot.slane %v1008_v46, 9 }
  0x2b   : > { %v1040_v50 = vrot.slane %v5886_v37, 5  ;;  %v615_v51 = vld [vmem:[#allocation2 + $0x18] sm:$0xf]  ;;  %v646_v53 = vrot.slane %v644_v43, 4  ;;  %v649_v54 = vrot.slane %v647_v44, 5  ;;  %801 = vrot.lane.b32.xlu1 %v5894_v45, %s5712_s16  ;;  %v633_v55 = vshll.u32 %v613_v35, 16  ;;  %5512 = vmatpush3.bf16.msra.mxu1 %v5604_v34 }
  0x2c   : > { %v616_v56 = vld [vmem:[#allocation2 + $0x20] sm:$0xf]  ;;  %v658_v57 = vshrl.u32 %v615_v51, 16  ;;  %v661_v59 = vshll.u32 %v615_v51, 16  ;;  %v5903_v61 = vld [vmem:[#allocation2 + $0x14] sm:$0x1]  ;;  %5513 = vmatprep.subr.bf16.mxu1 %v5606_v0  ;;  %5488 = vmatpush3.bf16.msra.mxu0 %v5607_v28 }
  0x2d   : > { %v1041_v58 = vsel %vm5867_vm8, %v5308_v49, %v1040_v50  ;;  %v672_v60 = vshrl.u32 %v616_v56, 16  ;;  %v650_v2 = vor.u32 %v649_v54, %v646_v53  ;;  %v675_v6 = vshll.u32 %v616_v56, 16  ;;  %v5909_v7 = vld [vmem:[#allocation2 + $0x1c] sm:$0x1]  ;;  %v1009_v8 = vld [vmem:[#allocation2 + $0x10] sm:$0xe] }
  0x2e   : > { %v5323_v3 = vcombine.low %v1037_v39, %v1041_v58  ;;  %v660_v5 = vrot.slane %v658_v57, 4  ;;  %v5911_v9 = vrot.slane %v630_v48, 4  ;;  %v663_v10 = vrot.slane %v661_v59, 5  ;;  %v1010_v13 = vld [vmem:[#allocation2 + $0x18] sm:$0xe]  ;;  %v5608_v39 = vld [vmem:[%s7983_s3 + $0x60] sm:$0xff]  }
  0x2f   : > { %v674_v11 = vrot.slane %v672_v60, 4  ;;  %v5913_v12 = vcombine.low %v615_v51, %v616_v56  ;;  %v5915_v14 = vrot.slane %v633_v55, 5  ;;  %v677_v15 = vrot.slane %v675_v6, 5  ;;  %v623_v18 = vld [vmem:[#allocation2 + $0x1c] sm:$0x1]  ;;  %5514 = vmatpush3.bf16.msra.mxu1 %v5606_v0  ;;  %v5610_v59 = vld [vmem:[%s7983_s3 + $0x68] sm:$0xff]  }
  0x30   : > { %1134 = vrot.lane.b32.xlu0 %v5323_v3, %s5713_s21  ;;  %v5309_v16 = vrot.slane %v1009_v8, 9  ;;  %v1044_v17 = vrot.slane %v5903_v61, 5  ;;  %vm499_vm10 = vsmask.f32 7440  ;;  %v5919_v20 = vrot.slane %v650_v2, 4  ;;  %v283_v48 = vld [vmem:[%s5791_s27 + $0x38] sm:$0xff]  ;;  %5515 = vmatprep.subr.bf16.mxu1 %v5608_v39 }
  0x31   : > { %v664_v21 = vor.u32 %v663_v10, %v660_v5  ;;  %803 = vrot.lane.b32.xlu1 %v5913_v12, %s5712_s16  ;;  %v5310_v22 = vrot.slane %v1010_v13, 9  ;;  %v1048_v25 = vrot.slane %v5909_v7, 5  ;;  %v5924_v26 = vld [vmem:[#allocation2 + $0x28] sm:$0xf]  ;;  %v624_v35 = vld [vmem:[#allocation2 + $0x24] sm:$0x1]  ;;  %v678_v40 = vor.u32 %v677_v15, %v674_v11  ;;  %vm5993_vm11 = vmor %vm498_vm9, %vm499_vm10 }
  0x32   : > { %v1045_v29 = vsel %vm5867_vm8, %v5309_v16, %v1044_v17  ;;  %v686_v34 = vshrl.u32 %v5924_v26, 16  ;;  %v1068_v36 = vld [vmem:[#allocation2 + $0x18] sm:$0xe]  ;;  %465 = vst [vmem:[#allocation2 + $0x30] sm:$0xf] %v464_v30  ;;  %v689_v43 = vshll.u32 %v5924_v26, 16  ;;  %v636_v60 = vor.u32 %v5915_v14, %v5911_v9 }
  0x33   : > { %v1049_v41 = vsel %vm5867_vm8, %v5310_v22, %v1048_v25  ;;  %v667_v44 = vshll.u32 %v623_v18, 16  ;;  %v1069_v46 = vld [vmem:[#allocation2 + $0x20] sm:$0xe]  ;;  %v5609_v49 = vld [vmem:[%s7983_s3 + $0x18] sm:$0xff]   ;;  %v5944_v50 = vrot.slane %v664_v21, 4  ;;  %v681_v53 = vshll.u32 %v624_v35, 16  ;;  %5516 = vmatpush3.bf16.msra.mxu1 %v5608_v39 }
  0x34   : > { %v5324_v51 = vcombine.low %v1045_v29, %v1049_v41  ;;  %v5946_v52 = vrot.slane %v686_v34, 4  ;;  %v5948_v54 = vld [vmem:[#allocation2 + $0xc] sm:$0x1]  ;;  %v5950_v55 = vrot.slane %v689_v43, 5  ;;  %v5317_v56 = vrot.slane %v1068_v36, 9  ;;  %5489 = vmatprep.subr.bf16.mxu0 %v5609_v49  ;;  %5517 = vmatprep.subr.bf16.mxu1 %v5610_v59 }
  0x35   : > { %v1100_v57 = vrot.slane %v623_v18, 5  ;;  %v1066_v58 = vld [vmem:[#allocation2 + $0x8] sm:$0xe]  ;;  %v5318_v63 = vrot.slane %v1069_v46, 9  ;;  %v1104_v2 = vrot.slane %v624_v35, 5  ;;  %v5959_v5 = vmul.f32 %v5797_v1, %v283_v48  ;;  %5490 = vmatpush3.bf16.msra.mxu0 %v5609_v49 }
  0x36   : > { %1136 = vrot.lane.b32.xlu0 %v5324_v51, %s5713_s21  ;;  %v622_v0 = vld [vmem:[#allocation2 + $0x14] sm:$0x1]  ;;  %v1067_v3 = vld [vmem:[#allocation2 + $0x10] sm:$0xe]  ;;  %v5961_v6 = vrot.slane %v678_v40, 4  ;;  %v5963_v8 = vrot.slane %v667_v44, 5  ;;  %v692_v18 = vor.u32 %v5950_v55, %v5946_v52 }
  0x37   : > { %v1101_v10 = vsel %vm5867_vm8, %v5317_v56, %v1100_v57  ;;  %v5315_v11 = vrot.slane %v1066_v58, 9  ;;  %v5967_v13 = vld [vmem:[#allocation2 + $0x24] sm:$0x1]  ;;  %v5969_v9 = vrot.slane %v681_v53, 5  ;;  %v1105_v14 = vsel %vm5867_vm8, %v5318_v63, %v1104_v2  ;;  %v1011_v1 = vld [vmem:[#allocation2 + $0x20] sm:$0xe]  ;;  %5518 = vmatpush3.bf16.msra.mxu1 %v5610_v59 }
  0x38   : > { %v1092_v15 = vrot.slane %v5948_v54, 5  ;;  %v5316_v16 = vrot.slane %v1067_v3, 9  ;;  %v466_v17 = vld [vmem:[#allocation2 + $0x34] sm:$0x1]  ;;  %v5976_v21 = vcombine.low %v1101_v10, %v1105_v14  ;;  %v639_v22 = vshll.u32 %v5948_v54, 16 }
  0x39   : > { %v1096_v25 = vrot.slane %v622_v0, 5  ;;  %v5979_v28 = vld [vmem:[#allocation2 + $0x2c] sm:$0x1]  ;;  %v1012_v29 = vld [vmem:[#allocation2 + $0x28] sm:$0xe]  ;;  %v5311_v35 = vrot.slane %v1011_v1, 9  ;;  %v467_v55 = vsel %vm5831_vm7, %v393_v62, %v466_v17  ;;  %v670_v2 = vsel %vm5993_vm11, %v5944_v50, %v5963_v8 }
  0x3a   : > { %v618_v30 = vld [vmem:[#allocation2 + $0x30] sm:$0xf]  ;;  %v1093_v34 = vsel %vm5867_vm8, %v5315_v11, %v1092_v15  ;;  %v1052_v36 = vrot.slane %v5967_v13, 5  ;;  %v5312_v39 = vrot.slane %v1012_v29, 9  ;;  %1164 = vrot.lane.b32.xlu0 %v5976_v21, %s5714_s30  ;;  %v653_v48 = vshll.u32 %v622_v0, 16 }
  0x3b   : > { %v700_v40 = vshrl.u32 %v618_v30, 16  ;;  %v703_v41 = vshll.u32 %v618_v30, 16  ;;  %v5985_v43 = vcombine.low %v5924_v26, %v618_v30  ;;  %v1097_v44 = vsel %vm5867_vm8, %v5316_v16, %v1096_v25  ;;  %v469_v56 = vld [vmem:[#allocation2 + $0x38] sm:$0xf]  ;;  %v472_v57 = vld [vmem:[#allocation2 + $0x3c] sm:$0x1] }
  0x3c   : > { %v1053_v49 = vsel %vm5867_vm8, %v5311_v35, %v1052_v36  ;;  %v1056_v26 = vrot.slane %v5979_v28, 5  ;;  %v397_v51 = vrot.slane %v395_v33, 7  ;;  %v6004_v54 = vcombine.low %v1093_v34, %v1097_v44  ;;  %468 = vst [vmem:[#allocation2 + $0x34] sm:$0x1] %v467_v55  ;;  %v1013_v63 = vld [vmem:[#allocation2 + $0x30] sm:$0xe] }
  0x3d   : > { %v702_v52 = vrot.slane %v700_v40, 4  ;;  %v705_v53 = vrot.slane %v703_v41, 5  ;;  %805 = vrot.lane.b32.xlu1 %v5985_v43, %s5712_s16  ;;  %v6018_v24 = vrot.slane %v636_v60, 4  ;;  %v6020_v0 = vrot.slane %v639_v22, 5  ;;  %v6026_v19 = vld [vmem:[#allocation2 + $0x10] sm:$0xf] }
  0x3e   : > { %v1057_v58 = vsel %vm5867_vm8, %v5312_v39, %v1056_v26  ;;  %v400_v33 = vor.u32 %v398_v47, %v397_v51  ;;  %v401_v59 = vrot.slane %v397_v51, 4  ;;  %v684_v3 = vsel %vm5993_vm11, %v5961_v6, %v5969_v9  ;;  %v6028_v47 = vld [vmem:[#allocation2 + $0x18] sm:$0xf]  ;;  %v625_v8 = vld [vmem:[#allocation2 + $0x2c] sm:$0x1] }
  0x3f   : > { %v5325_v62 = vcombine.low %v1053_v49, %v1057_v58  ;;  %v6030_v10 = vrot.slane %v692_v18, 4  ;;  %v6032_v11 = vrot.slane %v653_v48, 5  ;;  %v1070_v14 = vld [vmem:[#allocation2 + $0x28] sm:$0xe]  ;;  %v706_v15 = vor.u32 %v705_v53, %v702_v52  ;;  %v1071_v1 = vld [vmem:[#allocation2 + $0x30] sm:$0xe] }
  0x40   : > { %v470_v50 = vsel %vm5823_vm6, %v400_v33, %v469_v56  ;;  %v473_v60 = vsel %vm5831_vm7, %v401_v59, %v472_v57  ;;  %v5313_v6 = vrot.slane %v1013_v63, 9  ;;  %v6041_v9 = vcombine.low %v670_v2, %v684_v3  ;;  %v6049_v44 = vld [vmem:[#allocation2 + $0x8] sm:$0xf]  ;;  %v5611_v57 = vld [vmem:[%s7983_s3 + $0x20] sm:$0xff]  }
  0x41   : > { %1162 = vrot.lane.b32.xlu1 %v6004_v54, %s5714_s30  ;;  %1138 = vrot.lane.b32.xlu0 %v5325_v62, %s5713_s21  ;;  %471 = vst [vmem:[#allocation2 + $0x38] sm:$0xf] %v470_v50  ;;  %474 = vst [vmem:[#allocation2 + $0x3c] sm:$0x1] %v473_v60  ;;  %v695_v16 = vshll.u32 %v625_v8, 16  ;;  %v530_v17 = vshrl.u32 %v6026_v19, 16  ;;  %v508_v51 = vor.u32 %v5880_v32, %v5878_v31 }
  0x42   : > { %v533_v18 = vshll.u32 %v6026_v19, 16  ;;  %v539_v22 = vshll.u32 %v5903_v61, 16  ;;  %v544_v25 = vshrl.u32 %v6028_v47, 16  ;;  %v5319_v29 = vrot.slane %v1070_v14, 9  ;;  %5491 = vmatprep.subr.bf16.mxu0 %v5611_v57  ;;  %v5612_v14 = vld [vmem:[%s7983_s3 + $0x70] sm:$0xff]  }
  0x43   : > { %v1108_v30 = vrot.slane %v625_v8, 5  ;;  %v547_v34 = vshll.u32 %v6028_v47, 16  ;;  %v553_v35 = vshll.u32 %v5909_v7, 16  ;;  %v5320_v36 = vrot.slane %v1071_v1, 9  ;;  %v6051_v48 = vld [vmem:[#allocation2 + $0x34] sm:$0x1]  ;;  %5492 = vmatpush3.bf16.msra.mxu0 %v5611_v57  ;;  %5519 = vmatprep.subr.bf16.mxu1 %v5612_v14 }
  0x44   : > { %v532_v39 = vrot.slane %v530_v17, 4  ;;  %v535_v40 = vrot.slane %v533_v18, 5  ;;  %v546_v41 = vrot.slane %v544_v25, 4  ;;  %v626_v61 = vld [vmem:[#allocation2 + $0x34] sm:$0x1]  ;;  %v541_v49 = vrot.slane %v539_v22, 5  ;;  %5520 = vmatpush3.bf16.msra.mxu1 %v5612_v14 }
  0x45   : > { %1144 = vrot.lane.b32.xlu0 %v6041_v9, %s5712_s16  ;;  %v549_v26 = vrot.slane %v547_v34, 5  ;;  %v313_v7 = vadd.f32 %v5801_v4, %v5959_v5  ;;  %v1060_v52 = vrot.slane %v6051_v48, 5  ;;  %v709_v53 = vshll.u32 %v626_v61, 16  ;;  %v475_v57 = vld [vmem:[#allocation2 + $0x40] sm:$0xf] }
  0x46   : > { %v1112_v55 = vrot.slane %v626_v61, 5  ;;  %v536_v56 = vor.u32 %v535_v40, %v532_v39  ;;  %v6063_v58 = vrot.slane %v706_v15, 4  ;;  %v555_v59 = vrot.slane %v553_v35, 5  ;;  %v5616_v61 = vld [vmem:[%s7983_s3 + $0x30] sm:$0xff]  }
  0x47   : > { %v550_v33 = vor.u32 %v549_v26, %v546_v41  ;;  %v516_v63 = vshrl.u32 %v6049_v44, 16  ;;  %v1061_v4 = vsel %vm5867_vm8, %v5313_v6, %v1060_v52  ;;  %v697_v32 = vrot.slane %v695_v16, 5 }
  0x48   : > { %v6066_v2 = vld [vmem:[#allocation2 + $0x3c] sm:$0x1]  ;;  %v1014_v31 = vld [vmem:[#allocation2 + $0x38] sm:$0xe]  ;;  %v1109_v5 = vsel %vm5867_vm8, %v5319_v29, %v1108_v30  ;;  %v537_v62 = vrot.slane %v536_v56, 4  ;;  %v711_v60 = vrot.slane %v709_v53, 5  ;;  %v1113_v15 = vsel %vm5867_vm8, %v5320_v36, %v1112_v55 }
  0x49   : > { %v5314_v3 = vrot.slane %v1014_v31, 9  ;;  %v1064_v50 = vrot.slane %v6066_v2, 5  ;;  %v551_v8 = vrot.slane %v550_v33, 4  ;;  %v518_v16 = vrot.slane %v516_v63, 4  ;;  %v6090_v29 = vld [vmem:[#allocation2 + $0x20] sm:$0xf] }
  0x4a   : > { %v542_v6 = vsel %vm5993_vm11, %v537_v62, %v541_v49  ;;  %v519_v1 = vshll.u32 %v6049_v44, 16  ;;  %v525_v17 = vshll.u32 %v5886_v37, 16  ;;  %v642_v25 = vsel %vm5993_vm11, %v6018_v24, %v6020_v0  ;;  %v5613_v30 = vld [vmem:[%s7983_s3 + $0x28] sm:$0xff]   ;;  %v5615_v24 = vld [vmem:[%s7983_s3 + $0x78] sm:$0xff]  }
  0x4b   : > { %v1065_v18 = vsel %vm5867_vm8, %v5314_v3, %v1064_v50  ;;  %v556_v22 = vsel %vm5993_vm11, %v551_v8, %v555_v59  ;;  %v656_v35 = vsel %vm5993_vm11, %v5919_v20, %v6032_v11  ;;  %v6104_v0 = vcombine.low %v1109_v5, %v1113_v15  ;;  %5493 = vmatprep.subr.bf16.mxu0 %v5613_v30  ;;  %v6118_v49 = vld [vmem:[#allocation2 + $0x28] sm:$0xf]  ;;  %v6124_v55 = vld [vmem:[#allocation2 + $0x38] sm:$0xf]  ;;  %v478_v5 = vld [vmem:[#allocation2 + $0x44] sm:$0x1] }
  0x4c   : > { %v5326_v34 = vcombine.low %v1061_v4, %v1065_v18  ;;  %v6095_v37 = vcombine.low %v542_v6, %v556_v22  ;;  %v521_v36 = vrot.slane %v519_v1, 5  ;;  %v509_v39 = vrot.slane %v508_v51, 4  ;;  %5494 = vmatpush3.bf16.msra.mxu0 %v5613_v30  ;;  %5521 = vmatprep.subr.bf16.mxu1 %v5615_v24  ;;  %v5618_v63 = vld [vmem:[%s7983_s3 + $0x38] sm:$0xff]   ;;  %v6136_v3 = vld [vmem:[#allocation2 + $0x30] sm:$0xf] }
  0x4d   : > { %v698_v40 = vsel %vm5993_vm11, %v6030_v10, %v697_v32  ;;  %v5434_v41 = vpack.c.bf16 %v313_v7, %v313_v7  ;;  %v712_v11 = vsel %vm5993_vm11, %v6063_v58, %v711_v60  ;;  %v558_v10 = vshrl.u32 %v6090_v29, 16  ;;  %5522 = vmatpush3.bf16.msra.mxu1 %v5615_v24  ;;  %5495 = vmatprep.subr.bf16.mxu0 %v5616_v61  ;;  %v6145_v8 = vld [vmem:[#allocation2 + $0x38] sm:$0xf]  ;;  %v6150_v1 = vld [vmem:[#allocation2 + $0x3c] sm:$0x1] }
  0x4e   : > { %1140 = vrot.lane.b32.xlu1 %v5326_v34, %s5713_s21  ;;  %775 = vrot.lane.b32.xlu0 %v6095_v37, %s5713_s21  ;;  %v522_v20 = vor.u32 %v521_v36, %v518_v16  ;;  %v561_v26 = vshll.u32 %v6090_v29, 16  ;;  %v6122_v51 = vcombine.low %v642_v25, %v656_v35  ;;  %v527_v7 = vrot.slane %v525_v17, 5 }
  0x4f   : > { %v403_v52 = vshrl.u32 %v5434_v41, 16  ;;  %v406_v53 = vshll.u32 %v5434_v41, 16  ;;  %v560_v33 = vrot.slane %v558_v10, 4  ;;  %v567_v58 = vshll.u32 %v5967_v13, 16 }
  0x50   : > { %v523_v56 = vrot.slane %v522_v20, 4  ;;  %v563_v59 = vrot.slane %v561_v26, 5  ;;  %v514_v31 = vsel %vm5993_vm11, %v509_v39, %v5873_v27  ;;  %v6133_v4 = vcombine.low %v698_v40, %v712_v11  ;;  %5496 = vmatpush3.bf16.msra.mxu0 %v5616_v61 }
  0x51   : > { %v405_v32 = vrot.slane %v403_v52, 7  ;;  %v572_v62 = vshrl.u32 %v6118_v49, 16  ;;  %v714_v13 = vshrl.u32 %v6124_v55, 16  ;;  %v575_v60 = vshll.u32 %v6118_v49, 16  ;;  %5497 = vmatprep.subr.bf16.mxu0 %v5618_v63 }
  0x52   : > { %1166 = vrot.lane.b32.xlu1 %v6104_v0, %s5714_s30  ;;  %821 = vrot.lane.b32.xlu0 %v6122_v51, %s5714_s30  ;;  %v564_v50 = vor.u32 %v563_v59, %v560_v33  ;;  %v581_v27 = vshll.u32 %v5979_v28, 16  ;;  %v528_v14 = vsel %vm5993_vm11, %v523_v56, %v527_v7  ;;  %v717_v16 = vshll.u32 %v6124_v55, 16  ;;  %v6177_v33 = vld [vmem:[%s7983_s3 + $0xc0] sm:$0xff]  }
  0x53   : > { %v408_v15 = vor.u32 %v406_v53, %v405_v32  ;;  %v409_v6 = vrot.slane %v405_v32, 4  ;;  %v569_v17 = vrot.slane %v567_v58, 5  ;;  %v574_v18 = vrot.slane %v572_v62, 4  ;;  %5555 = vmatprep.subr.bf16.mxu1 %v6177_v33 }
  0x54   : > { %v577_v22 = vrot.slane %v575_v60, 5  ;;  %v565_v30 = vrot.slane %v564_v50, 4  ;;  %v586_v34 = vshrl.u32 %v6136_v3, 16  ;;  %v6159_v35 = vcombine.low %v514_v31, %v528_v14  ;;  %5498 = vmatpush3.bf16.msra.mxu0 %v5618_v63  ;;  %v6185_v50 = vld [vmem:[#allocation2 + $0x10] sm:$0xf] }
  0x55   : > { %v476_v25 = vsel %vm5823_vm6, %v408_v15, %v475_v57  ;;  %v479_v28 = vsel %vm5831_vm7, %v409_v6, %v478_v5  ;;  %v583_v24 = vrot.slane %v581_v27, 5  ;;  %v589_v38 = vshll.u32 %v6136_v3, 16  ;;  %v6187_v15 = vld [vmem:[#allocation2 + $0x18] sm:$0xf] }
  0x56   : > { %1142 = vrot.lane.b32.xlu1 %v6122_v51, %s5712_s16  ;;  %1146 = vrot.lane.b32.xlu0 %v6133_v4, %s5712_s16  ;;  %477 = vst [vmem:[#allocation2 + $0x40] sm:$0xf] %v476_v25  ;;  %480 = vst [vmem:[#allocation2 + $0x44] sm:$0x1] %v479_v28  ;;  %v578_v36 = vor.u32 %v577_v22, %v574_v18  ;;  %v716_v39 = vrot.slane %v714_v13, 4  ;;  %v719_v42 = vrot.slane %v717_v16, 5 }
  0x57   : > { %v600_v40 = vshrl.u32 %v6145_v8, 16  ;;  %v603_v41 = vshll.u32 %v6145_v8, 16  ;;  %v588_v20 = vrot.slane %v586_v34, 4  ;;  %v591_v11 = vrot.slane %v589_v38, 5  ;;  %v1072_v18 = vld [vmem:[#allocation2 + $0x38] sm:$0xe] }
  0x58   : > { %v579_v61 = vrot.slane %v578_v36, 4  ;;  %v723_v10 = vshll.u32 %v6150_v1, 16  ;;  %v570_v26 = vsel %vm5993_vm11, %v565_v30, %v569_v17  ;;  %v720_v56 = vor.u32 %v719_v42, %v716_v39 }
  0x59   : > { %v602_v52 = vrot.slane %v600_v40, 4  ;;  %v605_v53 = vrot.slane %v603_v41, 5  ;;  %v595_v57 = vshll.u32 %v6051_v48, 16  ;;  %v592_v59 = vor.u32 %v591_v11, %v588_v20  ;;  %v6203_v20 = vld [vmem:[%s7983_s3 + $0x80] sm:$0xff]  }
  0x5a   : > { %773 = vrot.lane.b32.xlu1 %v6159_v35, %s5713_s21  ;;  %v584_v7 = vsel %vm5993_vm11, %v579_v61, %v583_v24  ;;  %v609_v58 = vshll.u32 %v6066_v2, 16  ;;  %v721_v60 = vrot.slane %v720_v56, 4  ;;  %v725_v27 = vrot.slane %v723_v10, 5  ;;  %5531 = vmatprep.subr.bf16.mxu0 %v6203_v20  ;;  %v6219_v56 = vld [vmem:[#allocation2 + $0x28] sm:$0xf] }
  0x5b   : > { %v6180_v32 = vcombine.low %v570_v26, %v584_v7  ;;  %v606_v13 = vor.u32 %v605_v53, %v602_v52  ;;  %v597_v14 = vrot.slane %v595_v57, 5  ;;  %v593_v16 = vrot.slane %v592_v59, 4  ;;  %v6214_v7 = vld [vmem:[#allocation2 + $0x20] sm:$0xf]  ;;  %v1349_v53 = vld [vmem:[#allocation2 + $0x14] sm:$0x1] }
  0x5c   : > { %v611_v17 = vrot.slane %v609_v58, 5  ;;  %v726_v36 = vsel %vm5993_vm11, %v721_v60, %v725_v27  ;;  %v5321_v24 = vrot.slane %v1072_v18, 9  ;;  %v1116_v38 = vrot.slane %v6150_v1, 5  ;;  %v1350_v59 = vld [vmem:[#allocation2 + $0x1c] sm:$0x1] }
  0x5d   : > { %v620_v63 = vld [vmem:[#allocation2 + $0x40] sm:$0xf]  ;;  %v628_v31 = vld [vmem:[#allocation2 + $0x44] sm:$0x1]  ;;  %v607_v30 = vrot.slane %v606_v13, 4  ;;  %v1358_v39 = vshrl.u32 %v6185_v50, 16  ;;  %v598_v1 = vsel %vm5993_vm11, %v593_v16, %v597_v14 }
  0x5e   : > { %823 = vrot.lane.b32.xlu1 %v6041_v9, %s5714_s30  ;;  %v728_v5 = vshrl.u32 %v620_v63, 16  ;;  %v731_v62 = vshll.u32 %v620_v63, 16  ;;  %v737_v48 = vshll.u32 %v628_v31, 16  ;;  %v1073_v22 = vld [vmem:[#allocation2 + $0x40] sm:$0xe]  ;;  %v6192_v34 = vcombine.low %v6124_v55, %v620_v63 }
  0x5f   : > { %v5322_v40 = vrot.slane %v1073_v22, 9  ;;  %v1361_v41 = vshll.u32 %v6185_v50, 16  ;;  %v1372_v61 = vshrl.u32 %v6187_v15, 16  ;;  %v1120_v55 = vrot.slane %v628_v31, 5  ;;  %v1695_v31 = vld [vmem:[#allocation2 + $0x10] sm:$0xe] }
  0x60   : > { %v730_v2 = vrot.slane %v728_v5, 4  ;;  %v733_v6 = vrot.slane %v731_v62, 5  ;;  %v739_v28 = vrot.slane %v737_v48, 5  ;;  %v1375_v11 = vshll.u32 %v6187_v15, 16  ;;  %v1696_v5 = vld [vmem:[#allocation2 + $0x18] sm:$0xe] }
  0x61   : > { %v612_v26 = vsel %vm5993_vm11, %v607_v30, %v611_v17  ;;  %v1117_v57 = vsel %vm5867_vm8, %v5321_v24, %v1116_v38  ;;  %v1360_v58 = vrot.slane %v1358_v39, 4  ;;  %v1363_v63 = vrot.slane %v1361_v41, 5  ;;  %v6237_v30 = vld [vmem:[#allocation2 + $0x2c] sm:$0x1] }
  0x62   : > { %v734_v25 = vor.u32 %v733_v6, %v730_v2  ;;  %777 = vrot.lane.b32.xlu1 %v6180_v32, %s5713_s21  ;;  %v6225_v62 = vcombine.low %v598_v1, %v612_v26  ;;  %v1121_v48 = vsel %vm5867_vm8, %v5322_v40, %v1120_v55  ;;  %v1374_v13 = vrot.slane %v1372_v61, 4 }
  0x63   : > { %v1377_v60 = vrot.slane %v1375_v11, 5  ;;  %v1386_v27 = vshrl.u32 %v6214_v7, 16  ;;  %v1389_v14 = vshll.u32 %v6214_v7, 16  ;;  %v1400_v2 = vshrl.u32 %v6219_v56, 16 }
  0x64   : > { %v735_v42 = vrot.slane %v734_v25, 4  ;;  %v1403_v6 = vshll.u32 %v6219_v56, 16  ;;  %v5387_v16 = vrot.slane %v1695_v31, 9  ;;  %v1721_v17 = vrot.slane %v1349_v53, 5 }
  0x65   : > { %v5388_v18 = vrot.slane %v1696_v5, 9  ;;  %v1725_v22 = vrot.slane %v1350_v59, 5  ;;  %v1367_v25 = vshll.u32 %v1349_v53, 16  ;;  %v1364_v24 = vor.u32 %v1363_v63, %v1360_v58 }
  0x66   : > { %v740_v10 = vsel %vm5993_vm11, %v735_v42, %v739_v28  ;;  %807 = vrot.lane.b32.xlu1 %v6192_v34, %s5712_s16  ;;  %v6235_v28 = vld [vmem:[#allocation2 + $0x24] sm:$0x1]  ;;  %v1378_v38 = vor.u32 %v1377_v60, %v1374_v13  ;;  %v1381_v39 = vshll.u32 %v1350_v59, 16  ;;  %v1388_v42 = vrot.slane %v1386_v27, 4 }
  0x67   : > { %v6217_v52 = vcombine.low %v726_v36, %v740_v10  ;;  %v6241_v36 = vcombine.low %v1117_v57, %v1121_v48  ;;  %v1391_v40 = vrot.slane %v1389_v14, 5  ;;  %v1402_v41 = vrot.slane %v1400_v2, 4 }
  0x68   : > { %v1405_v61 = vrot.slane %v1403_v6, 5  ;;  %v1722_v55 = vsel %vm5867_vm8, %v5387_v16, %v1721_v17  ;;  %v1726_v11 = vsel %vm5867_vm8, %v5388_v18, %v1725_v22  ;;  %v1369_v10 = vrot.slane %v1367_v25, 5  ;;  %v6268_v6 = vld [vmem:[#allocation2 + $0x30] sm:$0xf]  ;;  %v6277_v17 = vld [vmem:[#allocation2 + $0x38] sm:$0xf] }
  0x69   : > { %1148 = vrot.lane.b32.xlu0 %v6217_v52, %s5712_s16  ;;  %v1365_v1 = vrot.slane %v1364_v24, 4  ;;  %v1383_v26 = vrot.slane %v1381_v39, 5  ;;  %v1395_v53 = vshll.u32 %v6235_v28, 16  ;;  %v1379_v57 = vrot.slane %v1378_v38, 4  ;;  %v1697_v18 = vld [vmem:[#allocation2 + $0x20] sm:$0xe] }
  0x6a   : > { %827 = vrot.lane.b32.xlu1 %v6217_v52, %s5714_s30  ;;  %v5395_v59 = vcombine.low %v1722_v55, %v1726_v11  ;;  %v1392_v58 = vor.u32 %v1391_v40, %v1388_v42  ;;  %v1406_v63 = vor.u32 %v1405_v61, %v1402_v41  ;;  %v5355_v48 = vcombine.low %v6185_v50, %v6187_v15  ;;  %v1698_v22 = vld [vmem:[#allocation2 + $0x28] sm:$0xe] }
  0x6b   : > { %v1397_v31 = vrot.slane %v1395_v53, 5  ;;  %v1370_v13 = vsel %vm5993_vm11, %v1365_v1, %v1369_v10  ;;  %v1384_v60 = vsel %vm5993_vm11, %v1379_v57, %v1383_v26  ;;  %v5356_v16 = vcombine.low %v6214_v7, %v6219_v56  ;;  %v6291_v40 = vld [vmem:[#allocation2 + $0x48] sm:$0xf]  ;;  %v6296_v10 = vld [vmem:[#allocation2 + $0x40] sm:$0xf] }
  0x6c   : > { %v1393_v27 = vrot.slane %v1392_v58, 4  ;;  %v1407_v14 = vrot.slane %v1406_v63, 4  ;;  %v6266_v2 = vcombine.low %v1370_v13, %v1384_v60  ;;  %v5284_v25 = vcombine.low %v6090_v29, %v6118_v49  ;;  %v1699_v1 = vld [vmem:[#allocation2 + $0x30] sm:$0xe]  ;;  %v1700_v26 = vld [vmem:[#allocation2 + $0x38] sm:$0xe] }
  0x6d   : > { %779 = vrot.lane.b32.xlu0 %v6225_v62, %s5713_s21  ;;  %v1414_v24 = vshrl.u32 %v6268_v6, 16  ;;  %v5285_v38 = vcombine.low %v6136_v3, %v6145_v8  ;;  %v1417_v7 = vshll.u32 %v6268_v6, 16  ;;  %v1428_v56 = vshrl.u32 %v6277_v17, 16  ;;  %v1353_v57 = vld [vmem:[#allocation2 + $0x34] sm:$0x1]  ;;  %v5636_v3 = vld [vmem:[%s7983_s3 + $0xb8] sm:$0xff]  }
  0x6e   : > { %1753 = vrot.lane.b32.xlu1 %v5976_v21, %s5713_s21  ;;  %v1409_v21 = vshll.u32 %v6237_v30, 16  ;;  %v1398_v50 = vsel %vm5993_vm11, %v1393_v27, %v1397_v31  ;;  %v1431_v42 = vshll.u32 %v6277_v17, 16  ;;  %v5389_v41 = vrot.slane %v1697_v18, 9 }
  0x6f   : > { %v1729_v61 = vrot.slane %v6235_v28, 5  ;;  %v5390_v55 = vrot.slane %v1698_v22, 9  ;;  %v1733_v11 = vrot.slane %v6237_v30, 5  ;;  %v1456_v53 = vshrl.u32 %v6291_v40, 16 }
  0x70   : > { %v1411_v5 = vrot.slane %v1409_v21, 5  ;;  %v1459_v21 = vshll.u32 %v6291_v40, 16  ;;  %v1419_v58 = vrot.slane %v1417_v7, 5  ;;  %v1430_v63 = vrot.slane %v1428_v56, 4 }
  0x71   : > { %1168 = vrot.lane.b32.xlu0 %v6241_v36, %s5714_s30  ;;  %v1433_v31 = vrot.slane %v1431_v42, 5  ;;  %v1730_v28 = vsel %vm5867_vm8, %v5389_v41, %v1729_v61  ;;  %v1734_v30 = vsel %vm5867_vm8, %v5390_v55, %v1733_v11  ;;  %v1445_v13 = vshll.u32 %v6296_v10, 16  ;;  %v1356_v11 = vld [vmem:[#allocation2 + $0x4c] sm:$0x1] }
  0x72   : > { %1469 = vrot.lane.b32.xlu1 %v6122_v51, %s5713_s21  ;;  %v1412_v15 = vsel %vm5993_vm11, %v1407_v14, %v1411_v5  ;;  %v1354_v5 = vld [vmem:[#allocation2 + $0x3c] sm:$0x1]  ;;  %v5391_v60 = vrot.slane %v1699_v1, 9  ;;  %v1737_v27 = vrot.slane %v1353_v57, 5  ;;  %v5392_v14 = vrot.slane %v1700_v26, 9 }
  0x73   : > { %v5360_v39 = vcombine.low %v1398_v50, %v1412_v15  ;;  %v1741_v50 = vrot.slane %v1354_v5, 5  ;;  %v1423_v15 = vshll.u32 %v1353_v57, 16  ;;  %v1434_v22 = vor.u32 %v1433_v31, %v1430_v63 }
  0x74   : > { %v1447_v56 = vrot.slane %v1445_v13, 5  ;;  %v1458_v42 = vrot.slane %v1456_v53, 4  ;;  %v1461_v41 = vrot.slane %v1459_v21, 5  ;;  %v1738_v61 = vsel %vm5867_vm8, %v5391_v60, %v1737_v27 }
  0x75   : > { %825 = vrot.lane.b32.xlu0 %v6133_v4, %s5714_s30  ;;  %v1742_v55 = vsel %vm5867_vm8, %v5392_v14, %v1741_v50  ;;  %v1425_v1 = vrot.slane %v1423_v15, 5  ;;  %v1435_v57 = vrot.slane %v1434_v22, 4  ;;  %v1465_v63 = vshll.u32 %v1356_v11, 16  ;;  %v1701_v15 = vld [vmem:[#allocation2 + $0x40] sm:$0xe] }
  0x76   : > { %1779 = vrot.lane.b32.xlu1 %v5395_v59, %s5714_s30  ;;  %v1416_v59 = vrot.slane %v1414_v24, 4  ;;  %v1437_v24 = vshll.u32 %v1354_v5, 16  ;;  %v1462_v21 = vor.u32 %v1461_v41, %v1458_v42  ;;  %v5357_v60 = vcombine.low %v6268_v6, %v6277_v17 }
  0x77   : > { %v1467_v13 = vrot.slane %v1465_v63, 5  ;;  %v5358_v50 = vcombine.low %v6296_v10, %v6291_v40  ;;  %v1749_v22 = vrot.slane %v1356_v11, 5  ;;  %vm829_vm12 = vcmask 261120  }
  0x78   : > { %v1420_v18 = vor.u32 %v1419_v58, %v1416_v59  ;;  %v1439_v59 = vrot.slane %v1437_v24, 5  ;;  %vm842_vm13 = vcmask 523264   ;;  %vm851_vm14 = vcmask 785408  }
  0x79   : > { %1751 = vrot.lane.b32.xlu0 %v6004_v54, %s5713_s21  ;;  %v5283_v54 = vcombine.low %v6026_v19, %v6028_v47  ;;  %v5625_v47 = vld [vmem:[%s7983_s3 + $0x88] sm:$0xff]   ;;  %vm3141_vm15 = vcmask 1040384  }
  0x7a   : > { %1497 = vrot.lane.b32.xlu1 %v5355_v48, %s5712_s16  ;;  %v1442_v48 = vshrl.u32 %v6296_v10, 16  ;;  %v1421_v26 = vrot.slane %v1420_v18, 4 }
  0x7c   : > { %v1444_v7 = vrot.slane %v1442_v48, 4  ;;  %v1426_v31 = vsel %vm5993_vm11, %v1421_v26, %v1425_v1  ;;  %v1463_v48 = vrot.slane %v1462_v21, 4 }
  0x7d   : > { %1759 = vrot.lane.b32.xlu0 %v6266_v2, %s5712_s16 }
  0x7e   : > { %1499 = vrot.lane.b32.xlu1 %v5356_v16, %s5712_s16  ;;  %v5396_v16 = vcombine.low %v1730_v28, %v1734_v30  ;;  %v1448_v53 = vor.u32 %v1447_v56, %v1444_v7  ;;  %v1440_v28 = vsel %vm5993_vm11, %v1435_v57, %v1439_v59  ;;  %v1468_v14 = vsel %vm5993_vm11, %v1463_v48, %v1467_v13 }
  0x7f   : > { %v5361_v27 = vcombine.low %v1426_v31, %v1440_v28  ;;  %v5701_v28 = vld [vmem:[#allocation2] sm:$0xf] }
  0x80   : > { %v1449_v5 = vrot.slane %v1448_v53, 4 }
  0x81   : > { %1761 = vrot.lane.b32.xlu0 %v5360_v39, %s5712_s16 }
  0x82   : > { %1519 = vrot.lane.b32.xlu1 %v5360_v39, %s5714_s30  ;;  %v1355_v39 = vld [vmem:[#allocation2 + $0x44] sm:$0x1] }
  0x83   : > { %v1451_v58 = vshll.u32 %v1355_v39, 16  ;;  %v1745_v17 = vrot.slane %v1355_v39, 5 }
  0x85   : > { %1471 = vrot.lane.b32.xlu0 %v6041_v9, %s5713_s21  ;;  %v1453_v30 = vrot.slane %v1451_v58, 5 }
  0x86   : > { %1757 = vrot.lane.b32.xlu1 %v6241_v36, %s5713_s21  ;;  %v5397_v36 = vcombine.low %v1738_v61, %v1742_v55 }
  0x89   : > { %1781 = vrot.lane.b32.xlu0 %v5396_v16, %s5714_s30  ;;  %v1702_v16 = vld [vmem:[#allocation2 + $0x48] sm:$0xe] }
  0x8a   : > { %1473 = vrot.lane.b32.xlu1 %v6133_v4, %s5713_s21  ;;  %v5394_v18 = vrot.slane %v1702_v16, 9  ;;  %v5627_v16 = vld [vmem:[%s7983_s3 + $0x90] sm:$0xff]  }
  0x8c   : > { %v1750_v24 = vsel %vm5867_vm8, %v5394_v18, %v1749_v22 }
  0x8d   : > { %1517 = vrot.lane.b32.xlu0 %v6266_v2, %s5714_s30  ;;  %v1454_v2 = vsel %vm5993_vm11, %v1449_v5, %v1453_v30  ;;  %v5282_v30 = vcombine.low %v5701_v28, %v6049_v44 }
  0x8e   : > { %1783 = vrot.lane.b32.xlu1 %v5397_v36, %s5714_s30  ;;  %v5362_v6 = vcombine.low %v1454_v2, %v1468_v14  ;;  %v5624_v2 = vld [vmem:[%s7983_s3 + $0xd0] sm:$0xff]  }
  0x91   : > { %1755 = vrot.lane.b32.xlu0 %v6104_v0, %s5713_s21  ;;  %v5393_v0 = vrot.slane %v1701_v15, 9 }
  0x92   : > { %1501 = vrot.lane.b32.xlu1 %v5357_v60, %s5712_s16 }
  0x93   : > { %v1746_v46 = vsel %vm5867_vm8, %v5393_v0, %v1745_v17  ;;  %v5629_v17 = vld [vmem:[%s7983_s3 + $0x98] sm:$0xff]  }
  0x94   : > { %v5398_v40 = vcombine.low %v1746_v46, %v1750_v24  ;;  %v5631_v46 = vld [vmem:[%s7983_s3 + $0xa0] sm:$0xff]   ;;  %v5632_v24 = vld [vmem:[%s7983_s3 + $0xf0] sm:$0xff]  }
  0x95   : > { %1763 = vrot.lane.b32.xlu0 %v5361_v27, %s5712_s16 }
  0x96   : > { %1503 = vrot.lane.b32.xlu1 %v5358_v50, %s5712_s16 }
  0x99   : > { %1765 = vrot.lane.b32.xlu0 %v5362_v6, %s5712_s16 }
  0x9a   : > { %1523 = vrot.lane.b32.xlu1 %v5362_v6, %s5714_s30  ;;  %v5628_v6 = vld [vmem:[%s7983_s3 + $0xe0] sm:$0xff]  }
  0x9d   : > { %1475 = vrot.lane.b32.xlu0 %v6217_v52, %s5713_s21  ;;  %v802_v39 = vpop.permute.xlu1 %801 }
  0xa1   : > { %1785 = vrot.lane.b32.xlu0 %v5398_v40, %s5714_s30 }
  0xa2   : > { %v1135_v10 = vpop.permute.xlu0 %1134 }
  0xa3   : > { %v804_v56 = vpop.permute.xlu1 %803  ;;  %v1172_v58 = vsel %vm829_vm12, %v6159_v35, %v1135_v10  ;;  %v5622_v35 = vld [vmem:[%s7983_s3 + $0xc8] sm:$0xff]  }
  0xa5   : > { %1521 = vrot.lane.b32.xlu0 %v5361_v27, %s5714_s30 }
  0xa8   : > { %v1137_v7 = vpop.permute.xlu0 %1136 }
  0xa9   : > { %v1175_v59 = vsel %vm829_vm12, %v6095_v37, %v1137_v7 }
  0xac   : > { %v1165_v42 = vpop.permute.xlu0 %1164 }
  0xaf   : > { %v6349_v41 = vpop.permute.xlu1 %805 }
  0xb3   : > { %v1139_v61 = vpop.permute.xlu0 %1138  ;;  %v1163_v23 = vpop.permute.xlu1 %1162 }
  0xb4   : > { %v1178_v36 = vsel %vm829_vm12, %v6180_v32, %v1139_v61  ;;  %v5634_v61 = vld [vmem:[%s7983_s3 + $0xf8] sm:$0xff]  }
  0xb7   : > { %v1145_v55 = vpop.permute.xlu0 %1144 }
  0xb8   : > { %v1185_v53 = vsel %vm842_vm13, %v1175_v59, %v1145_v55 }
  0xb9   : > { %v1194_v32 = vsel %vm851_vm14, %v1185_v53, %v1165_v42 }
  0xc0   : > { %v6351_v11 = vpop.permute.xlu1 %1140  ;;  %v776_v1 = vpop.permute.xlu0 %775 }
  0xc1   : > { %v835_v44 = vsel %vm829_vm12, %v5283_v54, %v776_v1  ;;  %v1181_v7 = vsel %vm829_vm12, %v6225_v62, %v6351_v11  ;;  %v5635_v62 = vld [vmem:[%s7983_s3 + $0xb0] sm:$0xff]  }
  0xc2   : > { %v846_v19 = vsel %vm842_vm13, %v835_v44, %v804_v56 }
  0xc4   : > { %v1167_v26 = vpop.permute.xlu1 %1166  ;;  %v822_v57 = vpop.permute.xlu0 %821 }
  0xc8   : > { %v1143_v21 = vpop.permute.xlu1 %1142  ;;  %v1147_v63 = vpop.permute.xlu0 %1146 }
  0xc9   : > { %v1183_v31 = vsel %vm842_vm13, %v1172_v58, %v1143_v21  ;;  %v1187_v5 = vsel %vm842_vm13, %v1178_v36, %v1147_v63 }
  0xca   : > { %v1191_v37 = vsel %vm851_vm14, %v1183_v31, %v1163_v23  ;;  %v1197_v48 = vsel %vm851_vm14, %v1187_v5, %v1167_v26 }
  0xcb   : > { %5523 = vmatprep.mubr.bf16.mxu1 %v1191_v37 }
  0xcc   : > { %v774_v13 = vpop.permute.xlu1 %773  ;;  %5524 = vmatmul.mubr.bf16.vlgmr.msra.gmra.mrb[0].mxu1 %v1194_v32 }
  0xcd   : > { %v832_v60 = vsel %vm829_vm12, %v5282_v30, %v774_v13  ;;  %5527 = vmatprep.mubr.bf16.mxu1 %v1197_v48  ;;  %5556 = vmatpush3.bf16.msra.mxu1 %v6177_v33  ;;  %v5626_v33 = vld [vmem:[%s7983_s3 + $0xd8] sm:$0xff]  }
  0xce   : > { %v844_v27 = vsel %vm842_vm13, %v832_v60, %v802_v39  ;;  %5557 = vmatprep.subr.bf16.mxu1 %v5622_v35  ;;  %v5633_v39 = vld [vmem:[%s7983_s3 + $0xa8] sm:$0xff]  }
  0xcf   : > { %v853_v14 = vsel %vm851_vm14, %v844_v27, %v822_v57 }
  0xd0   : > { %5499 = vmatprep.mubr.bf16.mxu0 %v853_v14  ;;  %v824_v50 = vpop.permute.xlu1 %823 }
  0xd1   : > { %v856_v54 = vsel %vm851_vm14, %v846_v19, %v824_v50  ;;  %5558 = vmatpush3.bf16.msra.mxu1 %v5622_v35 }
  0xd2   : > { %5500 = vmatmul.mubr.bf16.vlgmr.msra.gmra.mrb[0].mxu0 %v856_v54  ;;  %5559 = vmatprep.subr.bf16.mxu1 %v5624_v2 }
  0xd3   : > { %5532 = vmatpush3.bf16.msra.mxu0 %v6203_v20  ;;  %v5630_v20 = vld [vmem:[%s7983_s3 + $0xe8] sm:$0xff]  }
  0xd4   : > { %v778_v15 = vpop.permute.xlu1 %777  ;;  %5533 = vmatprep.subr.bf16.mxu0 %v5625_v47 }
  0xd5   : > { %5560 = vmatpush3.bf16.msra.mxu1 %v5624_v2  ;;  %v838_v23 = vsel %vm829_vm12, %v5284_v25, %v778_v15 }
  0xd6   : > { %5561 = vmatprep.subr.bf16.mxu1 %v5626_v33  ;;  %v848_v29 = vsel %vm842_vm13, %v838_v23, %v6349_v41 }
  0xd7   : > { %5534 = vmatpush3.bf16.msra.mxu0 %v5625_v47 }
  0xd8   : > { %v808_v0 = vpop.permute.xlu1 %807  ;;  %5535 = vmatprep.subr.bf16.mxu0 %v5627_v16 }
  0xd9   : > { %5562 = vmatpush3.bf16.msra.mxu1 %v5626_v33 }
  0xda   : > { %5563 = vmatprep.subr.bf16.mxu1 %v5628_v6 }
  0xdb   : > { %v1149_v18 = vpop.permute.xlu0 %1148  ;;  %5536 = vmatpush3.bf16.msra.mxu0 %v5627_v16 }
  0xdc   : > { %v828_v22 = vpop.permute.xlu1 %827  ;;  %5537 = vmatprep.subr.bf16.mxu0 %v5629_v17  ;;  %v1189_v56 = vsel %vm842_vm13, %v1181_v7, %v1149_v18 }
  0xdd   : > { %5564 = vmatpush3.bf16.msra.mxu1 %v5628_v6 }
  0xde   : > { %5565 = vmatprep.subr.bf16.mxu1 %v5630_v20 }
  0xdf   : > { %v780_v40 = vpop.permute.xlu0 %779  ;;  %5538 = vmatpush3.bf16.msra.mxu0 %v5629_v17 }
  0xe0   : > { %v1754_v10 = vpop.permute.xlu1 %1753  ;;  %5539 = vmatprep.subr.bf16.mxu0 %v5631_v46  ;;  %v841_v11 = vsel %vm829_vm12, %v5285_v38, %v780_v40 }
  0xe1   : > { %5566 = vmatpush3.bf16.msra.mxu1 %v5630_v20  ;;  %v850_v49 = vsel %vm842_vm13, %v841_v11, %v808_v0  ;;  %v1792_v5 = vsel %vm829_vm12, %v6041_v9, %v1754_v10 }
  0xe2   : > { %5567 = vmatprep.subr.bf16.mxu1 %v5632_v24  ;;  %v862_v8 = vsel %vm851_vm14, %v850_v49, %v828_v22 }
  0xe3   : > { %v1169_v42 = vpop.permute.xlu0 %1168  ;;  %5540 = vmatpush3.bf16.msra.mxu0 %v5631_v46 }
  0xe4   : > { %v1200_v55 = vsel %vm851_vm14, %v1189_v56, %v1169_v42  ;;  %v1470_v1 = vpop.permute.xlu1 %1469  ;;  %5541 = vmatprep.subr.bf16.mxu0 %v5633_v39  ;;  %v5715_v56 = vmov 1966171168  }
  0xe5   : > { %5528 = vmatmul.mubr.bf16.gmra.mrb[4].mxu1 %v1200_v55  ;;  %v1527_v32 = vsel %vm829_vm12, %v5894_v45, %v1470_v1  ;;  %v1967_v42 = vunpack.c.l.s4 %v5715_v56 }
  0xe6   : > { %5568 = vmatpush3.bf16.msra.mxu1 %v5632_v24 }
  0xe7   : > { %v826_v26 = vpop.permute.xlu0 %825  ;;  %5542 = vmatpush3.bf16.msra.mxu0 %v5633_v39  ;;  %5569 = vmatprep.subr.bf16.mxu1 %v5634_v61  ;;  %v1968_v11 = vunpack.c.0.s8 %v1967_v42 }
  0xe8   : > { %v859_v25 = vsel %vm851_vm14, %v848_v29, %v826_v26  ;;  %v1780_v57 = vpop.permute.xlu1 %1779  ;;  %5543 = vmatprep.subr.bf16.mxu0 %v5635_v62 }
  0xe9   : > { %5503 = vmatprep.mubr.bf16.mxu0 %v859_v25  ;;  %v5716_v25 = vmov 1983009808  }
  0xea   : > { %5504 = vmatmul.mubr.bf16.gmra.mrb[4].mxu0 %v862_v8  ;;  %5570 = vmatpush3.bf16.msra.mxu1 %v5634_v61  ;;  %v1969_v61 = vlaneseq }
  0xeb   : > { %v1752_v38 = vpop.permute.xlu0 %1751  ;;  %5544 = vmatpush3.bf16.msra.mxu0 %v5635_v62 }
  0xec   : > { %v1498_v41 = vpop.permute.xlu1 %1497  ;;  %5545 = vmatprep.subr.bf16.mxu0 %v5636_v3  ;;  %v1789_v59 = vsel %vm829_vm12, %v6122_v51, %v1752_v38  ;;  %v1970_v26 = vshrl.u32 %v1969_v61, 7 }
  0xed   : > { %v1538_v44 = vsel %vm842_vm13, %v1527_v32, %v1498_v41 }
  0xef   : > { %v1760_v58 = vpop.permute.xlu0 %1759  ;;  %5546 = vmatpush3.bf16.msra.mxu0 %v5636_v3 }
  0xf0   : > { %v1800_v36 = vsel %vm842_vm13, %v1789_v59, %v1760_v58  ;;  %v1500_v53 = vpop.permute.xlu1 %1499  ;;  %v6480_v58 = vsub.s32 %v1968_v11, %v1970_v26 }
  0xf1   : > { %v1808_v21 = vsel %vm851_vm14, %v1800_v36, %v1780_v57  ;;  %v4585_v57 = vunpack.c.l.s4 %v5716_v25 }
  0xf2   : > { %5571 = vmatprep.mubr.bf16.mxu1 %v1808_v21 }
  0xf3   : > { %v1762_v63 = vpop.permute.xlu0 %1761 }
  0xf4   : > { %v1520_v31 = vpop.permute.xlu1 %1519  ;;  %v1802_v37 = vsel %vm842_vm13, %v1792_v5, %v1762_v63  ;;  %v6485_v5 = vsub.s32 0, %v1970_v26 }
  0xf7   : > { %v1472_v28 = vpop.permute.xlu0 %1471 }
  0xf8   : > { %v1758_v30 = vpop.permute.xlu1 %1757  ;;  %v1530_v35 = vsel %vm829_vm12, %v5913_v12, %v1472_v28 }
  0xf9   : > { %v1540_v27 = vsel %vm842_vm13, %v1530_v35, %v1500_v53  ;;  %v1798_v6 = vsel %vm829_vm12, %v6217_v52, %v1758_v30  ;;  %v4586_v53 = vunpack.c.0.s8 %v4585_v57 }
  0xfa   : > { %v1549_v2 = vsel %vm851_vm14, %v1540_v27, %v1520_v31 }
  0xfb   : > { %v1782_v48 = vpop.permute.xlu0 %1781  ;;  %v6488_v35 = vsub.s32 %v4586_v53, %v1970_v26 }
  0xfc   : > { %v1811_v51 = vsel %vm851_vm14, %v1802_v37, %v1782_v48  ;;  %v1474_v13 = vpop.permute.xlu1 %1473 }
  0xfd   : > { %5572 = vmatmul.mubr.bf16.vlgmr.msra.gmra.mrb[8].mxu1 %v1811_v51  ;;  %v1533_v18 = vsel %vm829_vm12, %v5985_v43, %v1474_v13 }
  0xff   : > { %v1518_v60 = vpop.permute.xlu0 %1517 }
 0x100   : > { %v1546_v9 = vsel %vm851_vm14, %v1538_v44, %v1518_v60  ;;  %v1784_v50 = vpop.permute.xlu1 %1783 }
 0x101   : > { %5547 = vmatprep.mubr.bf16.mxu0 %v1546_v9 }
 0x102   : > { %5548 = vmatmul.mubr.bf16.vlgmr.msra.gmra.mrb[8].mxu0 %v1549_v2 }
 0x103   : > { %v1756_v14 = vpop.permute.xlu0 %1755 }
 0x104   : > { %v1795_v12 = vsel %vm829_vm12, %v6133_v4, %v1756_v14  ;;  %v1502_v54 = vpop.permute.xlu1 %1501 }
 0x105   : > { %v1542_v46 = vsel %vm842_vm13, %v1533_v18, %v1502_v54 }
 0x107   : > { %v1764_v19 = vpop.permute.xlu0 %1763 }
 0x108   : > { %v1804_v45 = vsel %vm842_vm13, %v1795_v12, %v1764_v19  ;;  %v1504_v16 = vpop.permute.xlu1 %1503 }
 0x109   : > { %v1814_v47 = vsel %vm851_vm14, %v1804_v45, %v1784_v50 }
 0x10a   : > { %5575 = vmatprep.mubr.bf16.mxu1 %v1814_v47 }
 0x10b   : > { %v1766_v33 = vpop.permute.xlu0 %1765 }
 0x10c   : > { %v1806_v0 = vsel %vm842_vm13, %v1798_v6, %v1766_v33  ;;  %v1524_v22 = vpop.permute.xlu1 %1523 }
 0x10f   : > { %v1476_v15 = vpop.permute.xlu0 %1475 }
 0x110   : > { %v1536_v4 = vsel %vm829_vm12, %v6192_v34, %v1476_v15  ;;  %v6472_v34 = vld [vmem:[%s7984_s4] ss:$0 sm:$0xff] }
 0x111   : > { %v1544_v40 = vsel %vm842_vm13, %v1536_v4, %v1504_v16 }
 0x112   : > { %v1555_v10 = vsel %vm851_vm14, %v1544_v40, %v1524_v22 }
 0x113   : > { %v1786_v17 = vpop.permute.xlu0 %1785 }
 0x114   : > { %v1817_v20 = vsel %vm851_vm14, %v1806_v0, %v1786_v17 }
 0x115   : > { %5576 = vmatmul.mubr.bf16.gmra.mrb[12].mxu1 %v1817_v20 }
 0x117   : > { %v1522_v24 = vpop.permute.xlu0 %1521 }
 0x118   : > { %v1552_v52 = vsel %vm851_vm14, %v1542_v46, %v1522_v24 }
 0x119   : > { %5551 = vmatprep.mubr.bf16.mxu0 %v1552_v52 }
 0x11a   : > { %5552 = vmatmul.mubr.bf16.gmra.mrb[12].mxu0 %v1555_v10 }
 0x19f   : > { %v5525_v39 = vpop.f32.mrb[0].mxu1 }
 0x1a0   : > { %v1310_v43 = vadd.f32 %v5525_v39, %v6472_v34  ;;  %v1301_v7 = vpop.f32.mrb[1].mxu1 }
 0x1a1   : > { %v1302_v23 = vadd.f32 %v6472_v34, %v1301_v7  ;;  %v5526_v55 = vpop.f32.mrb[2].mxu1 }
 0x1a2   : > { %5637 = vtanh.f32 %v1310_v43  ;;  %v1313_v1 = vadd.f32 %v5526_v55, %v6472_v34  ;;  %v1304_v62 = vpop.f32.mrb[3].mxu1 }
 0x1a3   : > { %5639 = vtanh.f32 %v1302_v23  ;;  %v1305_v49 = vadd.f32 %v6472_v34, %v1304_v62 }
 0x1a4   : > { %5641 = vtanh.f32 %v1313_v1 }
 0x1a5   : > { %v5501_v29 = vpop.f32.mrb[0].mxu0  ;;  %5643 = vtanh.f32 %v1305_v49 }
 0x1a6   : > { %v968_v3 = vpop.f32.mrb[1].mxu0  ;;  %v977_v8 = vadd.f32 %v5501_v29, %v6472_v34 }
 0x1a7   : > { %v5502_v38 = vpop.f32.mrb[2].mxu0  ;;  %v969_v41 = vadd.f32 %v6472_v34, %v968_v3 }
 0x1a8   : > { %v971_v59 = vpop.f32.mrb[3].mxu0  ;;  %v980_v36 = vadd.f32 %v5502_v38, %v6472_v34  ;;  %5645 = vtanh.f32 %v977_v8 }
 0x1a9   : > { %v972_v21 = vadd.f32 %v6472_v34, %v971_v59  ;;  %5647 = vtanh.f32 %v969_v41 }
 0x1aa   : > { %5649 = vtanh.f32 %v980_v36 }
 0x1ab   : > { %5651 = vtanh.f32 %v972_v21 }
 0x1ac   : > { %v5638_v63 = vpop.eup %5637 }
 0x1ad   : > { %v5640_v31 = vpop.eup %5639  ;;  %v2527_v28 = vcombine.high %v5638_v63, %v5638_v63  ;;  %v2534_v30 = vrot.slane %v5638_v63, %v6480_v58 }
 0x1ae   : > { %v5642_v37 = vpop.eup %5641  ;;  %v2429_v48 = vcombine.high %v5640_v31, %v5640_v31  ;;  %v2436_v51 = vrot.slane %v5640_v31, %v6480_v58 }
 0x1af   : > { %v2541_v32 = vrot.slane %v2527_v28, %v6480_v58  ;;  %v2542_v13 = vcombine.high %v2534_v30, %v2534_v30  ;;  %v6492_v44 = vrot.slane %v2534_v30, %v6480_v58  ;;  %v2576_v60 = vcombine.high %v5642_v37, %v5642_v37  ;;  %v5644_v20 = vpop.eup %5643 }
 0x1b0   : > { %v2443_v27 = vrot.slane %v2429_v48, %v6480_v58  ;;  %v2444_v9 = vcombine.high %v2436_v51, %v2436_v51  ;;  %v6496_v2 = vrot.slane %v2436_v51, %v6480_v58  ;;  %v2583_v14 = vrot.slane %v5642_v37, %v6480_v58 }
 0x1b1   : > { %v2543_v50 = vcombine.high %v2541_v32, %v2541_v32  ;;  %v6500_v12 = vrot.slane %v2541_v32, %v6480_v58  ;;  %v6503_v19 = vrot.slane %v2542_v13, %v6480_v58  ;;  %v2572_v45 = vcombine.high %v6492_v44, %v6492_v44 }
 0x1b2   : > { %v2888_v47 = vrot.slane %v6492_v44, %v6485_v5  ;;  %v2445_v54 = vcombine.high %v2443_v27, %v2443_v27  ;;  %v6510_v33 = vrot.slane %v2443_v27, %v6480_v58  ;;  %v6513_v15 = vrot.slane %v2444_v9, %v6480_v58  ;;  %v6534_v24 = vpop.eup %5645 }
 0x1b3   : > { %v6516_v16 = vrot.slane %v2543_v50, %v6480_v58  ;;  %v2573_v6 = vcombine.high %v6500_v12, %v6500_v12  ;;  %v2574_v0 = vcombine.high %v6503_v19, %v6503_v19  ;;  %v2892_v17 = vrot.slane %v6503_v19, %v6485_v5  ;;  %v6546_v43 = vpop.eup %5647 }
 0x1b4   : > { %v6525_v4 = vrot.slane %v2572_v45, %v6485_v5  ;;  %v2904_v18 = vrot.slane %v6500_v12, %v6485_v5  ;;  %v6530_v22 = vrot.slane %v2445_v54, %v6480_v58  ;;  %v2474_v46 = vcombine.high %v6496_v2, %v6496_v2  ;;  %v6556_v23 = vpop.eup %5649 }
 0x1b5   : > { %v2575_v40 = vcombine.high %v6516_v16, %v6516_v16  ;;  %v6539_v52 = vrot.slane %v2574_v0, %v6485_v5  ;;  %v6544_v39 = vrot.slane %v2573_v6, %v6485_v5  ;;  %v2475_v7 = vcombine.high %v6510_v33, %v6510_v33  ;;  %v6568_v26 = vpop.eup %5651 }
 0x1b6   : > { %v2476_v56 = vcombine.high %v6513_v15, %v6513_v15  ;;  %v2477_v42 = vcombine.high %v6530_v22, %v6530_v22  ;;  %v6564_v62 = vrot.slane %v2474_v46, %v6485_v5  ;;  %v2590_v8 = vrot.slane %v2576_v60, %v6480_v58 }
 0x1b7   : > { %v6559_v55 = vrot.slane %v2575_v40, %v6485_v5  ;;  %v6576_v25 = vrot.slane %v2475_v7, %v6485_v5  ;;  %v2591_v38 = vcombine.high %v2583_v14, %v2583_v14  ;;  %v6585_v41 = vrot.slane %v2583_v14, %v6480_v58 }
 0x1b8   : > { %v6571_v29 = vrot.slane %v2476_v56, %v6485_v5  ;;  %v6579_v57 = vrot.slane %v2477_v42, %v6485_v5  ;;  %v6581_v3 = vpop.f32.mrb[4].mxu1  ;;  %v2478_v59 = vcombine.high %v5644_v20, %v5644_v20  ;;  %v2485_v53 = vrot.slane %v5644_v20, %v6480_v58 }
 0x1b9   : > { %v6587_v36 = vpop.f32.mrb[5].mxu1  ;;  %v2063_v21 = vcombine.high %v6534_v24, %v6534_v24  ;;  %v2070_v63 = vrot.slane %v6534_v24, %v6480_v58  ;;  %v1965_v31 = vcombine.high %v6546_v43, %v6546_v43  ;;  %v2592_v30 = vcombine.high %v2590_v8, %v2590_v8 }
 0x1ba   : > { %v6596_v28 = vpop.f32.mrb[6].mxu1  ;;  %v6599_v37 = vrot.slane %v2590_v8, %v6480_v58  ;;  %v6602_v48 = vrot.slane %v2591_v38, %v6480_v58  ;;  %v2621_v51 = vcombine.high %v6585_v41, %v6585_v41  ;;  %v2492_v60 = vrot.slane %v2478_v59, %v6480_v58 }
 0x1bb   : > { %v6606_v32 = vpop.f32.mrb[7].mxu1  ;;  %v2493_v27 = vcombine.high %v2485_v53, %v2485_v53  ;;  %v6612_v9 = vrot.slane %v2485_v53, %v6480_v58  ;;  %v6615_v14 = vrot.slane %v2592_v30, %v6480_v58  ;;  %v2086_v1 = vrot.slane %v2070_v63, %v6480_v58 }
 0x1bc   : > { %v2622_v50 = vcombine.high %v6599_v37, %v6599_v37  ;;  %v2623_v45 = vcombine.high %v6602_v48, %v6602_v48  ;;  %v6626_v0 = vrot.slane %v2621_v51, %v6485_v5  ;;  %v2494_v46 = vcombine.high %v2492_v60, %v2492_v60 }
 0x1bd   : > { %v6623_v6 = vpop.f32.mrb[4].mxu0  ;;  %v6631_v24 = vrot.slane %v2492_v60, %v6480_v58  ;;  %v2624_v7 = vcombine.high %v6615_v14, %v6615_v14  ;;  %v6648_v59 = vrot.slane %v2493_v27, %v6480_v58  ;;  %v2523_v30 = vcombine.high %v6612_v9, %v6612_v9 }
 0x1be   : > { %v6633_v40 = vpop.f32.mrb[5].mxu0  ;;  %v6638_v56 = vrot.slane %v2623_v45, %v6485_v5  ;;  %v6643_v8 = vrot.slane %v2622_v50, %v6485_v5  ;;  %v6651_v53 = vrot.slane %v2494_v46, %v6480_v58  ;;  %v2077_v46 = vrot.slane %v2063_v21, %v6480_v58 }
 0x1bf   : > { %v6645_v38 = vpop.f32.mrb[6].mxu0  ;;  %v2524_v51 = vcombine.high %v6631_v24, %v6631_v24  ;;  %v6660_v45 = vrot.slane %v2624_v7, %v6485_v5  ;;  %v2525_v42 = vcombine.high %v6648_v59, %v6648_v59  ;;  %v6674_v7 = vrot.slane %v2523_v30, %v6485_v5 }
 0x1c0   : > { %v6657_v60 = vpop.f32.mrb[7].mxu0  ;;  %v2526_v54 = vcombine.high %v6651_v53, %v6651_v53  ;;  %v2078_v27 = vcombine.high %v2070_v63, %v2070_v63  ;;  %v2079_v21 = vcombine.high %v2077_v46, %v2077_v46  ;;  %v2093_v20 = vrot.slane %v2077_v46, %v6480_v58 }
 0x1c1   : > { %v6679_v13 = vrot.slane %v2524_v51, %v6485_v5  ;;  %v6682_v49 = vrot.slane %v2525_v42, %v6485_v5  ;;  %v1972_v51 = vrot.slane %v6546_v43, %v6480_v58  ;;  %v1979_v50 = vrot.slane %v1965_v31, %v6480_v58 }
 0x1c2   : > { %v6685_v11 = vrot.slane %v2526_v54, %v6485_v5  ;;  %v2100_v30 = vrot.slane %v2078_v27, %v6480_v58  ;;  %v2107_v61 = vrot.slane %v2079_v21, %v6480_v58  ;;  %v2108_v10 = vcombine.high %v2086_v1, %v2086_v1 }
 0x1c3   : > { %v2109_v42 = vcombine.high %v2093_v20, %v2093_v20  ;;  %v3158_v54 = vsel %vm3141_vm15, %v2086_v1, %v2888_v47  ;;  %v3162_v63 = vsel %vm3141_vm15, %v2093_v20, %v2904_v18  ;;  %v7997_v31 = vrot.slane %v6516_v16, %v6485_v5 }
 0x1c4   : > { %v2110_v27 = vcombine.high %v2100_v30, %v2100_v30  ;;  %v2111_v46 = vcombine.high %v2107_v61, %v2107_v61  ;;  %v3159_v43 = vsel %vm3141_vm15, %v2100_v30, %v2892_v17  ;;  %v3160_v44 = vsel %vm3141_vm15, %v2108_v10, %v6525_v4 }
 0x1c5   : > { %v3163_v21 = vsel %vm3141_vm15, %v2107_v61, %v7997_v31  ;;  %v3164_v12 = vsel %vm3141_vm15, %v2109_v42, %v6544_v39  ;;  %v4718_v47 = vcombine.low %v3158_v54, %v3159_v43  ;;  %v1980_v17 = vcombine.high %v1972_v51, %v1972_v51 }
 0x1c6   : > { %v4735_v18 = vcombine.low %v3162_v63, %v3163_v21  ;;  %v3161_v1 = vsel %vm3141_vm15, %v2110_v27, %v6539_v52  ;;  %v3165_v19 = vsel %vm3141_vm15, %v2111_v46, %v6559_v55  ;;  %v1981_v20 = vcombine.high %v1979_v50, %v1979_v50 }
 0x1c7   : > { %v4719_v16 = vcombine.low %v3160_v44, %v3161_v1  ;;  %v4726_v61 = vrot.slane %v4718_v47, %v6488_v35  ;;  %v4736_v30 = vcombine.low %v3164_v12, %v3165_v19  ;;  %v1988_v10 = vrot.slane %v1972_v51, %v6480_v58 }
 0x1c8   : > { %v4743_v4 = vrot.slane %v4735_v18, %v6488_v35  ;;  %v1995_v39 = vrot.slane %v1979_v50, %v6480_v58  ;;  %v2002_v42 = vrot.slane %v1980_v17, %v6480_v58  ;;  %v2009_v52 = vrot.slane %v1981_v20, %v6480_v58 }
 0x1c9   : > { %v4733_v54 = vrot.slane %v4719_v16, %v6488_v35  ;;  %v4750_v55 = vrot.slane %v4736_v30, %v6488_v35  ;;  %v2112_v63 = vcombine.high %v6556_v23, %v6556_v23  ;;  %v2119_v27 = vrot.slane %v6556_v23, %v6480_v58 }
 0x1ca   : > { %v2010_v50 = vcombine.high %v1988_v10, %v1988_v10  ;;  %v2011_v51 = vcombine.high %v1995_v39, %v1995_v39  ;;  %v2012_v46 = vcombine.high %v2002_v42, %v2002_v42  ;;  %v2013_v43 = vcombine.high %v2009_v52, %v2009_v52 }
 0x1cb   : > { %v4734_v31 = vcombine.low %v4726_v61, %v4733_v54  ;;  %v4751_v21 = vcombine.low %v4743_v4, %v4750_v55  ;;  %v7998_v44 = vrot.slane %v6496_v2, %v6485_v5  ;;  %v7999_v23 = vrot.slane %v6513_v15, %v6485_v5 }
 0x1cc   : > { %v3144_v18 = vsel %vm3141_vm15, %v2010_v50, %v6564_v62  ;;  %v3145_v1 = vsel %vm3141_vm15, %v2012_v46, %v6571_v29  ;;  %v8000_v19 = vrot.slane %v6510_v33, %v6485_v5  ;;  %v8001_v2 = vrot.slane %v6530_v22, %v6485_v5 }
 0x1cd   : > { %v3142_v12 = vsel %vm3141_vm15, %v1988_v10, %v7998_v44  ;;  %v3143_v47 = vsel %vm3141_vm15, %v2002_v42, %v7999_v23  ;;  %5166 = vst [vmem:[%s6734_s8 + $0x40] sm:$0xff] %v4734_v31  ;;  %5167 = vst [vmem:[%s6734_s8 + $0x48] sm:$0xff] %v4751_v21  ;;  %v3148_v15 = vsel %vm3141_vm15, %v2011_v51, %v6576_v25 }
 0x1ce   : > { %v3146_v17 = vsel %vm3141_vm15, %v1995_v39, %v8000_v19  ;;  %v3147_v20 = vsel %vm3141_vm15, %v2009_v52, %v8001_v2  ;;  %v3149_v62 = vsel %vm3141_vm15, %v2013_v43, %v6579_v57  ;;  %v4582_v16 = vcombine.low %v3142_v12, %v3143_v47 }
 0x1cf   : > { %v4583_v29 = vcombine.low %v3144_v18, %v3145_v1  ;;  %v4599_v33 = vcombine.low %v3146_v17, %v3147_v20  ;;  %v4600_v30 = vcombine.low %v3148_v15, %v3149_v62  ;;  %v2126_v4 = vrot.slane %v2112_v63, %v6480_v58 }
 0x1d0   : > { %v6762_v61 = vpop.f32.mrb[8].mxu1  ;;  %v2127_v10 = vcombine.high %v2119_v27, %v2119_v27  ;;  %v4590_v39 = vrot.slane %v4582_v16, %v6488_v35  ;;  %v2135_v25 = vrot.slane %v2119_v27, %v6480_v58  ;;  %v2014_v57 = vcombine.high %v6568_v26, %v6568_v26 }
 0x1d1   : > { %v6765_v22 = vpop.f32.mrb[9].mxu1  ;;  %v4597_v42 = vrot.slane %v4583_v29, %v6488_v35  ;;  %v4607_v54 = vrot.slane %v4599_v33, %v6488_v35  ;;  %v4614_v55 = vrot.slane %v4600_v30, %v6488_v35  ;;  %v2128_v63 = vcombine.high %v2126_v4, %v2126_v4 }
 0x1d2   : > { %v6772_v52 = vpop.f32.mrb[10].mxu1  ;;  %v2142_v50 = vrot.slane %v2126_v4, %v6480_v58  ;;  %v2149_v43 = vrot.slane %v2127_v10, %v6480_v58  ;;  %v2157_v27 = vcombine.high %v2135_v25, %v2135_v25  ;;  %v8002_v31 = vrot.slane %v6585_v41, %v6485_v5 }
 0x1d3   : > { %v6777_v51 = vpop.f32.mrb[11].mxu1  ;;  %v4598_v46 = vcombine.low %v4590_v39, %v4597_v42  ;;  %v4615_v44 = vcombine.low %v4607_v54, %v4614_v55  ;;  %v2156_v12 = vrot.slane %v2128_v63, %v6480_v58  ;;  %v8003_v47 = vrot.slane %v6599_v37, %v6485_v5 }
 0x1d4   : > { %v3166_v21 = vsel %vm3141_vm15, %v2135_v25, %v8002_v31  ;;  %v2158_v23 = vcombine.high %v2142_v50, %v2142_v50  ;;  %v2159_v19 = vcombine.high %v2149_v43, %v2149_v43  ;;  %v8004_v17 = vrot.slane %v6602_v48, %v6485_v5 }
 0x1d5   : > { %v3170_v18 = vsel %vm3141_vm15, %v2142_v50, %v8003_v47  ;;  %v6789_v1 = vpop.f32.mrb[8].mxu0  ;;  %5158 = vst [vmem:[%s6734_s8] sm:$0xff] %v4598_v46  ;;  %v3168_v2 = vsel %vm3141_vm15, %v2157_v27, %v6626_v0  ;;  %v2021_v20 = vrot.slane %v6568_v26, %v6480_v58  ;;  %5159 = vst [vmem:[%s6734_s8 + $0x8] sm:$0xff] %v4615_v44 }
 0x1d6   : > { %v3167_v41 = vsel %vm3141_vm15, %v2149_v43, %v8004_v17  ;;  %v6800_v15 = vpop.f32.mrb[9].mxu0  ;;  %v2160_v37 = vcombine.high %v2156_v12, %v2156_v12  ;;  %v8005_v62 = vrot.slane %v6615_v14, %v6485_v5  ;;  %v3172_v48 = vsel %vm3141_vm15, %v2158_v23, %v6643_v8 }
 0x1d7   : > { %v4786_v29 = vcombine.low %v3166_v21, %v3167_v41  ;;  %v6809_v33 = vpop.f32.mrb[10].mxu0  ;;  %v3169_v0 = vsel %vm3141_vm15, %v2159_v19, %v6638_v56  ;;  %v2028_v26 = vrot.slane %v2014_v57, %v6480_v58  ;;  %v2029_v4 = vcombine.high %v2021_v20, %v2021_v20 }
 0x1d8   : > { %v3171_v16 = vsel %vm3141_vm15, %v2156_v12, %v8005_v62  ;;  %v6814_v10 = vpop.f32.mrb[11].mxu0  ;;  %v3173_v14 = vsel %vm3141_vm15, %v2160_v37, %v6660_v45  ;;  %v4787_v39 = vcombine.low %v3168_v2, %v3169_v0  ;;  %v2037_v8 = vrot.slane %v2021_v20, %v6480_v58 }
 0x1d9   : > { %v4803_v30 = vcombine.low %v3170_v18, %v3171_v16  ;;  %v4794_v42 = vrot.slane %v4786_v29, %v6488_v35  ;;  %v4804_v25 = vcombine.low %v3172_v48, %v3173_v14  ;;  %v2030_v55 = vcombine.high %v2028_v26, %v2028_v26 }
 0x1da   : > { %v2044_v56 = vrot.slane %v2028_v26, %v6480_v58  ;;  %v4801_v63 = vrot.slane %v4787_v39, %v6488_v35  ;;  %v2051_v57 = vrot.slane %v2029_v4, %v6480_v58  ;;  %v2059_v50 = vcombine.high %v2037_v8, %v2037_v8 }
 0x1db   : > { %v4811_v54 = vrot.slane %v4803_v30, %v6488_v35  ;;  %v8006_v45 = vrot.slane %v6612_v9, %v6485_v5  ;;  %v4818_v43 = vrot.slane %v4804_v25, %v6488_v35  ;;  %v2058_v27 = vrot.slane %v2030_v55, %v6480_v58 }
 0x1dc   : > { %v2060_v31 = vcombine.high %v2044_v56, %v2044_v56  ;;  %v8007_v21 = vrot.slane %v6631_v24, %v6485_v5  ;;  %v4802_v12 = vcombine.low %v4794_v42, %v4801_v63  ;;  %v2061_v23 = vcombine.high %v2051_v57, %v2051_v57 }
 0x1dd   : > { %v3150_v46 = vsel %vm3141_vm15, %v2037_v8, %v8006_v45  ;;  %v8008_v47 = vrot.slane %v6648_v59, %v6485_v5  ;;  %v3152_v18 = vsel %vm3141_vm15, %v2059_v50, %v6674_v7  ;;  %v4819_v19 = vcombine.low %v4811_v54, %v4818_v43 }
 0x1de   : > { %v3154_v44 = vsel %vm3141_vm15, %v2044_v56, %v8007_v21  ;;  %v2062_v17 = vcombine.high %v2058_v27, %v2058_v27  ;;  %v8009_v41 = vrot.slane %v6651_v53, %v6485_v5  ;;  %v3156_v24 = vsel %vm3141_vm15, %v2060_v31, %v6679_v13  ;;  %5170 = vst [vmem:[%s6734_s8 + $0x60] sm:$0xff] %v4802_v12 }
 0x1df   : > { %v3151_v9 = vsel %vm3141_vm15, %v2051_v57, %v8008_v47  ;;  %v3153_v20 = vsel %vm3141_vm15, %v2061_v23, %v6682_v49  ;;  %v1326_v62 = vadd.f32 %v6581_v3, %v6472_v34  ;;  %5171 = vst [vmem:[%s6734_s8 + $0x68] sm:$0xff] %v4819_v19  ;;  %v1318_v53 = vadd.f32 %v6472_v34, %v6587_v36 }
 0x1e0   : > { %v3155_v2 = vsel %vm3141_vm15, %v2058_v27, %v8009_v41  ;;  %v4650_v59 = vcombine.low %v3150_v46, %v3151_v9  ;;  %v3157_v7 = vsel %vm3141_vm15, %v2062_v17, %v6685_v11  ;;  %v4651_v16 = vcombine.low %v3152_v18, %v3153_v20 }
 0x1e1   : > { %v4667_v37 = vcombine.low %v3154_v44, %v3155_v2  ;;  %v1329_v13 = vadd.f32 %v6596_v28, %v6472_v34  ;;  %v4668_v49 = vcombine.low %v3156_v24, %v3157_v7  ;;  %5653 = vtanh.f32 %v1326_v62 }
 0x1e2   : > { %v4658_v48 = vrot.slane %v4650_v59, %v6488_v35  ;;  %v4665_v29 = vrot.slane %v4651_v16, %v6488_v35  ;;  %5655 = vtanh.f32 %v1318_v53  ;;  %v1321_v3 = vadd.f32 %v6472_v34, %v6606_v32 }
 0x1e3   : > { %v993_v11 = vadd.f32 %v6623_v6, %v6472_v34  ;;  %v4675_v36 = vrot.slane %v4667_v37, %v6488_v35  ;;  %v4682_v0 = vrot.slane %v4668_v49, %v6488_v35  ;;  %5657 = vtanh.f32 %v1329_v13 }
 0x1e4   : > { %v985_v28 = vadd.f32 %v6472_v34, %v6633_v40  ;;  %v4666_v30 = vcombine.low %v4658_v48, %v4665_v29  ;;  %v996_v26 = vadd.f32 %v6645_v38, %v6472_v34  ;;  %5659 = vtanh.f32 %v1321_v3 }
 0x1e5   : > { %v4683_v4 = vcombine.low %v4675_v36, %v4682_v0  ;;  %v988_v32 = vadd.f32 %v6472_v34, %v6657_v60  ;;  %5661 = vtanh.f32 %v993_v11  ;;  %v1927_v6 = vadd.f32 %v6762_v61, %v6472_v34 }
 0x1e6   : > { %5162 = vst [vmem:[%s6734_s8 + $0x20] sm:$0xff] %v4666_v30  ;;  %5663 = vtanh.f32 %v985_v28  ;;  %v1919_v14 = vadd.f32 %v6472_v34, %v6765_v22  ;;  %v1930_v40 = vadd.f32 %v6772_v52, %v6472_v34  ;;  %v1922_v60 = vadd.f32 %v6472_v34, %v6777_v51 }
 0x1e7   : > { %5163 = vst [vmem:[%s6734_s8 + $0x28] sm:$0xff] %v4683_v4  ;;  %5665 = vtanh.f32 %v996_v26  ;;  %v6893_v52 = vadd.f32 %v6789_v1, %v6472_v34  ;;  %v6898_v63 = vadd.f32 %v6472_v34, %v6800_v15 }
 0x1e8   : > { %v6880_v38 = vpop.f32.mrb[12].mxu1  ;;  %5667 = vtanh.f32 %v988_v32 }
 0x1e9   : > { %v6884_v39 = vpop.f32.mrb[13].mxu1  ;;  %5669 = vtanh.f32 %v1927_v6  ;;  %8010 = vst [vmem:[#allocation3_spill] sm:$0xff] %v6898_v63 }
 0x1ea   : > { %v6886_v42 = vpop.f32.mrb[14].mxu1  ;;  %5671 = vtanh.f32 %v1919_v14 }
 0x1eb   : > { %v5654_v61 = vpop.eup %5653  ;;  %v6888_v8 = vpop.f32.mrb[15].mxu1  ;;  %5673 = vtanh.f32 %v1930_v40 }
 0x1ec   : > { %v5656_v22 = vpop.eup %5655  ;;  %v2723_v25 = vcombine.high %v5654_v61, %v5654_v61  ;;  %v2730_v54 = vrot.slane %v5654_v61, %v6480_v58  ;;  %5675 = vtanh.f32 %v1922_v60 }
 0x1ed   : > { %v5658_v55 = vpop.eup %5657  ;;  %v2625_v51 = vcombine.high %v5656_v22, %v5656_v22  ;;  %v2632_v56 = vrot.slane %v5656_v22, %v6480_v58  ;;  %v6900_v57 = vpop.f32.mrb[12].mxu0  ;;  %5677 = vtanh.f32 %v6893_v52 }
 0x1ee   : > { %8011 = vst [vmem:[#allocation4_spill] sm:$0xff] %v6900_v57  ;;  %v2737_v50 = vrot.slane %v2723_v25, %v6480_v58  ;;  %v2738_v45 = vcombine.high %v2730_v54, %v2730_v54  ;;  %v6904_v46 = vrot.slane %v2730_v54, %v6480_v58  ;;  %v2772_v43 = vcombine.high %v5658_v55, %v5658_v55  ;;  %v6906_v1 = vpop.f32.mrb[13].mxu0  ;;  %v5660_v27 = vpop.eup %5659 }
 0x1ef   : > { %8012 = vst [vmem:[#allocation5_spill] sm:$0xff] %v6906_v1  ;;  %v2639_v31 = vrot.slane %v2625_v51, %v6480_v58  ;;  %v2640_v21 = vcombine.high %v2632_v56, %v2632_v56  ;;  %v6910_v44 = vrot.slane %v2632_v56, %v6480_v58  ;;  %v2779_v34 = vrot.slane %v5658_v55, %v6480_v58  ;;  %v6913_v15 = vpop.f32.mrb[14].mxu0  ;;  %v6915_v12 = vpop.eup %5661 }
 0x1f0   : > { %8013 = vst [vmem:[#allocation6_spill] sm:$0xff] %v6913_v15  ;;  %v2739_v23 = vcombine.high %v2737_v50, %v2737_v50  ;;  %v6918_v47 = vrot.slane %v2737_v50, %v6480_v58  ;;  %v6921_v9 = vrot.slane %v2738_v45, %v6480_v58  ;;  %v2768_v18 = vcombine.high %v6904_v46, %v6904_v46  ;;  %v6925_v19 = vpop.f32.mrb[15].mxu0  ;;  %v6927_v17 = vpop.eup %5663 }
 0x1f1   : > { %8014 = vst [vmem:[#allocation7_spill] sm:$0xff] %v6925_v19  ;;  %v2641_v2 = vcombine.high %v2639_v31, %v2639_v31  ;;  %v6932_v24 = vrot.slane %v2639_v31, %v6480_v58  ;;  %v6935_v20 = vrot.slane %v2640_v21, %v6480_v58  ;;  %v6937_v59 = vpop.eup %5665  ;;  %v2670_v29 = vcombine.high %v6910_v44, %v6910_v44 }
 0x1f2   : > { %v6940_v37 = vrot.slane %v2739_v23, %v6480_v58  ;;  %v2769_v62 = vcombine.high %v6918_v47, %v6918_v47  ;;  %v2770_v7 = vcombine.high %v6921_v9, %v6921_v9  ;;  %v6948_v53 = vpop.eup %5667  ;;  %v6951_v13 = vrot.slane %v2768_v18, %v6485_v5 }
 0x1f3   : > { %v6956_v49 = vrot.slane %v2641_v2, %v6480_v58  ;;  %v6960_v3 = vpop.eup %5669  ;;  %v2671_v26 = vcombine.high %v6932_v24, %v6932_v24  ;;  %v2672_v4 = vcombine.high %v6935_v20, %v6935_v20  ;;  %v6990_v61 = vrot.slane %v2670_v29, %v6485_v5 }
 0x1f4   : > { %v2771_v11 = vcombine.high %v6940_v37, %v6940_v37  ;;  %v6965_v36 = vrot.slane %v2770_v7, %v6485_v5  ;;  %v6970_v28 = vrot.slane %v2769_v62, %v6485_v5  ;;  %v6972_v30 = vpop.eup %5671  ;;  %v2786_v50 = vrot.slane %v2772_v43, %v6480_v58 }
 0x1f5   : > { %v2673_v32 = vcombine.high %v6956_v49, %v6956_v49  ;;  %v6982_v14 = vpop.eup %5673  ;;  %v6997_v54 = vrot.slane %v2672_v4, %v6485_v5  ;;  %v7002_v51 = vrot.slane %v2671_v26, %v6485_v5  ;;  %v2787_v45 = vcombine.high %v2779_v34, %v2779_v34 }
 0x1f6   : > { %8015 = vst [vmem:[#allocation8_spill] sm:$0xff] %v6982_v14  ;;  %v6985_v40 = vrot.slane %v2771_v11, %v6485_v5  ;;  %v6994_v25 = vpop.eup %5675  ;;  %v7009_v31 = vrot.slane %v2779_v34, %v6480_v58  ;;  %v2674_v21 = vcombine.high %v5660_v27, %v5660_v27  ;;  %v2681_v23 = vrot.slane %v5660_v27, %v6480_v58 }
 0x1f7   : > { %8016 = vst [vmem:[#allocation9_spill] sm:$0xff] %v6994_v25  ;;  %v7005_v56 = vrot.slane %v2673_v32, %v6485_v5  ;;  %v2259_v18 = vcombine.high %v6915_v12, %v6915_v12  ;;  %v2266_v2 = vrot.slane %v6915_v12, %v6480_v58  ;;  %v2161_v62 = vcombine.high %v6927_v17, %v6927_v17 }
 0x1f8   : > { %v2788_v7 = vcombine.high %v2786_v50, %v2786_v50  ;;  %v7019_v29 = vrot.slane %v2786_v50, %v6480_v58  ;;  %v7022_v43 = vrot.slane %v2787_v45, %v6480_v58  ;;  %v2817_v34 = vcombine.high %v7009_v31, %v7009_v31 }
 0x1f9   : > { %v2688_v11 = vrot.slane %v2674_v21, %v6480_v58  ;;  %v2689_v26 = vcombine.high %v2681_v23, %v2681_v23  ;;  %v7030_v12 = vrot.slane %v2681_v23, %v6480_v58  ;;  %v2282_v15 = vrot.slane %v2266_v2, %v6480_v58 }
 0x1fa   : > { %v7033_v4 = vrot.slane %v2788_v7, %v6480_v58  ;;  %v2818_v32 = vcombine.high %v7019_v29, %v7019_v29  ;;  %v2819_v50 = vcombine.high %v7022_v43, %v7022_v43  ;;  %v7042_v27 = vrot.slane %v2817_v34, %v6485_v5 }
 0x1fb   : > { %v2690_v23 = vcombine.high %v2688_v11, %v2688_v11  ;;  %v7047_v55 = vrot.slane %v2688_v11, %v6480_v58  ;;  %v7060_v34 = vrot.slane %v2689_v26, %v6480_v58  ;;  %v2719_v11 = vcombine.high %v7030_v12, %v7030_v12 }
 0x1fc   : > { %v2820_v7 = vcombine.high %v7033_v4, %v7033_v4  ;;  %v7052_v22 = vrot.slane %v2819_v50, %v6485_v5  ;;  %v7057_v45 = vrot.slane %v2818_v32, %v6485_v5  ;;  %v2273_v26 = vrot.slane %v2259_v18, %v6480_v58 }
 0x1fd   : > { %v7063_v21 = vrot.slane %v2690_v23, %v6480_v58  ;;  %v2720_v6 = vcombine.high %v7047_v55, %v7047_v55  ;;  %v2721_v23 = vcombine.high %v7060_v34, %v7060_v34  ;;  %v2274_v32 = vcombine.high %v2266_v2, %v2266_v2 }
 0x1fe   : > { %v7070_v50 = vrot.slane %v2820_v7, %v6485_v5  ;;  %v7084_v7 = vrot.slane %v2719_v11, %v6485_v5  ;;  %v2275_v18 = vcombine.high %v2273_v26, %v2273_v26  ;;  %v2289_v16 = vrot.slane %v2273_v26, %v6480_v58 }
 0x1ff   : > { %v2722_v0 = vcombine.high %v7063_v21, %v7063_v21  ;;  %v7089_v48 = vrot.slane %v2720_v6, %v6485_v5  ;;  %v7092_v41 = vrot.slane %v2721_v23, %v6485_v5  ;;  %v2296_v11 = vrot.slane %v2274_v32, %v6480_v58 }
 0x200   : > { %v2303_v1 = vrot.slane %v2275_v18, %v6480_v58  ;;  %v2168_v6 = vrot.slane %v6927_v17, %v6480_v58  ;;  %v2175_v60 = vrot.slane %v2161_v62, %v6480_v58  ;;  %v2304_v57 = vcombine.high %v2282_v15, %v2282_v15 }
 0x201   : > { %v7095_v19 = vrot.slane %v2722_v0, %v6485_v5  ;;  %v2305_v63 = vcombine.high %v2289_v16, %v2289_v16  ;;  %v8017_v23 = vrot.slane %v6904_v46, %v6485_v5  ;;  %v8018_v2 = vrot.slane %v6918_v47, %v6485_v5 }
 0x202   : > { %v2306_v32 = vcombine.high %v2296_v11, %v2296_v11  ;;  %v2307_v25 = vcombine.high %v2303_v1, %v2303_v1  ;;  %v8019_v18 = vrot.slane %v6921_v9, %v6485_v5  ;;  %v8020_v62 = vrot.slane %v6940_v37, %v6485_v5 }
 0x203   : > { %v3190_v0 = vsel %vm3141_vm15, %v2282_v15, %v8017_v23  ;;  %v3194_v26 = vsel %vm3141_vm15, %v2289_v16, %v8018_v2  ;;  %v3192_v46 = vsel %vm3141_vm15, %v2304_v57, %v6951_v13  ;;  %v3196_v15 = vsel %vm3141_vm15, %v2305_v63, %v6970_v28 }
 0x204   : > { %v3191_v17 = vsel %vm3141_vm15, %v2296_v11, %v8019_v18  ;;  %v3195_v14 = vsel %vm3141_vm15, %v2303_v1, %v8020_v62  ;;  %v3193_v23 = vsel %vm3141_vm15, %v2306_v32, %v6965_v36  ;;  %v3197_v9 = vsel %vm3141_vm15, %v2307_v25, %v6985_v40 }
 0x205   : > { %v4990_v47 = vcombine.low %v3190_v0, %v3191_v17  ;;  %v5007_v16 = vcombine.low %v3194_v26, %v3195_v14  ;;  %v2176_v11 = vcombine.high %v2168_v6, %v2168_v6  ;;  %v2177_v2 = vcombine.high %v2175_v60, %v2175_v60 }
 0x206   : > { %v4991_v18 = vcombine.low %v3192_v46, %v3193_v23  ;;  %v5008_v1 = vcombine.low %v3196_v15, %v3197_v9  ;;  %v2184_v57 = vrot.slane %v2168_v6, %v6480_v58  ;;  %v2191_v63 = vrot.slane %v2175_v60, %v6480_v58 }
 0x207   : > { %v4998_v37 = vrot.slane %v4990_v47, %v6488_v35  ;;  %v5015_v62 = vrot.slane %v5007_v16, %v6488_v35  ;;  %v2198_v13 = vrot.slane %v2176_v11, %v6480_v58  ;;  %v2205_v28 = vrot.slane %v2177_v2, %v6480_v58 }
 0x208   : > { %v5005_v36 = vrot.slane %v4991_v18, %v6488_v35  ;;  %v5022_v14 = vrot.slane %v5008_v1, %v6488_v35  ;;  %v2308_v40 = vcombine.high %v6937_v59, %v6937_v59  ;;  %v2315_v25 = vrot.slane %v6937_v59, %v6480_v58 }
 0x209   : > { %v2206_v0 = vcombine.high %v2184_v57, %v2184_v57  ;;  %v2207_v6 = vcombine.high %v2191_v63, %v2191_v63  ;;  %v2208_v26 = vcombine.high %v2198_v13, %v2198_v13  ;;  %v2209_v60 = vcombine.high %v2205_v28, %v2205_v28 }
 0x20a   : > { %v5006_v32 = vcombine.low %v4998_v37, %v5005_v36  ;;  %v5023_v17 = vcombine.low %v5015_v62, %v5022_v14  ;;  %v8021_v46 = vrot.slane %v6910_v44, %v6485_v5  ;;  %v8022_v47 = vrot.slane %v6935_v20, %v6485_v5 }
 0x20b   : > { %v3176_v23 = vsel %vm3141_vm15, %v2206_v0, %v6990_v61  ;;  %v3177_v59 = vsel %vm3141_vm15, %v2208_v26, %v6997_v54  ;;  %v8023_v9 = vrot.slane %v6932_v24, %v6485_v5  ;;  %v8024_v44 = vrot.slane %v6956_v49, %v6485_v5 }
 0x20c   : > { %v3174_v15 = vsel %vm3141_vm15, %v2184_v57, %v8021_v46  ;;  %v3175_v16 = vsel %vm3141_vm15, %v2198_v13, %v8022_v47  ;;  %5182 = vst [vmem:[%s6734_s8 + $0xc0] sm:$0xff] %v5006_v32  ;;  %5183 = vst [vmem:[%s6734_s8 + $0xc8] sm:$0xff] %v5023_v17  ;;  %v3180_v20 = vsel %vm3141_vm15, %v2207_v6, %v7002_v51 }
 0x20d   : > { %v3178_v11 = vsel %vm3141_vm15, %v2191_v63, %v8023_v9  ;;  %v3179_v2 = vsel %vm3141_vm15, %v2205_v28, %v8024_v44  ;;  %v3181_v61 = vsel %vm3141_vm15, %v2209_v60, %v7005_v56  ;;  %v4854_v18 = vcombine.low %v3174_v15, %v3175_v16 }
 0x20e   : > { %v4855_v54 = vcombine.low %v3176_v23, %v3177_v59  ;;  %v4871_v37 = vcombine.low %v3178_v11, %v3179_v2  ;;  %v4872_v1 = vcombine.low %v3180_v20, %v3181_v61  ;;  %v2322_v24 = vrot.slane %v2308_v40, %v6480_v58 }
 0x20f   : > { %v2323_v62 = vcombine.high %v2315_v25, %v2315_v25  ;;  %v4862_v57 = vrot.slane %v4854_v18, %v6488_v35  ;;  %v2331_v63 = vrot.slane %v2315_v25, %v6480_v58  ;;  %v2210_v51 = vcombine.high %v6948_v53, %v6948_v53 }
 0x210   : > { %v4869_v49 = vrot.slane %v4855_v54, %v6488_v35  ;;  %v4879_v13 = vrot.slane %v4871_v37, %v6488_v35  ;;  %v4886_v56 = vrot.slane %v4872_v1, %v6488_v35  ;;  %v2324_v28 = vcombine.high %v2322_v24, %v2322_v24 }
 0x211   : > { %v2338_v36 = vrot.slane %v2322_v24, %v6480_v58  ;;  %v2345_v40 = vrot.slane %v2323_v62, %v6480_v58  ;;  %v2353_v0 = vcombine.high %v2331_v63, %v2331_v63  ;;  %v8025_v6 = vrot.slane %v7009_v31, %v6485_v5 }
 0x212   : > { %v4870_v14 = vcombine.low %v4862_v57, %v4869_v49  ;;  %v4887_v26 = vcombine.low %v4879_v13, %v4886_v56  ;;  %v2352_v60 = vrot.slane %v2324_v28, %v6480_v58  ;;  %v8026_v17 = vrot.slane %v7019_v29, %v6485_v5 }
 0x213   : > { %v3198_v25 = vsel %vm3141_vm15, %v2331_v63, %v8025_v6  ;;  %v2354_v32 = vcombine.high %v2338_v36, %v2338_v36  ;;  %v2355_v15 = vcombine.high %v2345_v40, %v2345_v40  ;;  %v8027_v47 = vrot.slane %v7022_v43, %v6485_v5 }
 0x214   : > { %v3202_v46 = vsel %vm3141_vm15, %v2338_v36, %v8026_v17  ;;  %5174 = vst [vmem:[%s6734_s8 + $0x80] sm:$0xff] %v4870_v14  ;;  %v3200_v31 = vsel %vm3141_vm15, %v2353_v0, %v7042_v27  ;;  %v2217_v23 = vrot.slane %v6948_v53, %v6480_v58  ;;  %5175 = vst [vmem:[%s6734_s8 + $0x88] sm:$0xff] %v4887_v26 }
 0x215   : > { %v3199_v16 = vsel %vm3141_vm15, %v2345_v40, %v8027_v47  ;;  %v2356_v59 = vcombine.high %v2352_v60, %v2352_v60  ;;  %v8028_v29 = vrot.slane %v7033_v4, %v6485_v5  ;;  %v3204_v11 = vsel %vm3141_vm15, %v2354_v32, %v7057_v45 }
 0x216   : > { %v5058_v44 = vcombine.low %v3198_v25, %v3199_v16  ;;  %v3201_v43 = vsel %vm3141_vm15, %v2355_v15, %v7052_v22  ;;  %v2224_v27 = vrot.slane %v2210_v51, %v6480_v58  ;;  %v2225_v20 = vcombine.high %v2217_v23, %v2217_v23 }
 0x217   : > { %v3203_v9 = vsel %vm3141_vm15, %v2352_v60, %v8028_v29  ;;  %v3205_v53 = vsel %vm3141_vm15, %v2356_v59, %v7070_v50  ;;  %v5059_v61 = vcombine.low %v3200_v31, %v3201_v43  ;;  %v2233_v4 = vrot.slane %v2217_v23, %v6480_v58 }
 0x218   : > { %v5075_v2 = vcombine.low %v3202_v46, %v3203_v9  ;;  %v5066_v18 = vrot.slane %v5058_v44, %v6488_v35  ;;  %v5076_v54 = vcombine.low %v3204_v11, %v3205_v53  ;;  %v2226_v45 = vcombine.high %v2224_v27, %v2224_v27 }
 0x219   : > { %v2240_v1 = vrot.slane %v2224_v27, %v6480_v58  ;;  %v5073_v22 = vrot.slane %v5059_v61, %v6488_v35  ;;  %v2247_v24 = vrot.slane %v2225_v20, %v6480_v58  ;;  %v2255_v62 = vcombine.high %v2233_v4, %v2233_v4 }
 0x21a   : > { %v5083_v37 = vrot.slane %v5075_v2, %v6488_v35  ;;  %v8029_v50 = vrot.slane %v7030_v12, %v6485_v5  ;;  %v5090_v49 = vrot.slane %v5076_v54, %v6488_v35  ;;  %v2254_v63 = vrot.slane %v2226_v45, %v6480_v58  ;;  %v7266_v2 = vld [vmem:[%s7984_s4] ss:$0 sm:$0xff] }
 0x21b   : > { %v2256_v51 = vcombine.high %v2240_v1, %v2240_v1  ;;  %v8030_v13 = vrot.slane %v7047_v55, %v6485_v5  ;;  %v5074_v28 = vcombine.low %v5066_v18, %v5073_v22  ;;  %v2257_v36 = vcombine.high %v2247_v24, %v2247_v24 }
 0x21c   : > { %v3182_v57 = vsel %vm3141_vm15, %v2233_v4, %v8029_v50  ;;  %v8031_v14 = vrot.slane %v7060_v34, %v6485_v5  ;;  %v3184_v40 = vsel %vm3141_vm15, %v2255_v62, %v7084_v7  ;;  %v5091_v0 = vcombine.low %v5083_v37, %v5090_v49  ;;  %v8033_v62 = vld [vmem:[#allocation8_spill] sm:$0xff] }
 0x21d   : > { %v3186_v56 = vsel %vm3141_vm15, %v2240_v1, %v8030_v13  ;;  %v2258_v6 = vcombine.high %v2254_v63, %v2254_v63  ;;  %v8032_v25 = vrot.slane %v7063_v21, %v6485_v5  ;;  %v3188_v55 = vsel %vm3141_vm15, %v2256_v51, %v7089_v48  ;;  %5186 = vst [vmem:[%s6734_s8 + $0xe0] sm:$0xff] %v5074_v28 }
 0x21e   : > { %v3183_v12 = vsel %vm3141_vm15, %v2247_v24, %v8031_v14  ;;  %v3185_v60 = vsel %vm3141_vm15, %v2257_v36, %v7092_v41  ;;  %v3776_v17 = vcombine.high %v6960_v3, %v6960_v3  ;;  %5187 = vst [vmem:[%s6734_s8 + $0xe8] sm:$0xff] %v5091_v0  ;;  %v3783_v21 = vrot.slane %v6960_v3, %v6480_v58 }
 0x21f   : > { %v3187_v26 = vsel %vm3141_vm15, %v2254_v63, %v8032_v25  ;;  %v4922_v34 = vcombine.low %v3182_v57, %v3183_v12  ;;  %v3189_v7 = vsel %vm3141_vm15, %v2258_v6, %v7095_v19  ;;  %v4923_v46 = vcombine.low %v3184_v40, %v3185_v60 }
 0x220   : > { %v4939_v32 = vcombine.low %v3186_v56, %v3187_v26  ;;  %v3678_v48 = vcombine.high %v6972_v30, %v6972_v30  ;;  %v4940_v47 = vcombine.low %v3188_v55, %v3189_v7  ;;  %v3790_v16 = vrot.slane %v3776_v17, %v6480_v58  ;;  %v8034_v55 = vld [vmem:[#allocation9_spill] sm:$0xff] }
 0x221   : > { %v4930_v15 = vrot.slane %v4922_v34, %v6488_v35  ;;  %v4937_v31 = vrot.slane %v4923_v46, %v6488_v35  ;;  %v3791_v23 = vcombine.high %v3783_v21, %v3783_v21  ;;  %v7251_v19 = vrot.slane %v3783_v21, %v6480_v58  ;;  %v5678_v46 = vpop.eup %5677 }
 0x222   : > { %v4947_v41 = vrot.slane %v4939_v32, %v6488_v35  ;;  %v3685_v3 = vrot.slane %v6972_v30, %v6480_v58  ;;  %v4954_v59 = vrot.slane %v4940_v47, %v6488_v35  ;;  %v3792_v29 = vcombine.high %v3790_v16, %v3790_v16 }
 0x223   : > { %v7257_v9 = vrot.slane %v3790_v16, %v6480_v58  ;;  %v3692_v11 = vrot.slane %v3678_v48, %v6480_v58  ;;  %v4938_v44 = vcombine.low %v4930_v15, %v4937_v31  ;;  %v7261_v43 = vrot.slane %v3791_v23, %v6480_v58 }
 0x224   : > { %v7270_v30 = vadd.f32 %v7266_v2, %v6809_v33  ;;  %v7274_v27 = vadd.f32 %v7266_v2, %v6814_v10  ;;  %v4955_v20 = vcombine.low %v4947_v41, %v4954_v59  ;;  %v7277_v53 = vrot.slane %v3792_v29, %v6480_v58 }
 0x225   : > { %v7282_v61 = vadd.f32 %v7266_v2, %v6880_v38  ;;  %5178 = vst [vmem:[%s6734_s8 + $0xa0] sm:$0xff] %v4938_v44  ;;  %v3821_v18 = vcombine.high %v7251_v19, %v7251_v19  ;;  %v3693_v33 = vcombine.high %v3685_v3, %v3685_v3  ;;  %v7289_v4 = vadd.f32 %v7266_v2, %v6884_v39 }
 0x226   : > { %v7293_v10 = vadd.f32 %v7266_v2, %v6886_v42  ;;  %5179 = vst [vmem:[%s6734_s8 + $0xa8] sm:$0xff] %v4955_v20  ;;  %v3822_v52 = vcombine.high %v7257_v9, %v7257_v9  ;;  %v3823_v38 = vcombine.high %v7261_v43, %v7261_v43  ;;  %v3824_v54 = vcombine.high %v7277_v53, %v7277_v53 }
 0x227   : > { %v3694_v37 = vcombine.high %v3692_v11, %v3692_v11  ;;  %v7303_v45 = vrot.slane %v3685_v3, %v6480_v58  ;;  %v7306_v39 = vrot.slane %v3692_v11, %v6480_v58  ;;  %v7309_v42 = vrot.slane %v3693_v33, %v6480_v58 }
 0x228   : > { %v7313_v1 = vadd.f32 %v7266_v2, %v6888_v8  ;;  %v4137_v22 = vrot.slane %v7251_v19, %v6485_v5  ;;  %v3825_v50 = vcombine.high %v8033_v62, %v8033_v62  ;;  %v3832_v57 = vrot.slane %v8033_v62, %v6480_v58 }
 0x229   : > { %v7318_v24 = vrot.slane %v3694_v37, %v6480_v58  ;;  %v4141_v49 = vrot.slane %v7261_v43, %v6485_v5  ;;  %v7327_v63 = vrot.slane %v3821_v18, %v6485_v5  ;;  %v4153_v8 = vrot.slane %v7257_v9, %v6485_v5 }
 0x22a   : > { %v4157_v51 = vrot.slane %v7277_v53, %v6485_v5  ;;  %v7334_v13 = vrot.slane %v3823_v38, %v6485_v5  ;;  %v7337_v56 = vrot.slane %v3822_v52, %v6485_v5  ;;  %v7340_v28 = vrot.slane %v3824_v54, %v6485_v5  ;;  %v8036_v53 = vld [vmem:[#allocation4_spill] sm:$0xff] }
 0x22b   : > { %v3723_v36 = vcombine.high %v7303_v45, %v7303_v45  ;;  %v3724_v14 = vcombine.high %v7306_v39, %v7306_v39  ;;  %v3725_v12 = vcombine.high %v7309_v42, %v7309_v42  ;;  %v4073_v40 = vrot.slane %v7303_v45, %v6485_v5 }
 0x22c   : > { %v3839_v0 = vrot.slane %v3825_v50, %v6480_v58  ;;  %v3726_v6 = vcombine.high %v7318_v24, %v7318_v24  ;;  %v3840_v25 = vcombine.high %v3832_v57, %v3832_v57  ;;  %v7354_v26 = vrot.slane %v3832_v57, %v6480_v58 }
 0x22d   : > { %v3727_v60 = vcombine.high %v8034_v55, %v8034_v55  ;;  %v4077_v34 = vrot.slane %v7309_v42, %v6485_v5  ;;  %v3734_v7 = vrot.slane %v8034_v55, %v6480_v58  ;;  %v4089_v21 = vrot.slane %v7306_v39, %v6485_v5 }
 0x22e   : > { %v3841_v32 = vcombine.high %v3839_v0, %v3839_v0  ;;  %v7361_v17 = vrot.slane %v3839_v0, %v6480_v58  ;;  %v4093_v48 = vrot.slane %v7318_v24, %v6485_v5  ;;  %v7370_v15 = vrot.slane %v3840_v25, %v6480_v58 }
 0x22f   : > { %v3741_v47 = vrot.slane %v3727_v60, %v6480_v58  ;;  %v7374_v41 = vrot.slane %v3723_v36, %v6485_v5  ;;  %v7377_v16 = vrot.slane %v3725_v12, %v6485_v5  ;;  %v3742_v23 = vcombine.high %v3734_v7, %v3734_v7 }
 0x230   : > { %v7380_v31 = vrot.slane %v3841_v32, %v6480_v58  ;;  %v7383_v3 = vrot.slane %v3724_v14, %v6485_v5  ;;  %v3870_v59 = vcombine.high %v7354_v26, %v7354_v26  ;;  %v3871_v29 = vcombine.high %v7361_v17, %v7361_v17 }
 0x231   : > { %v3743_v11 = vcombine.high %v3741_v47, %v3741_v47  ;;  %v3872_v44 = vcombine.high %v7370_v15, %v7370_v15  ;;  %v7394_v18 = vrot.slane %v3734_v7, %v6480_v58  ;;  %v3312_v33 = vcombine.high %v5678_v46, %v5678_v46 }
 0x232   : > { %v3873_v20 = vcombine.high %v7380_v31, %v7380_v31  ;;  %v7397_v52 = vrot.slane %v3726_v6, %v6485_v5  ;;  %v7400_v38 = vrot.slane %v3741_v47, %v6480_v58  ;;  %v7403_v54 = vrot.slane %v3742_v23, %v6480_v58 }
 0x233   : > { %v7406_v37 = vrot.slane %v3743_v11, %v6480_v58  ;;  %v4169_v62 = vrot.slane %v7354_v26, %v6485_v5  ;;  %v3319_v36 = vrot.slane %v5678_v46, %v6480_v58  ;;  %v7416_v14 = vrot.slane %v3870_v59, %v6485_v5 }
 0x234   : > { %v7421_v0 = vrot.slane %v3871_v29, %v6485_v5  ;;  %v3772_v6 = vcombine.high %v7394_v18, %v7394_v18  ;;  %v7426_v25 = vrot.slane %v3872_v44, %v6485_v5  ;;  %v7429_v55 = vrot.slane %v3873_v20, %v6485_v5  ;;  %v8035_v44 = vld [vmem:[#allocation3_spill] sm:$0xff] }
 0x235   : > { %v3326_v32 = vrot.slane %v3312_v33, %v6480_v58  ;;  %v3773_v7 = vcombine.high %v7400_v38, %v7400_v38  ;;  %v3774_v46 = vcombine.high %v7403_v54, %v7403_v54  ;;  %v3775_v47 = vcombine.high %v7406_v37, %v7406_v37 }
 0x236   : > { %v3327_v23 = vcombine.high %v3319_v36, %v3319_v36  ;;  %v3335_v29 = vrot.slane %v3319_v36, %v6480_v58  ;;  %5679 = vtanh.f32 %v8035_v44  ;;  %v4109_v20 = vrot.slane %v7403_v54, %v6485_v5 }
 0x237   : > { %v3328_v59 = vcombine.high %v3326_v32, %v3326_v32  ;;  %v3342_v11 = vrot.slane %v3326_v32, %v6480_v58  ;;  %v7446_v33 = vrot.slane %v3772_v6, %v6485_v5  ;;  %5681 = vtanh.f32 %v7270_v30 }
 0x238   : > { %v3349_v60 = vrot.slane %v3327_v23, %v6480_v58  ;;  %v3357_v57 = vcombine.high %v3335_v29, %v3335_v29  ;;  %v4406_v36 = vsel %vm3141_vm15, %v3335_v29, %v4137_v22  ;;  %5683 = vtanh.f32 %v7274_v27 }
 0x239   : > { %v3356_v12 = vrot.slane %v3328_v59, %v6480_v58  ;;  %v3358_v50 = vcombine.high %v3342_v11, %v3342_v11  ;;  %v4410_v30 = vsel %vm3141_vm15, %v3342_v11, %v4153_v8  ;;  %v4121_v22 = vrot.slane %v7400_v38, %v6485_v5 }
 0x23a   : > { %v3359_v32 = vcombine.high %v3349_v60, %v3349_v60  ;;  %v4407_v6 = vsel %vm3141_vm15, %v3349_v60, %v4141_v49  ;;  %v4408_v59 = vsel %vm3141_vm15, %v3357_v57, %v7327_v63  ;;  %5685 = vtanh.f32 %v7282_v61  ;;  %v8037_v57 = vld [vmem:[#allocation5_spill] sm:$0xff] }
 0x23b   : > { %v3360_v23 = vcombine.high %v3356_v12, %v3356_v12  ;;  %v4411_v19 = vsel %vm3141_vm15, %v3356_v12, %v4157_v51  ;;  %v4412_v43 = vsel %vm3141_vm15, %v3358_v50, %v7337_v56  ;;  %v4752_v49 = vcombine.low %v4406_v36, %v4407_v6 }
 0x23c   : > { %v4409_v9 = vsel %vm3141_vm15, %v3359_v32, %v7334_v13  ;;  %v4769_v27 = vcombine.low %v4410_v30, %v4411_v19  ;;  %v1681_v51 = vadd.f32 %v7266_v2, %v8036_v53  ;;  %v4125_v56 = vrot.slane %v7406_v37, %v6485_v5 }
 0x23d   : > { %v4413_v8 = vsel %vm3141_vm15, %v3360_v23, %v7340_v28  ;;  %v4753_v63 = vcombine.low %v4408_v59, %v4409_v9  ;;  %5687 = vtanh.f32 %v7289_v4  ;;  %v1673_v13 = vadd.f32 %v7266_v2, %v8037_v57  ;;  %v8038_v28 = vld [vmem:[#allocation6_spill] sm:$0xff]  ;;  %v8039_v4 = vld [vmem:[#allocation7_spill] sm:$0xff] }
 0x23e   : > { %v4770_v50 = vcombine.low %v4412_v43, %v4413_v8  ;;  %v4760_v12 = vrot.slane %v4752_v49, %v6488_v35  ;;  %5689 = vtanh.f32 %v7293_v10  ;;  %v1684_v61 = vadd.f32 %v7266_v2, %v8038_v28 }
 0x23f   : > { %v4767_v60 = vrot.slane %v4753_v63, %v6488_v35  ;;  %v4777_v29 = vrot.slane %v4769_v27, %v6488_v35  ;;  %5691 = vtanh.f32 %v7313_v1  ;;  %v1676_v44 = vadd.f32 %v7266_v2, %v8039_v4 }
 0x240   : > { %v4784_v11 = vrot.slane %v4770_v50, %v6488_v35  ;;  %v5680_v36 = vpop.eup %5679  ;;  %v7497_v32 = vrot.slane %v3774_v46, %v6485_v5  ;;  %v7500_v10 = vrot.slane %v3773_v7, %v6485_v5  ;;  %5693 = vtanh.f32 %v1681_v51 }
 0x241   : > { %v4768_v6 = vcombine.low %v4760_v12, %v4767_v60  ;;  %v5682_v30 = vpop.eup %5681  ;;  %v3214_v59 = vcombine.high %v5680_v36, %v5680_v36  ;;  %v3221_v19 = vrot.slane %v5680_v36, %v6480_v58  ;;  %5695 = vtanh.f32 %v1673_v13 }
 0x242   : > { %v4785_v23 = vcombine.low %v4777_v29, %v4784_v11  ;;  %v7504_v1 = vrot.slane %v3775_v47, %v6485_v5  ;;  %v3361_v2 = vcombine.high %v5682_v30, %v5682_v30  ;;  %v3368_v43 = vrot.slane %v5682_v30, %v6480_v58  ;;  %v7508_v46 = vpop.eup %5683 }
 0x243   : > { %5168 = vst [vmem:[%s6734_s8 + $0x50] sm:$0xff] %v4768_v6  ;;  %5697 = vtanh.f32 %v1684_v61  ;;  %v3228_v7 = vrot.slane %v3214_v59, %v6480_v58  ;;  %v3229_v9 = vcombine.high %v3221_v19, %v3221_v19  ;;  %v3237_v49 = vrot.slane %v3221_v19, %v6480_v58 }
 0x244   : > { %5169 = vst [vmem:[%s6734_s8 + $0x58] sm:$0xff] %v4785_v23  ;;  %5699 = vtanh.f32 %v1676_v44  ;;  %v3375_v27 = vrot.slane %v3361_v2, %v6480_v58  ;;  %v3376_v8 = vcombine.high %v3368_v43, %v3368_v43  ;;  %v3384_v47 = vrot.slane %v3368_v43, %v6480_v58  ;;  %v7519_v13 = vpop.eup %5685 }
 0x245   : > { %v3263_v63 = vcombine.high %v7508_v46, %v7508_v46  ;;  %v3230_v53 = vcombine.high %v3228_v7, %v3228_v7  ;;  %v3244_v51 = vrot.slane %v3228_v7, %v6480_v58  ;;  %v3251_v50 = vrot.slane %v3229_v9, %v6480_v58 }
 0x246   : > { %v3259_v57 = vcombine.high %v3237_v49, %v3237_v49  ;;  %v4390_v12 = vsel %vm3141_vm15, %v3237_v49, %v4073_v40  ;;  %v3377_v60 = vcombine.high %v3375_v27, %v3375_v27  ;;  %v3391_v28 = vrot.slane %v3375_v27, %v6480_v58 }
 0x247   : > { %v3398_v61 = vrot.slane %v3376_v8, %v6480_v58  ;;  %v7527_v29 = vpop.eup %5687  ;;  %v3258_v11 = vrot.slane %v3230_v53, %v6480_v58  ;;  %v3260_v4 = vcombine.high %v3244_v51, %v3244_v51  ;;  %v3261_v44 = vcombine.high %v3251_v50, %v3251_v50 }
 0x248   : > { %v4391_v36 = vsel %vm3141_vm15, %v3251_v50, %v4077_v34  ;;  %v7534_v6 = vpop.eup %5689  ;;  %v4392_v45 = vsel %vm3141_vm15, %v3259_v57, %v7374_v41  ;;  %v4394_v40 = vsel %vm3141_vm15, %v3244_v51, %v4089_v21  ;;  %v3405_v23 = vrot.slane %v3377_v60, %v6480_v58 }
 0x249   : > { %v4616_v30 = vcombine.low %v4390_v12, %v4391_v36  ;;  %v7543_v59 = vpop.eup %5691  ;;  %v3262_v19 = vcombine.high %v3258_v11, %v3258_v11  ;;  %v4393_v42 = vsel %vm3141_vm15, %v3261_v44, %v7377_v16  ;;  %v4395_v34 = vsel %vm3141_vm15, %v3258_v11, %v4093_v48 }
 0x24a   : > { %v4396_v41 = vsel %vm3141_vm15, %v3260_v4, %v7383_v3  ;;  %v7553_v39 = vpop.eup %5693  ;;  %v4617_v21 = vcombine.low %v4392_v45, %v4393_v42  ;;  %v4633_v43 = vcombine.low %v4394_v40, %v4395_v34  ;;  %v3406_v7 = vcombine.high %v3384_v47, %v3384_v47 }
 0x24b   : > { %v4624_v2 = vrot.slane %v4616_v30, %v6488_v35  ;;  %v7556_v9 = vpop.eup %5695  ;;  %v4397_v16 = vsel %vm3141_vm15, %v3262_v19, %v7397_v52  ;;  %v3407_v49 = vcombine.high %v3391_v28, %v3391_v28  ;;  %v3408_v27 = vcombine.high %v3398_v61, %v3398_v61 }
 0x24c   : > { %v3409_v24 = vcombine.high %v3405_v23, %v3405_v23  ;;  %v4631_v48 = vrot.slane %v4617_v21, %v6488_v35  ;;  %v4634_v3 = vcombine.low %v4396_v41, %v4397_v16  ;;  %v4641_v53 = vrot.slane %v4633_v43, %v6488_v35 }
 0x24d   : > { %v7560_v8 = vpop.eup %5697  ;;  %v4414_v51 = vsel %vm3141_vm15, %v3384_v47, %v4169_v62  ;;  %v8040_v52 = vrot.slane %v7370_v15, %v6485_v5  ;;  %v4416_v12 = vsel %vm3141_vm15, %v3406_v7, %v7416_v14  ;;  %v4417_v60 = vsel %vm3141_vm15, %v3408_v27, %v7426_v25 }
 0x24e   : > { %v7568_v50 = vpop.eup %5699  ;;  %v8041_v11 = vrot.slane %v7361_v17, %v6485_v5  ;;  %v4632_v4 = vcombine.low %v4624_v2, %v4631_v48  ;;  %v4648_v62 = vrot.slane %v4634_v3, %v6488_v35  ;;  %v8042_v47 = vrot.slane %v7380_v31, %v6485_v5 }
 0x24f   : > { %v4415_v57 = vsel %vm3141_vm15, %v3398_v61, %v8040_v52  ;;  %v4420_v14 = vsel %vm3141_vm15, %v3407_v49, %v7421_v0  ;;  %v4421_v25 = vsel %vm3141_vm15, %v3409_v24, %v7429_v55  ;;  %v4821_v44 = vcombine.low %v4416_v12, %v4417_v60 }
 0x250   : > { %v4418_v26 = vsel %vm3141_vm15, %v3391_v28, %v8041_v11  ;;  %v4419_v15 = vsel %vm3141_vm15, %v3405_v23, %v8042_v47  ;;  %v4820_v61 = vcombine.low %v4414_v51, %v4415_v57  ;;  %v4649_v36 = vcombine.low %v4641_v53, %v4648_v62  ;;  %5160 = vst [vmem:[%s6734_s8 + $0x10] sm:$0xff] %v4632_v4 }
 0x251   : > { %v4837_v17 = vcombine.low %v4418_v26, %v4419_v15  ;;  %v4838_v28 = vcombine.low %v4420_v14, %v4421_v25  ;;  %v3270_v45 = vrot.slane %v7508_v46, %v6480_v58  ;;  %v3277_v31 = vrot.slane %v3263_v63, %v6480_v58 }
 0x252   : > { %v4828_v40 = vrot.slane %v4820_v61, %v6488_v35  ;;  %v4835_v30 = vrot.slane %v4821_v44, %v6488_v35  ;;  %v3972_v55 = vcombine.high %v7519_v13, %v7519_v13  ;;  %5161 = vst [vmem:[%s6734_s8 + $0x18] sm:$0xff] %v4649_v36  ;;  %v3979_v41 = vrot.slane %v7519_v13, %v6480_v58 }
 0x253   : > { %v4845_v0 = vrot.slane %v4837_v17, %v6488_v35  ;;  %v4852_v23 = vrot.slane %v4838_v28, %v6488_v35  ;;  %v3278_v19 = vcombine.high %v3270_v45, %v3270_v45  ;;  %v3279_v42 = vcombine.high %v3277_v31, %v3277_v31 }
 0x254   : > { %v3286_v46 = vrot.slane %v3270_v45, %v6480_v58  ;;  %v4836_v34 = vcombine.low %v4828_v40, %v4835_v30  ;;  %v3293_v63 = vrot.slane %v3277_v31, %v6480_v58  ;;  %v3986_v21 = vrot.slane %v3972_v55, %v6480_v58 }
 0x255   : > { %v4853_v2 = vcombine.low %v4845_v0, %v4852_v23  ;;  %v3300_v43 = vrot.slane %v3278_v19, %v6480_v58  ;;  %v3307_v7 = vrot.slane %v3279_v42, %v6480_v58  ;;  %v8043_v27 = vrot.slane %v7394_v18, %v6485_v5 }
 0x256   : > { %v3308_v16 = vcombine.high %v3286_v46, %v3286_v46  ;;  %5172 = vst [vmem:[%s6734_s8 + $0x70] sm:$0xff] %v4836_v34  ;;  %v3309_v49 = vcombine.high %v3293_v63, %v3293_v63  ;;  %v4402_v13 = vsel %vm3141_vm15, %v3293_v63, %v4121_v22  ;;  %v3987_v48 = vcombine.high %v3979_v41, %v3979_v41 }
 0x257   : > { %v4398_v24 = vsel %vm3141_vm15, %v3286_v46, %v8043_v27  ;;  %5173 = vst [vmem:[%s6734_s8 + $0x78] sm:$0xff] %v4853_v2  ;;  %v3310_v3 = vcombine.high %v3300_v43, %v3300_v43  ;;  %v3311_v53 = vcombine.high %v3307_v7, %v3307_v7  ;;  %v4399_v51 = vsel %vm3141_vm15, %v3300_v43, %v4109_v20 }
 0x258   : > { %v4400_v52 = vsel %vm3141_vm15, %v3308_v16, %v7446_v33  ;;  %v4403_v18 = vsel %vm3141_vm15, %v3307_v7, %v4125_v56  ;;  %v4404_v38 = vsel %vm3141_vm15, %v3309_v49, %v7500_v10  ;;  %v4684_v22 = vcombine.low %v4398_v24, %v4399_v51 }
 0x259   : > { %v3988_v57 = vcombine.high %v3986_v21, %v3986_v21  ;;  %v4401_v12 = vsel %vm3141_vm15, %v3310_v3, %v7497_v32  ;;  %v4405_v54 = vsel %vm3141_vm15, %v3311_v53, %v7504_v1  ;;  %v4701_v20 = vcombine.low %v4402_v13, %v4403_v18 }
 0x25a   : > { %v7636_v60 = vrot.slane %v3979_v41, %v6480_v58  ;;  %v4685_v33 = vcombine.low %v4400_v52, %v4401_v12  ;;  %v4692_v37 = vrot.slane %v4684_v22, %v6488_v35  ;;  %v4702_v11 = vcombine.low %v4404_v38, %v4405_v54 }
 0x25b   : > { %v7640_v56 = vrot.slane %v3986_v21, %v6480_v58  ;;  %v4709_v10 = vrot.slane %v4701_v20, %v6488_v35  ;;  %v7644_v26 = vrot.slane %v3987_v48, %v6480_v58  ;;  %v7647_v32 = vrot.slane %v3988_v57, %v6480_v58 }
 0x25c   : > { %v4017_v1 = vcombine.high %v7636_v60, %v7636_v60  ;;  %v4699_v4 = vrot.slane %v4685_v33, %v6488_v35  ;;  %v4716_v62 = vrot.slane %v4702_v11, %v6488_v35  ;;  %v4265_v15 = vrot.slane %v7636_v60, %v6485_v5 }
 0x25d   : > { %v4018_v47 = vcombine.high %v7640_v56, %v7640_v56  ;;  %v4019_v14 = vcombine.high %v7644_v26, %v7644_v26  ;;  %v4020_v25 = vcombine.high %v7647_v32, %v7647_v32  ;;  %v4269_v61 = vrot.slane %v7644_v26, %v6485_v5 }
 0x25e   : > { %v7664_v44 = vrot.slane %v4017_v1, %v6485_v5  ;;  %v4700_v17 = vcombine.low %v4692_v37, %v4699_v4  ;;  %v4717_v36 = vcombine.low %v4709_v10, %v4716_v62  ;;  %v4281_v28 = vrot.slane %v7640_v56, %v6485_v5 }
 0x25f   : > { %v4285_v45 = vrot.slane %v7647_v32, %v6485_v5  ;;  %v7671_v31 = vrot.slane %v4019_v14, %v6485_v5  ;;  %v7674_v40 = vrot.slane %v4018_v47, %v6485_v5  ;;  %v7677_v30 = vrot.slane %v4020_v25, %v6485_v5 }
 0x260   : > { %v3874_v0 = vcombine.high %v7527_v29, %v7527_v29  ;;  %5164 = vst [vmem:[%s6734_s8 + $0x30] sm:$0xff] %v4700_v17  ;;  %5165 = vst [vmem:[%s6734_s8 + $0x38] sm:$0xff] %v4717_v36  ;;  %v3881_v55 = vrot.slane %v7527_v29, %v6480_v58  ;;  %v4021_v23 = vcombine.high %v7534_v6, %v7534_v6 }
 0x261   : > { %v4028_v19 = vrot.slane %v7534_v6, %v6480_v58  ;;  %v3923_v42 = vcombine.high %v7543_v59, %v7543_v59  ;;  %v3930_v34 = vrot.slane %v7543_v59, %v6480_v58  ;;  %v3508_v63 = vcombine.high %v7553_v39, %v7553_v39 }
 0x262   : > { %v3888_v46 = vrot.slane %v3874_v0, %v6480_v58  ;;  %v7698_v29 = vrot.slane %v7553_v39, %v6480_v58  ;;  %v3889_v41 = vcombine.high %v3881_v55, %v3881_v55  ;;  %v7701_v21 = vrot.slane %v3881_v55, %v6480_v58 }
 0x263   : > { %v4035_v6 = vrot.slane %v4021_v23, %v6480_v58  ;;  %v4036_v2 = vcombine.high %v4028_v19, %v4028_v19  ;;  %v7708_v59 = vrot.slane %v4028_v19, %v6480_v58  ;;  %v3937_v16 = vrot.slane %v3923_v42, %v6480_v58 }
 0x264   : > { %v3890_v43 = vcombine.high %v3888_v46, %v3888_v46  ;;  %v7705_v7 = vrot.slane %v3888_v46, %v6480_v58  ;;  %v7712_v49 = vrot.slane %v3889_v41, %v6480_v58  ;;  %v3919_v39 = vcombine.high %v7701_v21, %v7701_v21 }
 0x265   : > { %v4201_v27 = vrot.slane %v7701_v21, %v6485_v5  ;;  %v4037_v24 = vcombine.high %v4035_v6, %v4035_v6  ;;  %v7726_v53 = vrot.slane %v4035_v6, %v6480_v58  ;;  %v7736_v38 = vrot.slane %v4036_v2, %v6480_v58 }
 0x266   : > { %v7719_v13 = vrot.slane %v3890_v43, %v6480_v58  ;;  %v3920_v48 = vcombine.high %v7705_v7, %v7705_v7  ;;  %v4217_v3 = vrot.slane %v7705_v7, %v6485_v5  ;;  %v3921_v51 = vcombine.high %v7712_v49, %v7712_v49 }
 0x267   : > { %v4205_v52 = vrot.slane %v7712_v49, %v6485_v5  ;;  %v7733_v18 = vrot.slane %v3919_v39, %v6485_v5  ;;  %v7746_v54 = vrot.slane %v4037_v24, %v6480_v58  ;;  %v4066_v33 = vcombine.high %v7708_v59, %v7708_v59 }
 0x268   : > { %v3922_v22 = vcombine.high %v7719_v13, %v7719_v13  ;;  %v4221_v57 = vrot.slane %v7719_v13, %v6485_v5  ;;  %v7743_v12 = vrot.slane %v3920_v48, %v6485_v5  ;;  %v7749_v20 = vrot.slane %v3921_v51, %v6485_v5 }
 0x269   : > { %v4067_v37 = vcombine.high %v7726_v53, %v7726_v53  ;;  %v4068_v11 = vcombine.high %v7736_v38, %v7736_v38  ;;  %v4069_v1 = vcombine.high %v7746_v54, %v7746_v54  ;;  %v4297_v4 = vrot.slane %v7708_v59, %v6485_v5 }
 0x26a   : > { %v7758_v10 = vrot.slane %v3922_v22, %v6485_v5  ;;  %v4301_v62 = vrot.slane %v7736_v38, %v6485_v5  ;;  %v7767_v47 = vrot.slane %v4066_v33, %v6485_v5  ;;  %v4313_v25 = vrot.slane %v7726_v53, %v6485_v5 }
 0x26b   : > { %v7770_v14 = vrot.slane %v4068_v11, %v6485_v5  ;;  %v4317_v17 = vrot.slane %v7746_v54, %v6485_v5  ;;  %v7777_v36 = vrot.slane %v4067_v37, %v6485_v5  ;;  %v7780_v0 = vrot.slane %v4069_v1, %v6485_v5 }
 0x26c   : > { %v3938_v55 = vcombine.high %v3930_v34, %v3930_v34  ;;  %v3939_v23 = vcombine.high %v3937_v16, %v3937_v16  ;;  %v7783_v19 = vrot.slane %v3930_v34, %v6480_v58  ;;  %v7786_v42 = vrot.slane %v3937_v16, %v6480_v58 }
 0x26d   : > { %v3522_v46 = vrot.slane %v3508_v63, %v6480_v58  ;;  %v3523_v41 = vcombine.high %v7698_v29, %v7698_v29  ;;  %v3531_v43 = vrot.slane %v7698_v29, %v6480_v58  ;;  %v3410_v34 = vcombine.high %v7556_v9, %v7556_v9 }
 0x26e   : > { %v7792_v6 = vrot.slane %v3938_v55, %v6480_v58  ;;  %v7795_v2 = vrot.slane %v3939_v23, %v6480_v58  ;;  %v3968_v16 = vcombine.high %v7783_v19, %v7783_v19  ;;  %v3969_v63 = vcombine.high %v7786_v42, %v7786_v42 }
 0x26f   : > { %v3524_v11 = vcombine.high %v3522_v46, %v3522_v46  ;;  %v3538_v1 = vrot.slane %v3522_v46, %v6480_v58  ;;  %v3545_v24 = vrot.slane %v3523_v41, %v6480_v58  ;;  %v3553_v51 = vcombine.high %v3531_v43, %v3531_v43 }
 0x270   : > { %v3970_v48 = vcombine.high %v7792_v6, %v7792_v6  ;;  %v3971_v29 = vcombine.high %v7795_v2, %v7795_v2  ;;  %v7818_v33 = vrot.slane %v3968_v16, %v6485_v5  ;;  %v7821_v37 = vrot.slane %v3969_v63, %v6485_v5 }
 0x271   : > { %v3552_v22 = vrot.slane %v3524_v11, %v6480_v58  ;;  %v3554_v39 = vcombine.high %v3538_v1, %v3538_v1  ;;  %v4438_v16 = vsel %vm3141_vm15, %v3531_v43, %v4265_v15  ;;  %v4442_v46 = vsel %vm3141_vm15, %v3538_v1, %v4281_v28 }
 0x272   : > { %v7825_v55 = vrot.slane %v3970_v48, %v6485_v5  ;;  %v7828_v23 = vrot.slane %v3971_v29, %v6485_v5  ;;  %v3555_v63 = vcombine.high %v3545_v24, %v3545_v24  ;;  %v4439_v41 = vsel %vm3141_vm15, %v3545_v24, %v4269_v61 }
 0x273   : > { %v4440_v48 = vsel %vm3141_vm15, %v3553_v51, %v7664_v44  ;;  %v3417_v29 = vrot.slane %v7556_v9, %v6480_v58  ;;  %v3556_v60 = vcombine.high %v3552_v22, %v3552_v22  ;;  %v4443_v56 = vsel %vm3141_vm15, %v3552_v22, %v4285_v45 }
 0x274   : > { %v4444_v15 = vsel %vm3141_vm15, %v3554_v39, %v7674_v40  ;;  %v5024_v28 = vcombine.low %v4438_v16, %v4439_v41  ;;  %v4441_v26 = vsel %vm3141_vm15, %v3555_v63, %v7671_v31  ;;  %v5041_v61 = vcombine.low %v4442_v46, %v4443_v56 }
 0x275   : > { %v3424_v43 = vrot.slane %v3410_v34, %v6480_v58  ;;  %v3425_v44 = vcombine.high %v3417_v29, %v3417_v29  ;;  %v4445_v9 = vsel %vm3141_vm15, %v3556_v60, %v7677_v30  ;;  %v5025_v24 = vcombine.low %v4440_v48, %v4441_v26 }
 0x276   : > { %v5032_v51 = vrot.slane %v5024_v28, %v6488_v35  ;;  %v3433_v32 = vrot.slane %v3417_v29, %v6480_v58  ;;  %v5042_v45 = vcombine.low %v4444_v15, %v4445_v9  ;;  %v5049_v22 = vrot.slane %v5041_v61, %v6488_v35 }
 0x277   : > { %v3426_v40 = vcombine.high %v3424_v43, %v3424_v43  ;;  %v3440_v39 = vrot.slane %v3424_v43, %v6480_v58  ;;  %v5039_v31 = vrot.slane %v5025_v24, %v6488_v35  ;;  %v3447_v34 = vrot.slane %v3425_v44, %v6480_v58 }
 0x278   : > { %v3455_v11 = vcombine.high %v3433_v32, %v3433_v32  ;;  %v4422_v30 = vsel %vm3141_vm15, %v3433_v32, %v4201_v27  ;;  %v5056_v1 = vrot.slane %v5042_v45, %v6488_v35  ;;  %v3564_v13 = vrot.slane %v7560_v8, %v6480_v58 }
 0x279   : > { %v3454_v16 = vrot.slane %v3426_v40, %v6480_v58  ;;  %v3456_v46 = vcombine.high %v3440_v39, %v3440_v39  ;;  %v4426_v63 = vsel %vm3141_vm15, %v3440_v39, %v4217_v3  ;;  %v5040_v41 = vcombine.low %v5032_v51, %v5039_v31 }
 0x27a   : > { %v3457_v48 = vcombine.high %v3447_v34, %v3447_v34  ;;  %v4423_v21 = vsel %vm3141_vm15, %v3447_v34, %v4205_v52  ;;  %v4424_v27 = vsel %vm3141_vm15, %v3455_v11, %v7733_v18  ;;  %v5057_v29 = vcombine.low %v5049_v22, %v5056_v1 }
 0x27b   : > { %v3458_v60 = vcombine.high %v3454_v16, %v3454_v16  ;;  %v4427_v56 = vsel %vm3141_vm15, %v3454_v16, %v4221_v57  ;;  %v4428_v7 = vsel %vm3141_vm15, %v3456_v46, %v7743_v12  ;;  %5184 = vst [vmem:[%s6734_s8 + $0xd0] sm:$0xff] %v5040_v41  ;;  %v4888_v49 = vcombine.low %v4422_v30, %v4423_v21 }
 0x27c   : > { %v4425_v3 = vsel %vm3141_vm15, %v3457_v48, %v7749_v20  ;;  %v4905_v15 = vcombine.low %v4426_v63, %v4427_v56  ;;  %v3557_v52 = vcombine.high %v7560_v8, %v7560_v8  ;;  %5185 = vst [vmem:[%s6734_s8 + $0xd8] sm:$0xff] %v5057_v29  ;;  %v3459_v57 = vcombine.high %v7568_v50, %v7568_v50 }
 0x27d   : > { %v4429_v18 = vsel %vm3141_vm15, %v3458_v60, %v7758_v10  ;;  %v4889_v28 = vcombine.low %v4424_v27, %v4425_v3  ;;  %v4896_v12 = vrot.slane %v4888_v49, %v6488_v35  ;;  %v3572_v44 = vcombine.high %v3564_v13, %v3564_v13 }
 0x27e   : > { %v4906_v26 = vcombine.low %v4428_v7, %v4429_v18  ;;  %v4913_v20 = vrot.slane %v4905_v15, %v6488_v35  ;;  %v3571_v61 = vrot.slane %v3557_v52, %v6480_v58  ;;  %v3580_v10 = vrot.slane %v3564_v13, %v6480_v58 }
 0x27f   : > { %v4903_v43 = vrot.slane %v4889_v28, %v6488_v35  ;;  %v3466_v9 = vrot.slane %v7568_v50, %v6480_v58  ;;  %v3473_v32 = vrot.slane %v3459_v57, %v6480_v58  ;;  %v3594_v22 = vrot.slane %v3572_v44, %v6480_v58 }
 0x280   : > { %v4920_v8 = vrot.slane %v4906_v26, %v6488_v35  ;;  %v3573_v24 = vcombine.high %v3571_v61, %v3571_v61  ;;  %v3587_v51 = vrot.slane %v3571_v61, %v6480_v58  ;;  %v3602_v40 = vcombine.high %v3580_v10, %v3580_v10 }
 0x281   : > { %v4904_v45 = vcombine.low %v4896_v12, %v4903_v43  ;;  %v4446_v39 = vsel %vm3141_vm15, %v3580_v10, %v4297_v4  ;;  %v3604_v30 = vcombine.high %v3594_v22, %v3594_v22  ;;  %v4447_v1 = vsel %vm3141_vm15, %v3594_v22, %v4301_v62 }
 0x282   : > { %v4921_v31 = vcombine.low %v4913_v20, %v4920_v8  ;;  %v3601_v50 = vrot.slane %v3573_v24, %v6480_v58  ;;  %v3603_v34 = vcombine.high %v3587_v51, %v3587_v51  ;;  %v4450_v11 = vsel %vm3141_vm15, %v3587_v51, %v4313_v25 }
 0x283   : > { %5176 = vst [vmem:[%s6734_s8 + $0x90] sm:$0xff] %v4904_v45  ;;  %v4448_v59 = vsel %vm3141_vm15, %v3602_v40, %v7767_v47  ;;  %v3474_v4 = vcombine.high %v3466_v9, %v3466_v9  ;;  %v5092_v46 = vcombine.low %v4446_v39, %v4447_v1  ;;  %v4449_v38 = vsel %vm3141_vm15, %v3604_v30, %v7770_v14 }
 0x284   : > { %5177 = vst [vmem:[%s6734_s8 + $0x98] sm:$0xff] %v4921_v31  ;;  %v3605_v16 = vcombine.high %v3601_v50, %v3601_v50  ;;  %v4451_v53 = vsel %vm3141_vm15, %v3601_v50, %v4317_v17  ;;  %v4452_v25 = vsel %vm3141_vm15, %v3603_v34, %v7777_v36  ;;  %v3475_v62 = vcombine.high %v3473_v32, %v3473_v32 }
 0x285   : > { %v5109_v63 = vcombine.low %v4450_v11, %v4451_v53  ;;  %v3482_v41 = vrot.slane %v3466_v9, %v6480_v58  ;;  %v5093_v48 = vcombine.low %v4448_v59, %v4449_v38  ;;  %v5100_v21 = vrot.slane %v5092_v46, %v6488_v35 }
 0x286   : > { %v4453_v47 = vsel %vm3141_vm15, %v3605_v16, %v7780_v0  ;;  %v3489_v54 = vrot.slane %v3473_v32, %v6480_v58  ;;  %v3496_v36 = vrot.slane %v3474_v4, %v6480_v58  ;;  %v3503_v29 = vrot.slane %v3475_v62, %v6480_v58 }
 0x287   : > { %v5110_v17 = vcombine.low %v4452_v25, %v4453_v47  ;;  %v5117_v27 = vrot.slane %v5109_v63, %v6488_v35  ;;  %v5107_v14 = vrot.slane %v5093_v48, %v6488_v35  ;;  %v3504_v60 = vcombine.high %v3482_v41, %v3482_v41 }
 0x288   : > { %v3505_v56 = vcombine.high %v3489_v54, %v3489_v54  ;;  %v8044_v0 = vrot.slane %v7783_v19, %v6485_v5  ;;  %v3506_v49 = vcombine.high %v3496_v36, %v3496_v36  ;;  %v3507_v15 = vcombine.high %v3503_v29, %v3503_v29 }
 0x289   : > { %v5124_v3 = vrot.slane %v5110_v17, %v6488_v35  ;;  %v8045_v52 = vrot.slane %v7792_v6, %v6485_v5  ;;  %v5108_v18 = vcombine.low %v5100_v21, %v5107_v14  ;;  %v4432_v28 = vsel %vm3141_vm15, %v3504_v60, %v7818_v33 }
 0x28a   : > { %v4430_v7 = vsel %vm3141_vm15, %v3482_v41, %v8044_v0  ;;  %v8046_v13 = vrot.slane %v7786_v42, %v6485_v5  ;;  %v8047_v57 = vrot.slane %v7795_v2, %v6485_v5  ;;  %v4433_v6 = vsel %vm3141_vm15, %v3506_v49, %v7825_v55 }
 0x28b   : > { %v4431_v58 = vsel %vm3141_vm15, %v3496_v36, %v8045_v52  ;;  %v5125_v26 = vcombine.low %v5117_v27, %v5124_v3  ;;  %v4436_v20 = vsel %vm3141_vm15, %v3505_v56, %v7821_v37  ;;  %v4437_v33 = vsel %vm3141_vm15, %v3507_v15, %v7828_v23  ;;  %5188 = vst [vmem:[%s6734_s8 + $0xf0] sm:$0xff] %v5108_v18 }
 0x28c   : > { %v4434_v19 = vsel %vm3141_vm15, %v3489_v54, %v8046_v13  ;;  %v4435_v12 = vsel %vm3141_vm15, %v3503_v29, %v8047_v57  ;;  %v4956_v42 = vcombine.low %v4430_v7, %v4431_v58  ;;  %v4957_v61 = vcombine.low %v4432_v28, %v4433_v6 }
 0x28d   : > { %v4973_v43 = vcombine.low %v4434_v19, %v4435_v12  ;;  %v4974_v44 = vcombine.low %v4436_v20, %v4437_v33  ;;  %5189 = vst [vmem:[%s6734_s8 + $0xf8] sm:$0xff] %v5125_v26 }
 0x28e   : > { %v4964_v5 = vrot.slane %v4956_v42, %v6488_v35  ;;  %v4971_v2 = vrot.slane %v4957_v61, %v6488_v35 }
 0x28f   : > { %v4981_v10 = vrot.slane %v4973_v43, %v6488_v35  ;;  %v4988_v55 = vrot.slane %v4974_v44, %v6488_v35 }
 0x290   : > { %v4972_v9 = vcombine.low %v4964_v5, %v4971_v2 }
 0x291   : > { %v4989_v8 = vcombine.low %v4981_v10, %v4988_v55 }
 0x292   : > { %5180 = vst [vmem:[%s6734_s8 + $0xb0] sm:$0xff] %v4972_v9 }
 0x293   : > { %5181 = vst [vmem:[%s6734_s8 + $0xb8] sm:$0xff] %v4989_v8 }
 0x294 PF: > { %s15_s18 = sadd.s32 1, %s5709_s18  }
 0x295   : > { %p12_p4 = scmp.ge.s32.totalorder %s15_s18, 4  }
 0x297   :  { %14 = sbr.rel (!%p12_p4) target bundleno = 1 (0x1), region = 81 }

</bundles_post_ra>
